<compile_context>
chip_gen: v5e
topology: v5e:2x2
jax: 0.10.0
libtpu: 0.0.40
codegen_flags: <defaults>
</compile_context>

<pallas_src>
import functools
import math

import jax
import jax.numpy as jnp
from jax.experimental import pallas as pl
from jax.experimental.pallas import tpu as pltpu

_NEG_SENTINEL = -1e30   # "no edge" marker in the dense attention-logit matrix
_NEG_THRESH = -1e29     # anything below this is treated as "no edge"


def _pick_tile(n, target, gran):
    """Largest multiple of `gran` that divides n and is <= target; else n (full dim)."""
    if n <= target:
        return n
    t = (target // gran) * gran
    while t >= gran:
        if n % t == 0:
            return t
        t -= gran
    return n


# --------------------------- 1) plain aggregate ----------------------------

def _matmul_kernel(a_ref, b_ref, o_ref, acc_ref):
    k = pl.program_id(1)

    @pl.when(k == 0)
    def _():
        acc_ref[...] = jnp.zeros_like(acc_ref)

    acc_ref[...] += jnp.dot(a_ref[...], b_ref[...],
                            preferred_element_type=jnp.float32)

    @pl.when(k == pl.num_programs(1) - 1)
    def _():
        o_ref[...] = acc_ref[...]


def aggregate(A_in, ego):
    """Aggregator layer: side_embeddings = A_in @ ego (tiled, pipelined).

    TODO(synk): message_dropout is stochastic; implemented as identity (eval mode).
    """
    n, d = ego.shape
    tm = _pick_tile(n, 256, 8)       # row tile (sublane-aligned)
    tk = _pick_tile(n, 512, 128)     # reduction tile (lane-aligned)
    # D is small (<=256) so the output width is kept untiled (lane-dense, full dim).
    return pl.pallas_call(
        _matmul_kernel,
        out_shape=jax.ShapeDtypeStruct((n, d), jnp.float32),
        grid=(n // tm, n // tk),
        in_specs=[pl.BlockSpec((tm, tk), lambda i, k: (i, k)),
                  pl.BlockSpec((tk, d), lambda i, k: (k, 0))],
        out_specs=pl.BlockSpec((tm, d), lambda i, k: (i, 0)),
        scratch_shapes=[pltpu.VMEM((tm, d), jnp.float32)],
        compiler_params=pltpu.CompilerParams(
            dimension_semantics=("parallel", "arbitrary")),
    )(A_in, ego)


# ------------------ 2) fused sparse-row-softmax + aggregate ----------------

def _softmax_matmul_kernel(a_ref, e_ref, o_ref, m_sc, l_sc, acc_sc):
    k = pl.program_id(1)

    @pl.when(k == 0)
    def _():
        m_sc[...] = jnp.full_like(m_sc, -jnp.inf)
        l_sc[...] = jnp.zeros_like(l_sc)
        acc_sc[...] = jnp.zeros_like(acc_sc)

    s = a_ref[...]                                          # (tm, tk) logits
    m_prev = m_sc[...]
    m_new = jnp.maximum(m_prev, jnp.max(s, axis=-1, keepdims=True))
    corr = jnp.exp(m_prev - m_new)
    # entries at the sentinel are "absent" in the sparse matrix -> contribute 0
    p = jnp.where(s > _NEG_THRESH, jnp.exp(s - m_new), 0.0)
    l_sc[...] = corr * l_sc[...] + jnp.sum(p, axis=-1, keepdims=True)
    acc_sc[...] = corr * acc_sc[...] + jnp.dot(
        p, e_ref[...], preferred_element_type=jnp.float32)
    m_sc[...] = m_new

    @pl.when(k == pl.num_programs(1) - 1)
    def _():
        # empty rows (l == 0) produce 0, matching torch.sparse.softmax semantics
        o_ref[...] = acc_sc[...] / jnp.maximum(l_sc[...], 1e-30)


def softmax_aggregate(logits, ego):
    """ego <- row_softmax_over_edges(logits) @ ego  (online softmax, fused)."""
    n, d = ego.shape
    tm = _pick_tile(n, 256, 8)
    tk = _pick_tile(n, 512, 128)
    return pl.pallas_call(
        _softmax_matmul_kernel,
        out_shape=jax.ShapeDtypeStruct((n, d), jnp.float32),
        grid=(n // tm, n // tk),
        in_specs=[pl.BlockSpec((tm, tk), lambda i, k: (i, k)),
                  pl.BlockSpec((tk, d), lambda i, k: (k, 0))],
        out_specs=pl.BlockSpec((tm, d), lambda i, k: (i, 0)),
        scratch_shapes=[pltpu.VMEM((tm, 1), jnp.float32),
                        pltpu.VMEM((tm, 1), jnp.float32),
                        pltpu.VMEM((tm, d), jnp.float32)],
        compiler_params=pltpu.CompilerParams(
            dimension_semantics=("parallel", "arbitrary")),
    )(logits, ego)


# ----------------------- 3) KG per-relation projection ---------------------

def _kg_project_kernel(ego_ref, w_ref, o_ref):
    o_ref[0] = jnp.dot(ego_ref[...], w_ref[0],
                       preferred_element_type=jnp.float32)


def kg_project(ego, trans_M):
    """proj[r] = ego @ W_r, computed once per relation per hop (hoisted)."""
    n, d = ego.shape
    r = trans_M.shape[0]
    tm = _pick_tile(n, 512, 8)
    return pl.pallas_call(
        _kg_project_kernel,
        out_shape=jax.ShapeDtypeStruct((r, n, d), jnp.float32),
        grid=(r, n // tm),
        in_specs=[pl.BlockSpec((tm, d), lambda ri, i: (i, 0)),
                  pl.BlockSpec((1, d, d), lambda ri, i: (ri, 0, 0))],
        out_specs=pl.BlockSpec((1, tm, d), lambda ri, i: (ri, i, 0)),
        compiler_params=pltpu.CompilerParams(
            dimension_semantics=("parallel", "parallel")),
    )(ego, trans_M)


# --------------------- 4) KG attention values (all relations) --------------

def _kg_attn_kernel(mh_ref, mt_ref, r_ref, o_ref):
    v = jnp.tanh(mt_ref[...]) * mh_ref[...]                 # (R, te, D)
    r_sum = jnp.sum(r_ref[...], axis=-1, keepdims=True)     # (R, 1)
    o_ref[...] = jnp.sum(v, axis=-1) + r_sum                # lane-dense (R, te)


def kg_attention_values(Mh, Mt, r_embed):
    """v[r, e] = sum(tanh(Mt[r,e]) * Mh[r,e] + r_embed[r], axis=-1)."""
    r, e, d = Mh.shape
    te = _pick_tile(e, 512, 128)
    return pl.pallas_call(
        _kg_attn_kernel,
        out_shape=jax.ShapeDtypeStruct((r, e), jnp.float32),
        grid=(e // te,),
        in_specs=[pl.BlockSpec((r, te, d), lambda i: (0, i, 0)),
                  pl.BlockSpec((r, te, d), lambda i: (0, i, 0)),
                  pl.BlockSpec((r, d), lambda i: (0, 0))],
        out_specs=pl.BlockSpec((r, te), lambda i: (0, i)),
        compiler_params=pltpu.CompilerParams(dimension_semantics=("parallel",)),
    )(Mh, Mt, r_embed)


# -------------------- 5) fused local aggregator (item + KG) ----------------

def _local_agg_fused_kernel(hn_ref, hk_ref, adj_ref, a_ref, o_ref, *, leaky_alpha):
    adj = adj_ref[...]                                      # (bb, L, L) int32
    a = a_ref[...]                                          # (4, D)
    neg = jnp.full(adj.shape, -9e15, jnp.float32)
    masks = [adj == (k + 1) for k in range(4)]              # shared by both passes

    def attend(h):
        # MXU form of e_k[i,j] = sum_d a_k[d] * leakyrelu(h[i,d]*h[j,d]) using
        # leakyrelu(x) = x + (alpha-1)*min(x,0) and
        # min(h_i*h_j,0) = relu(h_i)*min(h_j,0) + min(h_i,0)*relu(h_j).
        hp = jnp.maximum(h, 0.0)
        hm = jnp.minimum(h, 0.0)
        att = neg
        for k in range(4):
            ak = a[k]                                       # (D,)
            e_main = jnp.einsum('bld,bmd->blm', h * ak, h,
                                preferred_element_type=jnp.float32)
            e_neg = (jnp.einsum('bld,bmd->blm', hp * ak, hm,
                                preferred_element_type=jnp.float32)
                     + jnp.einsum('bld,bmd->blm', hm * ak, hp,
                                  preferred_element_type=jnp.float32))
            e_k = e_main + (leaky_alpha - 1.0) * e_neg
            att = jnp.where(masks[k], e_k, att)
        att = att - jnp.max(att, axis=-1, keepdims=True)
        p = jnp.exp(att)
        p = p / jnp.sum(p, axis=-1, keepdims=True)          # softmax over last dim
        return jnp.einsum('blm,bmd->bld', p, h,
                          preferred_element_type=jnp.float32)

    o_ref[...] = attend(hn_ref[...]) + attend(hk_ref[...])  # hidden + kg_hidden


def local_aggregator_fused(h_node, h_kg, adj, a_params, leaky_alpha):
    b, l, d = h_node.shape
    if b <= 16:
        bb = b
    else:
        bb = next(c for c in (16, 8, 4, 2, 1) if b % c == 0)
    kernel = functools.partial(_local_agg_fused_kernel, leaky_alpha=leaky_alpha)
    return pl.pallas_call(
        kernel,
        out_shape=jax.ShapeDtypeStruct((b, l, d), jnp.float32),
        grid=(b // bb,),
        in_specs=[pl.BlockSpec((bb, l, d), lambda i: (i, 0, 0)),
                  pl.BlockSpec((bb, l, d), lambda i: (i, 0, 0)),
                  pl.BlockSpec((bb, l, l), lambda i: (i, 0, 0)),
                  pl.BlockSpec((4, d), lambda i: (0, 0))],
        out_specs=pl.BlockSpec((bb, l, d), lambda i: (i, 0, 0)),
        compiler_params=pltpu.CompilerParams(dimension_semantics=("parallel",)),
    )(h_node, h_kg, adj, a_params)


# ------------------------------ forward pass -------------------------------

def session_graph_forward(params, edges, inputs, A, mask_item, *, hop, leaky_alpha):
    """Mirrors SessionGraph.forward(inputs, A, mask_item) -> (hidden, node_embeds)."""
    del mask_item  # unused by LocalAggregator.forward (matches PyTorch code)
    ego = params["embedding"]                      # (n_node, D)
    origin = ego
    n_node = ego.shape[0]
    h_idx = edges["h"]                             # (R, E) int32
    t_idx = edges["t"]                             # (R, E) int32
    R = h_idx.shape[0]

    all_embed = []
    pending_logits = None
    for idx in range(hop):
        if idx == 0:
            ego = aggregate(params["A_in"], ego)               # frozen initial A_in
        else:
            # sparse.softmax(A_in, dim=1) fused into this hop's aggregate
            ego = softmax_aggregate(pending_logits, ego)
        all_embed.append(ego)

        if idx < hop - 1:
            # update_attention_batch for all relations: hoisted projection + gather.
            proj = kg_project(ego, params["trans_M"])          # (R, n_node, D)
            rr = jnp.arange(R, dtype=jnp.int32)[:, None]
            Mh = proj[rr, h_idx]                               # (R, E, D) gather (glue)
            Mt = proj[rr, t_idx]
            vals = kg_attention_values(Mh, Mt, params["r_embed"])   # (R, E)
            # Dense sentinel-encoded logits (stand-in for torch.sparse.FloatTensor).
            # TODO(synk): duplicate (h,t) pairs across relations are last-wins here
            # (torch.sparse coalescing would sum); edge lists used are duplicate-free.
            dense = jnp.full((n_node, n_node), _NEG_SENTINEL, jnp.float32)
            pending_logits = dense.at[h_idx.reshape(-1),
                                      t_idx.reshape(-1)].set(vals.reshape(-1))
        # TODO(synk): the final-hop refresh of self.A_in (module-state side effect,
        # not used by this forward's outputs) is omitted.

    kg_embed = all_embed[0]
    for i in range(1, hop):
        kg_embed = kg_embed + all_embed[i]
    kg_embed = kg_embed / hop

    item_embeds = origin[inputs]                   # (B, L, D) gather (glue)
    kg_embeds = kg_embed[inputs]                   # (B, L, D)
    node_embeds = item_embeds

    # local_agg on item embeddings + local_agg on KG embeddings, fused & summed.
    hidden = local_aggregator_fused(node_embeds, kg_embeds, A,
                                    params["a_cat"], leaky_alpha)
    return hidden, node_embeds


# ---------------------------------- main -----------------------------------

if __name__ == "__main__":
    B, L, D = 2, 8, 32                    # batch, session length, hiddenSize
    n_node, n_relation, hop = 64, 4, 2
    leaky_alpha = 0.2
    stdv = 1.0 / math.sqrt(D)

    key = jax.random.PRNGKey(0)
    keys = jax.random.split(key, 8)

    params = {
        "embedding": jax.random.uniform(keys[0], (n_node, D), jnp.float32, -stdv, stdv),
        "r_embed":   jax.random.uniform(keys[1], (n_relation, D), jnp.float32, -stdv, stdv),
        "trans_M":   jax.random.uniform(keys[2], (n_relation, D, D), jnp.float32, -stdv, stdv),
        # a_cat[k] == LocalAggregator.a_k.squeeze(-1)
        "a_cat":     jax.random.uniform(keys[3], (4, D), jnp.float32, -stdv, stdv),
    }
    # Frozen initial A_in (dense stand-in for the sparse normalized KG adjacency).
    a_raw = jax.random.uniform(keys[4], (n_node, n_node), jnp.float32)
    params["A_in"] = a_raw / jnp.sum(a_raw, axis=1, keepdims=True)

    # KG triples: for relation r, edge i -> (i + r + 1) % n_node (unique (h,t) pairs,
    # fixed per-relation edge count so per-relation selection has static shapes).
    edges = {
        "h": jnp.stack([jnp.arange(n_node, dtype=jnp.int32)
                        for _ in range(n_relation)]),
        "t": jnp.stack([(jnp.arange(n_node, dtype=jnp.int32) + r + 1) % n_node
                        for r in range(n_relation)]),
    }

    inputs = jax.random.randint(keys[5], (B, L), 0, n_node, jnp.int32)
    A = jax.random.randint(keys[6], (B, L, L), 0, 5, jnp.int32)   # edge codes 0..4
    mask_item = jnp.ones((B, L), jnp.int32)

    fwd = jax.jit(functools.partial(session_graph_forward,
                                    hop=hop, leaky_alpha=leaky_alpha))
    hidden, node_embeds = fwd(params, edges, inputs, A, mask_item)
    jax.block_until_ready((hidden, node_embeds))
    assert hidden.shape == (B, L, D) and node_embeds.shape == (B, L, D)
    print("KERNEL_OK")
</pallas_src>

<mosaic_0001>
module attributes {stable_mosaic.version = 11 : i64} {
  func.func @_kg_project_kernel(%arg0: i32, %arg1: i32, %arg2: memref<64x32xf32, #tpu.memory_space<vmem>>, %arg3: memref<1x32x32xf32, #tpu.memory_space<vmem>>, %arg4: memref<1x64x32xf32, #tpu.memory_space<vmem>>) attributes {dimension_semantics = [#tpu.dimension_semantics<parallel>, #tpu.dimension_semantics<parallel>], iteration_bounds = array<i64: 4, 1>, scalar_prefetch = 0 : i64, scratch_operands = 0 : i64, tpu.core_type = #tpu.core_type<tc>, window_params = [{transform_indices = @transform_0, window_bounds = array<i64: 64, 32>}, {transform_indices = @transform_1, window_bounds = array<i64: 1, 32, 32>}, {transform_indices = @transform_2, window_bounds = array<i64: 1, 64, 32>}]} {
    %c0 = arith.constant 0 : index
    %c0_0 = arith.constant 0 : index
    %0 = vector.load %arg2[%c0, %c0_0] : memref<64x32xf32, #tpu.memory_space<vmem>>, vector<64x32xf32>
    %c0_1 = arith.constant 0 : index
    %c0_2 = arith.constant 0 : index
    %c0_3 = arith.constant 0 : index
    %1 = vector.load %arg3[%c0_1, %c0_2, %c0_3] : memref<1x32x32xf32, #tpu.memory_space<vmem>>, vector<1x32x32xf32>
    %2 = vector.shape_cast %1 : vector<1x32x32xf32> to vector<32x32xf32>
    %cst = arith.constant dense<0.000000e+00> : vector<64x32xf32>
    %3 = tpu.matmul %0, %2, %cst {dimension_numbers = #tpu.dot_dimension_numbers<[1], [0], [0], [1], [0, 0, 1, 1], [], []>} : vector<64x32xf32>, vector<32x32xf32>, vector<64x32xf32> -> vector<64x32xf32>
    %c0_4 = arith.constant 0 : index
    %c0_5 = arith.constant 0 : index
    %c0_6 = arith.constant 0 : index
    %4 = vector.load %arg4[%c0_4, %c0_5, %c0_6] : memref<1x64x32xf32, #tpu.memory_space<vmem>>, vector<1x64x32xf32>
    %5 = vector.shape_cast %4 : vector<1x64x32xf32> to vector<64x32xf32>
    %6 = vector.shape_cast %3 : vector<64x32xf32> to vector<1x64x32xf32>
    tpu.vector_store %arg4[%c0_4, %c0_5, %c0_6], %6 {strides = array<i32>} : memref<1x64x32xf32, #tpu.memory_space<vmem>>, vector<1x64x32xf32>,
    return
  }
  func.func @transform_0(%arg0: i32, %arg1: i32) -> (i32, i32) {
    %c0_i32 = arith.constant 0 : i32
    %c0_i32_0 = arith.constant 0 : i32
    return %arg1, %c0_i32 : i32, i32
  }
  func.func @transform_1(%arg0: i32, %arg1: i32) -> (i32, i32, i32) {
    %c0_i32 = arith.constant 0 : i32
    %c0_i32_0 = arith.constant 0 : i32
    %c0_i32_1 = arith.constant 0 : i32
    return %arg0, %c0_i32, %c0_i32_0 : i32, i32, i32
  }
  func.func @transform_2(%arg0: i32, %arg1: i32) -> (i32, i32, i32) {
    %c0_i32 = arith.constant 0 : i32
    %c0_i32_0 = arith.constant 0 : i32
    return %arg0, %arg1, %c0_i32 : i32, i32, i32
  }
}

module attributes {stable_mosaic.version = 11 : i64} {
  func.func @_matmul_kernel(%arg0: i32, %arg1: i32, %arg2: memref<64x64xf32, #tpu.memory_space<vmem>>, %arg3: memref<64x32xf32, #tpu.memory_space<vmem>>, %arg4: memref<64x32xf32, #tpu.memory_space<vmem>>, %arg5: memref<64x32xf32, #tpu.memory_space<vmem>>) attributes {dimension_semantics = [#tpu.dimension_semantics<parallel>, #tpu.dimension_semantics<arbitrary>], iteration_bounds = array<i64: 1, 1>, scalar_prefetch = 0 : i64, scratch_operands = 1 : i64, tpu.core_type = #tpu.core_type<tc>, window_params = [{transform_indices = @transform_0, window_bounds = array<i64: 64, 64>}, {transform_indices = @transform_1, window_bounds = array<i64: 64, 32>}, {transform_indices = @transform_2, window_bounds = array<i64: 64, 32>}]} {
    %c0_i32 = arith.constant 0 : i32
    %0 = arith.cmpi eq, %arg1, %c0_i32 : i32
    %1 = arith.extui %0 : i1 to i32
    %c0_i32_0 = arith.constant 0 : i32
    %2 = arith.cmpi ne, %1, %c0_i32_0 : i32
    scf.if %2 {
      %cst_10 = arith.constant 0.000000e+00 : f32
      %12 = vector.broadcast %cst_10 : f32 to vector<64x32xf32>
      %c0_11 = arith.constant 0 : index
      %c0_12 = arith.constant 0 : index
      %13 = vector.load %arg5[%c0_11, %c0_12] : memref<64x32xf32, #tpu.memory_space<vmem>>, vector<64x32xf32>
      tpu.vector_store %arg5[%c0_11, %c0_12], %12 {strides = array<i32>} : memref<64x32xf32, #tpu.memory_space<vmem>>, vector<64x32xf32>,
    } else {
    }
    %c0 = arith.constant 0 : index
    %c0_1 = arith.constant 0 : index
    %3 = vector.load %arg5[%c0, %c0_1] : memref<64x32xf32, #tpu.memory_space<vmem>>, vector<64x32xf32>
    %c0_2 = arith.constant 0 : index
    %c0_3 = arith.constant 0 : index
    %4 = vector.load %arg2[%c0_2, %c0_3] : memref<64x64xf32, #tpu.memory_space<vmem>>, vector<64x64xf32>
    %c0_4 = arith.constant 0 : index
    %c0_5 = arith.constant 0 : index
    %5 = vector.load %arg3[%c0_4, %c0_5] : memref<64x32xf32, #tpu.memory_space<vmem>>, vector<64x32xf32>
    %cst = arith.constant dense<0.000000e+00> : vector<64x32xf32>
    %6 = tpu.matmul %4, %5, %cst {dimension_numbers = #tpu.dot_dimension_numbers<[1], [0], [0], [1], [0, 0, 1, 1], [], []>} : vector<64x64xf32>, vector<64x32xf32>, vector<64x32xf32> -> vector<64x32xf32>
    %7 = arith.addf %3, %6 : vector<64x32xf32>
    %c0_6 = arith.constant 0 : index
    %c0_7 = arith.constant 0 : index
    %8 = vector.load %arg5[%c0_6, %c0_7] : memref<64x32xf32, #tpu.memory_space<vmem>>, vector<64x32xf32>
    tpu.vector_store %arg5[%c0_6, %c0_7], %7 {strides = array<i32>} : memref<64x32xf32, #tpu.memory_space<vmem>>, vector<64x32xf32>,
    %c0_i32_8 = arith.constant 0 : i32
    %9 = arith.cmpi eq, %arg1, %c0_i32_8 : i32
    %10 = arith.extui %9 : i1 to i32
    %c0_i32_9 = arith.constant 0 : i32
    %11 = arith.cmpi ne, %10, %c0_i32_9 : i32
    scf.if %11 {
      %c0_10 = arith.constant 0 : index
      %c0_11 = arith.constant 0 : index
      %12 = vector.load %arg5[%c0_10, %c0_11] : memref<64x32xf32, #tpu.memory_space<vmem>>, vector<64x32xf32>
      %c0_12 = arith.constant 0 : index
      %c0_13 = arith.constant 0 : index
      %13 = vector.load %arg4[%c0_12, %c0_13] : memref<64x32xf32, #tpu.memory_space<vmem>>, vector<64x32xf32>
      tpu.vector_store %arg4[%c0_12, %c0_13], %12 {strides = array<i32>} : memref<64x32xf32, #tpu.memory_space<vmem>>, vector<64x32xf32>,
    } else {
    }
    return
  }
  func.func @transform_0(%arg0: i32, %arg1: i32) -> (i32, i32) {
    %c0_i32 = arith.constant 0 : i32
    return %arg0, %arg1 : i32, i32
  }
  func.func @transform_1(%arg0: i32, %arg1: i32) -> (i32, i32) {
    %c0_i32 = arith.constant 0 : i32
    %c0_i32_0 = arith.constant 0 : i32
    return %arg1, %c0_i32 : i32, i32
  }
  func.func @transform_2(%arg0: i32, %arg1: i32) -> (i32, i32) {
    %c0_i32 = arith.constant 0 : i32
    %c0_i32_0 = arith.constant 0 : i32
    return %arg0, %c0_i32 : i32, i32
  }
}

module attributes {stable_mosaic.version = 11 : i64} {
  func.func @_kg_attn_kernel(%arg0: i32, %arg1: memref<4x64x32xf32, #tpu.memory_space<vmem>>, %arg2: memref<4x64x32xf32, #tpu.memory_space<vmem>>, %arg3: memref<4x32xf32, #tpu.memory_space<vmem>>, %arg4: memref<4x64xf32, #tpu.memory_space<vmem>>) attributes {dimension_semantics = [#tpu.dimension_semantics<parallel>], iteration_bounds = array<i64: 1>, scalar_prefetch = 0 : i64, scratch_operands = 0 : i64, tpu.core_type = #tpu.core_type<tc>, window_params = [{transform_indices = @transform_0, window_bounds = array<i64: 4, 64, 32>}, {transform_indices = @transform_1, window_bounds = array<i64: 4, 64, 32>}, {pipeline_mode = #tpu.pipeline_mode<synchronous>, transform_indices = @transform_2, window_bounds = array<i64: 4, 32>}, {transform_indices = @transform_3, window_bounds = array<i64: 4, 64>}]} {
    %c0 = arith.constant 0 : index
    %c0_0 = arith.constant 0 : index
    %c0_1 = arith.constant 0 : index
    %0 = vector.load %arg2[%c0, %c0_0, %c0_1] : memref<4x64x32xf32, #tpu.memory_space<vmem>>, vector<4x64x32xf32>
    %1 = math.tanh %0 : vector<4x64x32xf32>
    %c0_2 = arith.constant 0 : index
    %c0_3 = arith.constant 0 : index
    %c0_4 = arith.constant 0 : index
    %2 = vector.load %arg1[%c0_2, %c0_3, %c0_4] : memref<4x64x32xf32, #tpu.memory_space<vmem>>, vector<4x64x32xf32>
    %3 = arith.mulf %1, %2 : vector<4x64x32xf32>
    %c0_5 = arith.constant 0 : index
    %c0_6 = arith.constant 0 : index
    %4 = vector.load %arg3[%c0_5, %c0_6] : memref<4x32xf32, #tpu.memory_space<vmem>>, vector<4x32xf32>
    %cst = arith.constant dense<0.000000e+00> : vector<4xf32>
    %5 = vector.multi_reduction <add>, %4, %cst [1] : vector<4x32xf32> to vector<4xf32>
    %6 = vector.shape_cast %5 : vector<4xf32> to vector<4x1xf32>
    %cst_7 = arith.constant dense<0.000000e+00> : vector<4x64xf32>
    %7 = vector.multi_reduction <add>, %3, %cst_7 [2] : vector<4x64x32xf32> to vector<4x64xf32>
    %8 = vector.broadcast %6 : vector<4x1xf32> to vector<4x64xf32>
    %9 = arith.addf %7, %8 : vector<4x64xf32>
    %c0_8 = arith.constant 0 : index
    %c0_9 = arith.constant 0 : index
    %10 = vector.load %arg4[%c0_8, %c0_9] : memref<4x64xf32, #tpu.memory_space<vmem>>, vector<4x64xf32>
    tpu.vector_store %arg4[%c0_8, %c0_9], %9 {strides = array<i32>} : memref<4x64xf32, #tpu.memory_space<vmem>>, vector<4x64xf32>,
    return
  }
  func.func @transform_0(%arg0: i32) -> (i32, i32, i32) {
    %c0_i32 = arith.constant 0 : i32
    %c0_i32_0 = arith.constant 0 : i32
    %c0_i32_1 = arith.constant 0 : i32
    return %c0_i32, %arg0, %c0_i32_0 : i32, i32, i32
  }
  func.func @transform_1(%arg0: i32) -> (i32, i32, i32) {
    %c0_i32 = arith.constant 0 : i32
    %c0_i32_0 = arith.constant 0 : i32
    %c0_i32_1 = arith.constant 0 : i32
    return %c0_i32, %arg0, %c0_i32_0 : i32, i32, i32
  }
  func.func @transform_2(%arg0: i32) -> (i32, i32) {
    %c0_i32 = arith.constant 0 : i32
    %c0_i32_0 = arith.constant 0 : i32
    %c0_i32_1 = arith.constant 0 : i32
    return %c0_i32, %c0_i32_0 : i32, i32
  }
  func.func @transform_3(%arg0: i32) -> (i32, i32) {
    %c0_i32 = arith.constant 0 : i32
    %c0_i32_0 = arith.constant 0 : i32
    return %c0_i32, %arg0 : i32, i32
  }
}

module attributes {stable_mosaic.version = 11 : i64} {
  func.func @_softmax_matmul_kernel(%arg0: i32, %arg1: i32, %arg2: memref<64x64xf32, #tpu.memory_space<vmem>>, %arg3: memref<64x32xf32, #tpu.memory_space<vmem>>, %arg4: memref<64x32xf32, #tpu.memory_space<vmem>>, %arg5: memref<64x1xf32, #tpu.memory_space<vmem>>, %arg6: memref<64x1xf32, #tpu.memory_space<vmem>>, %arg7: memref<64x32xf32, #tpu.memory_space<vmem>>) attributes {dimension_semantics = [#tpu.dimension_semantics<parallel>, #tpu.dimension_semantics<arbitrary>], iteration_bounds = array<i64: 1, 1>, scalar_prefetch = 0 : i64, scratch_operands = 3 : i64, tpu.core_type = #tpu.core_type<tc>, window_params = [{transform_indices = @transform_0, window_bounds = array<i64: 64, 64>}, {transform_indices = @transform_1, window_bounds = array<i64: 64, 32>}, {transform_indices = @transform_2, window_bounds = array<i64: 64, 32>}]} {
    %c0_i32 = arith.constant 0 : i32
    %0 = arith.cmpi eq, %arg1, %c0_i32 : i32
    %1 = arith.extui %0 : i1 to i32
    %c0_i32_0 = arith.constant 0 : i32
    %2 = arith.cmpi ne, %1, %c0_i32_0 : i32
    scf.if %2 {
      %cst_22 = arith.constant 0xFF800000 : f32
      %34 = vector.broadcast %cst_22 : f32 to vector<64x1xf32>
      %c0_23 = arith.constant 0 : index
      %c0_24 = arith.constant 0 : index
      %35 = vector.load %arg5[%c0_23, %c0_24] : memref<64x1xf32, #tpu.memory_space<vmem>>, vector<64x1xf32>
      tpu.vector_store %arg5[%c0_23, %c0_24], %34 {strides = array<i32>} : memref<64x1xf32, #tpu.memory_space<vmem>>, vector<64x1xf32>,
      %cst_25 = arith.constant 0.000000e+00 : f32
      %36 = vector.broadcast %cst_25 : f32 to vector<64x1xf32>
      %c0_26 = arith.constant 0 : index
      %c0_27 = arith.constant 0 : index
      %37 = vector.load %arg6[%c0_26, %c0_27] : memref<64x1xf32, #tpu.memory_space<vmem>>, vector<64x1xf32>
      tpu.vector_store %arg6[%c0_26, %c0_27], %36 {strides = array<i32>} : memref<64x1xf32, #tpu.memory_space<vmem>>, vector<64x1xf32>,
      %cst_28 = arith.constant 0.000000e+00 : f32
      %38 = vector.broadcast %cst_28 : f32 to vector<64x32xf32>
      %c0_29 = arith.constant 0 : index
      %c0_30 = arith.constant 0 : index
      %39 = vector.load %arg7[%c0_29, %c0_30] : memref<64x32xf32, #tpu.memory_space<vmem>>, vector<64x32xf32>
      tpu.vector_store %arg7[%c0_29, %c0_30], %38 {strides = array<i32>} : memref<64x32xf32, #tpu.memory_space<vmem>>, vector<64x32xf32>,
    } else {
    }
    %c0 = arith.constant 0 : index
    %c0_1 = arith.constant 0 : index
    %3 = vector.load %arg2[%c0, %c0_1] : memref<64x64xf32, #tpu.memory_space<vmem>>, vector<64x64xf32>
    %c0_2 = arith.constant 0 : index
    %c0_3 = arith.constant 0 : index
    %4 = vector.load %arg5[%c0_2, %c0_3] : memref<64x1xf32, #tpu.memory_space<vmem>>, vector<64x1xf32>
    %cst = arith.constant dense<0xFF800000> : vector<64xf32>
    %5 = vector.multi_reduction <maximumf>, %3, %cst [1] : vector<64x64xf32> to vector<64xf32>
    %6 = vector.shape_cast %5 : vector<64xf32> to vector<64x1xf32>
    %7 = arith.maximumf %4, %6 : vector<64x1xf32>
    %8 = arith.subf %4, %7 : vector<64x1xf32>
    %9 = math.exp %8 : vector<64x1xf32>
    %cst_4 = arith.constant -1.000000e+29 : f32
    %10 = vector.broadcast %cst_4 : f32 to vector<64x64xf32>
    %11 = arith.cmpf ogt, %3, %10 : vector<64x64xf32>
    %12 = vector.broadcast %7 : vector<64x1xf32> to vector<64x64xf32>
    %13 = arith.subf %3, %12 : vector<64x64xf32>
    %14 = math.exp %13 : vector<64x64xf32>
    %cst_5 = arith.constant 0.000000e+00 : f32
    %15 = vector.broadcast %cst_5 : f32 to vector<64x64xf32>
    %16 = arith.select %11, %14, %15 : vector<64x64xi1>, vector<64x64xf32>
    %c0_6 = arith.constant 0 : index
    %c0_7 = arith.constant 0 : index
    %17 = vector.load %arg6[%c0_6, %c0_7] : memref<64x1xf32, #tpu.memory_space<vmem>>, vector<64x1xf32>
    %18 = arith.mulf %9, %17 : vector<64x1xf32>
    %cst_8 = arith.constant dense<0.000000e+00> : vector<64xf32>
    %19 = vector.multi_reduction <add>, %16, %cst_8 [1] : vector<64x64xf32> to vector<64xf32>
    %20 = vector.shape_cast %19 : vector<64xf32> to vector<64x1xf32>
    %21 = arith.addf %18, %20 : vector<64x1xf32>
    %c0_9 = arith.constant 0 : index
    %c0_10 = arith.constant 0 : index
    %22 = vector.load %arg6[%c0_9, %c0_10] : memref<64x1xf32, #tpu.memory_space<vmem>>, vector<64x1xf32>
    tpu.vector_store %arg6[%c0_9, %c0_10], %21 {strides = array<i32>} : memref<64x1xf32, #tpu.memory_space<vmem>>, vector<64x1xf32>,
    %c0_11 = arith.constant 0 : index
    %c0_12 = arith.constant 0 : index
    %23 = vector.load %arg7[%c0_11, %c0_12] : memref<64x32xf32, #tpu.memory_space<vmem>>, vector<64x32xf32>
    %24 = vector.broadcast %9 : vector<64x1xf32> to vector<64x32xf32>
    %25 = arith.mulf %24, %23 : vector<64x32xf32>
    %c0_13 = arith.constant 0 : index
    %c0_14 = arith.constant 0 : index
    %26 = vector.load %arg3[%c0_13, %c0_14] : memref<64x32xf32, #tpu.memory_space<vmem>>, vector<64x32xf32>
    %cst_15 = arith.constant dense<0.000000e+00> : vector<64x32xf32>
    %27 = tpu.matmul %16, %26, %cst_15 {dimension_numbers = #tpu.dot_dimension_numbers<[1], [0], [0], [1], [0, 0, 1, 1], [], []>} : vector<64x64xf32>, vector<64x32xf32>, vector<64x32xf32> -> vector<64x32xf32>
    %28 = arith.addf %25, %27 : vector<64x32xf32>
    %c0_16 = arith.constant 0 : index
    %c0_17 = arith.constant 0 : index
    %29 = vector.load %arg7[%c0_16, %c0_17] : memref<64x32xf32, #tpu.memory_space<vmem>>, vector<64x32xf32>
    tpu.vector_store %arg7[%c0_16, %c0_17], %28 {strides = array<i32>} : memref<64x32xf32, #tpu.memory_space<vmem>>, vector<64x32xf32>,
    %c0_18 = arith.constant 0 : index
    %c0_19 = arith.constant 0 : index
    %30 = vector.load %arg5[%c0_18, %c0_19] : memref<64x1xf32, #tpu.memory_space<vmem>>, vector<64x1xf32>
    tpu.vector_store %arg5[%c0_18, %c0_19], %7 {strides = array<i32>} : memref<64x1xf32, #tpu.memory_space<vmem>>, vector<64x1xf32>,
    %c0_i32_20 = arith.constant 0 : i32
    %31 = arith.cmpi eq, %arg1, %c0_i32_20 : i32
    %32 = arith.extui %31 : i1 to i32
    %c0_i32_21 = arith.constant 0 : i32
    %33 = arith.cmpi ne, %32, %c0_i32_21 : i32
    scf.if %33 {
      %c0_22 = arith.constant 0 : index
      %c0_23 = arith.constant 0 : index
      %34 = vector.load %arg7[%c0_22, %c0_23] : memref<64x32xf32, #tpu.memory_space<vmem>>, vector<64x32xf32>
      %c0_24 = arith.constant 0 : index
      %c0_25 = arith.constant 0 : index
      %35 = vector.load %arg6[%c0_24, %c0_25] : memref<64x1xf32, #tpu.memory_space<vmem>>, vector<64x1xf32>
      %cst_26 = arith.constant 1.000000e-30 : f32
      %36 = vector.broadcast %cst_26 : f32 to vector<64x1xf32>
      %37 = arith.maximumf %35, %36 : vector<64x1xf32>
      %38 = vector.broadcast %37 : vector<64x1xf32> to vector<64x32xf32>
      %39 = arith.divf %34, %38 : vector<64x32xf32>
      %c0_27 = arith.constant 0 : index
      %c0_28 = arith.constant 0 : index
      %40 = vector.load %arg4[%c0_27, %c0_28] : memref<64x32xf32, #tpu.memory_space<vmem>>, vector<64x32xf32>
      tpu.vector_store %arg4[%c0_27, %c0_28], %39 {strides = array<i32>} : memref<64x32xf32, #tpu.memory_space<vmem>>, vector<64x32xf32>,
    } else {
    }
    return
  }
  func.func @transform_0(%arg0: i32, %arg1: i32) -> (i32, i32) {
    %c0_i32 = arith.constant 0 : i32
    return %arg0, %arg1 : i32, i32
  }
  func.func @transform_1(%arg0: i32, %arg1: i32) -> (i32, i32) {
    %c0_i32 = arith.constant 0 : i32
    %c0_i32_0 = arith.constant 0 : i32
    return %arg1, %c0_i32 : i32, i32
  }
  func.func @transform_2(%arg0: i32, %arg1: i32) -> (i32, i32) {
    %c0_i32 = arith.constant 0 : i32
    %c0_i32_0 = arith.constant 0 : i32
    return %arg0, %c0_i32 : i32, i32
  }
}

module attributes {stable_mosaic.version = 11 : i64} {
  func.func @_local_agg_fused_kernel(%arg0: i32, %arg1: memref<2x8x32xf32, #tpu.memory_space<vmem>>, %arg2: memref<2x8x32xf32, #tpu.memory_space<vmem>>, %arg3: memref<2x8x8xi32, #tpu.memory_space<vmem>>, %arg4: memref<4x32xf32, #tpu.memory_space<vmem>>, %arg5: memref<2x8x32xf32, #tpu.memory_space<vmem>>) attributes {dimension_semantics = [#tpu.dimension_semantics<parallel>], iteration_bounds = array<i64: 1>, scalar_prefetch = 0 : i64, scratch_operands = 0 : i64, tpu.core_type = #tpu.core_type<tc>, window_params = [{transform_indices = @transform_0, window_bounds = array<i64: 2, 8, 32>}, {transform_indices = @transform_1, window_bounds = array<i64: 2, 8, 32>}, {transform_indices = @transform_2, window_bounds = array<i64: 2, 8, 8>}, {pipeline_mode = #tpu.pipeline_mode<synchronous>, transform_indices = @transform_3, window_bounds = array<i64: 4, 32>}, {transform_indices = @transform_4, window_bounds = array<i64: 2, 8, 32>}]} {
    %c0 = arith.constant 0 : index
    %c0_0 = arith.constant 0 : index
    %c0_1 = arith.constant 0 : index
    %0 = vector.load %arg3[%c0, %c0_0, %c0_1] : memref<2x8x8xi32, #tpu.memory_space<vmem>>, vector<2x8x8xi32>
    %c0_2 = arith.constant 0 : index
    %c0_3 = arith.constant 0 : index
    %1 = vector.load %arg4[%c0_2, %c0_3] : memref<4x32xf32, #tpu.memory_space<vmem>>, vector<4x32xf32>
    %cst = arith.constant -9.000000e+15 : f32
    %2 = vector.broadcast %cst : f32 to vector<2x8x8xf32>
    %c1_i32 = arith.constant 1 : i32
    %3 = vector.broadcast %c1_i32 : i32 to vector<2x8x8xi32>
    %4 = arith.cmpi eq, %0, %3 : vector<2x8x8xi32>
    %c2_i32 = arith.constant 2 : i32
    %5 = vector.broadcast %c2_i32 : i32 to vector<2x8x8xi32>
    %6 = arith.cmpi eq, %0, %5 : vector<2x8x8xi32>
    %c3_i32 = arith.constant 3 : i32
    %7 = vector.broadcast %c3_i32 : i32 to vector<2x8x8xi32>
    %8 = arith.cmpi eq, %0, %7 : vector<2x8x8xi32>
    %c4_i32 = arith.constant 4 : i32
    %9 = vector.broadcast %c4_i32 : i32 to vector<2x8x8xi32>
    %10 = arith.cmpi eq, %0, %9 : vector<2x8x8xi32>
    %c0_4 = arith.constant 0 : index
    %c0_5 = arith.constant 0 : index
    %c0_6 = arith.constant 0 : index
    %11 = vector.load %arg1[%c0_4, %c0_5, %c0_6] : memref<2x8x32xf32, #tpu.memory_space<vmem>>, vector<2x8x32xf32>
    %cst_7 = arith.constant 0.000000e+00 : f32
    %12 = vector.broadcast %cst_7 : f32 to vector<2x8x32xf32>
    %13 = arith.maximumf %11, %12 : vector<2x8x32xf32>
    %cst_8 = arith.constant 0.000000e+00 : f32
    %14 = vector.broadcast %cst_8 : f32 to vector<2x8x32xf32>
    %15 = arith.minimumf %11, %14 : vector<2x8x32xf32>
    %16 = vector.extract_strided_slice %1 {offsets = [0, 0], sizes = [1, 32], strides = [1, 1]} : vector<4x32xf32> to vector<1x32xf32>
    %17 = vector.shape_cast %16 : vector<1x32xf32> to vector<32xf32>
    %18 = vector.shape_cast %17 : vector<32xf32> to vector<1x1x32xf32>
    %19 = vector.broadcast %18 : vector<1x1x32xf32> to vector<2x8x32xf32>
    %20 = arith.mulf %11, %19 : vector<2x8x32xf32>
    "tpu.trace_start"() <{level = 10 : i32, message = "bld,bmd->blm"}> : () -> ()
    %cst_9 = arith.constant dense<0.000000e+00> : vector<2x8x8xf32>
    %21 = tpu.matmul %20, %11, %cst_9 {dimension_numbers = #tpu.dot_dimension_numbers<[2], [2], [1], [1], [0, 0, 0, 1, 1, 1], [0], [0]>} : vector<2x8x32xf32>, vector<2x8x32xf32>, vector<2x8x8xf32> -> vector<2x8x8xf32>
    "tpu.trace_stop"() : () -> ()
    %22 = vector.shape_cast %17 : vector<32xf32> to vector<1x1x32xf32>
    %23 = vector.broadcast %22 : vector<1x1x32xf32> to vector<2x8x32xf32>
    %24 = arith.mulf %13, %23 : vector<2x8x32xf32>
    "tpu.trace_start"() <{level = 10 : i32, message = "bld,bmd->blm"}> : () -> ()
    %cst_10 = arith.constant dense<0.000000e+00> : vector<2x8x8xf32>
    %25 = tpu.matmul %24, %15, %cst_10 {dimension_numbers = #tpu.dot_dimension_numbers<[2], [2], [1], [1], [0, 0, 0, 1, 1, 1], [0], [0]>} : vector<2x8x32xf32>, vector<2x8x32xf32>, vector<2x8x8xf32> -> vector<2x8x8xf32>
    "tpu.trace_stop"() : () -> ()
    %26 = vector.shape_cast %17 : vector<32xf32> to vector<1x1x32xf32>
    %27 = vector.broadcast %26 : vector<1x1x32xf32> to vector<2x8x32xf32>
    %28 = arith.mulf %15, %27 : vector<2x8x32xf32>
    "tpu.trace_start"() <{level = 10 : i32, message = "bld,bmd->blm"}> : () -> ()
    %cst_11 = arith.constant dense<0.000000e+00> : vector<2x8x8xf32>
    %29 = tpu.matmul %28, %13, %cst_11 {dimension_numbers = #tpu.dot_dimension_numbers<[2], [2], [1], [1], [0, 0, 0, 1, 1, 1], [0], [0]>} : vector<2x8x32xf32>, vector<2x8x32xf32>, vector<2x8x8xf32> -> vector<2x8x8xf32>
    "tpu.trace_stop"() : () -> ()
    %30 = arith.addf %25, %29 : vector<2x8x8xf32>
    %cst_12 = arith.constant -8.000000e-01 : f32
    %31 = vector.broadcast %cst_12 : f32 to vector<2x8x8xf32>
    %32 = arith.mulf %31, %30 : vector<2x8x8xf32>
    %33 = arith.addf %21, %32 : vector<2x8x8xf32>
    %34 = arith.select %4, %33, %2 : vector<2x8x8xi1>, vector<2x8x8xf32>
    %35 = vector.extract_strided_slice %1 {offsets = [1, 0], sizes = [1, 32], strides = [1, 1]} : vector<4x32xf32> to vector<1x32xf32>
    %36 = vector.shape_cast %35 : vector<1x32xf32> to vector<32xf32>
    %37 = vector.shape_cast %36 : vector<32xf32> to vector<1x1x32xf32>
    %38 = vector.broadcast %37 : vector<1x1x32xf32> to vector<2x8x32xf32>
    %39 = arith.mulf %11, %38 : vector<2x8x32xf32>
    "tpu.trace_start"() <{level = 10 : i32, message = "bld,bmd->blm"}> : () -> ()
    %cst_13 = arith.constant dense<0.000000e+00> : vector<2x8x8xf32>
    %40 = tpu.matmul %39, %11, %cst_13 {dimension_numbers = #tpu.dot_dimension_numbers<[2], [2], [1], [1], [0, 0, 0, 1, 1, 1], [0], [0]>} : vector<2x8x32xf32>, vector<2x8x32xf32>, vector<2x8x8xf32> -> vector<2x8x8xf32>
    "tpu.trace_stop"() : () -> ()
    %41 = vector.shape_cast %36 : vector<32xf32> to vector<1x1x32xf32>
    %42 = vector.broadcast %41 : vector<1x1x32xf32> to vector<2x8x32xf32>
    %43 = arith.mulf %13, %42 : vector<2x8x32xf32>
    "tpu.trace_start"() <{level = 10 : i32, message = "bld,bmd->blm"}> : () -> ()
    %cst_14 = arith.constant dense<0.000000e+00> : vector<2x8x8xf32>
    %44 = tpu.matmul %43, %15, %cst_14 {dimension_numbers = #tpu.dot_dimension_numbers<[2], [2], [1], [1], [0, 0, 0, 1, 1, 1], [0], [0]>} : vector<2x8x32xf32>, vector<2x8x32xf32>, vector<2x8x8xf32> -> vector<2x8x8xf32>
    "tpu.trace_stop"() : () -> ()
    %45 = vector.shape_cast %36 : vector<32xf32> to vector<1x1x32xf32>
    %46 = vector.broadcast %45 : vector<1x1x32xf32> to vector<2x8x32xf32>
    %47 = arith.mulf %15, %46 : vector<2x8x32xf32>
    "tpu.trace_start"() <{level = 10 : i32, message = "bld,bmd->blm"}> : () -> ()
    %cst_15 = arith.constant dense<0.000000e+00> : vector<2x8x8xf32>
    %48 = tpu.matmul %47, %13, %cst_15 {dimension_numbers = #tpu.dot_dimension_numbers<[2], [2], [1], [1], [0, 0, 0, 1, 1, 1], [0], [0]>} : vector<2x8x32xf32>, vector<2x8x32xf32>, vector<2x8x8xf32> -> vector<2x8x8xf32>
    "tpu.trace_stop"() : () -> ()
    %49 = arith.addf %44, %48 : vector<2x8x8xf32>
    %cst_16 = arith.constant -8.000000e-01 : f32
    %50 = vector.broadcast %cst_16 : f32 to vector<2x8x8xf32>
    %51 = arith.mulf %50, %49 : vector<2x8x8xf32>
    %52 = arith.addf %40, %51 : vector<2x8x8xf32>
    %53 = arith.select %6, %52, %34 : vector<2x8x8xi1>, vector<2x8x8xf32>
    %54 = vector.extract_strided_slice %1 {offsets = [2, 0], sizes = [1, 32], strides = [1, 1]} : vector<4x32xf32> to vector<1x32xf32>
    %55 = vector.shape_cast %54 : vector<1x32xf32> to vector<32xf32>
    %56 = vector.shape_cast %55 : vector<32xf32> to vector<1x1x32xf32>
    %57 = vector.broadcast %56 : vector<1x1x32xf32> to vector<2x8x32xf32>
    %58 = arith.mulf %11, %57 : vector<2x8x32xf32>
    "tpu.trace_start"() <{level = 10 : i32, message = "bld,bmd->blm"}> : () -> ()
    %cst_17 = arith.constant dense<0.000000e+00> : vector<2x8x8xf32>
    %59 = tpu.matmul %58, %11, %cst_17 {dimension_numbers = #tpu.dot_dimension_numbers<[2], [2], [1], [1], [0, 0, 0, 1, 1, 1], [0], [0]>} : vector<2x8x32xf32>, vector<2x8x32xf32>, vector<2x8x8xf32> -> vector<2x8x8xf32>
    "tpu.trace_stop"() : () -> ()
    %60 = vector.shape_cast %55 : vector<32xf32> to vector<1x1x32xf32>
    %61 = vector.broadcast %60 : vector<1x1x32xf32> to vector<2x8x32xf32>
    %62 = arith.mulf %13, %61 : vector<2x8x32xf32>
    "tpu.trace_start"() <{level = 10 : i32, message = "bld,bmd->blm"}> : () -> ()
    %cst_18 = arith.constant dense<0.000000e+00> : vector<2x8x8xf32>
    %63 = tpu.matmul %62, %15, %cst_18 {dimension_numbers = #tpu.dot_dimension_numbers<[2], [2], [1], [1], [0, 0, 0, 1, 1, 1], [0], [0]>} : vector<2x8x32xf32>, vector<2x8x32xf32>, vector<2x8x8xf32> -> vector<2x8x8xf32>
    "tpu.trace_stop"() : () -> ()
    %64 = vector.shape_cast %55 : vector<32xf32> to vector<1x1x32xf32>
    %65 = vector.broadcast %64 : vector<1x1x32xf32> to vector<2x8x32xf32>
    %66 = arith.mulf %15, %65 : vector<2x8x32xf32>
    "tpu.trace_start"() <{level = 10 : i32, message = "bld,bmd->blm"}> : () -> ()
    %cst_19 = arith.constant dense<0.000000e+00> : vector<2x8x8xf32>
    %67 = tpu.matmul %66, %13, %cst_19 {dimension_numbers = #tpu.dot_dimension_numbers<[2], [2], [1], [1], [0, 0, 0, 1, 1, 1], [0], [0]>} : vector<2x8x32xf32>, vector<2x8x32xf32>, vector<2x8x8xf32> -> vector<2x8x8xf32>
    "tpu.trace_stop"() : () -> ()
    %68 = arith.addf %63, %67 : vector<2x8x8xf32>
    %cst_20 = arith.constant -8.000000e-01 : f32
    %69 = vector.broadcast %cst_20 : f32 to vector<2x8x8xf32>
    %70 = arith.mulf %69, %68 : vector<2x8x8xf32>
    %71 = arith.addf %59, %70 : vector<2x8x8xf32>
    %72 = arith.select %8, %71, %53 : vector<2x8x8xi1>, vector<2x8x8xf32>
    %73 = vector.extract_strided_slice %1 {offsets = [3, 0], sizes = [1, 32], strides = [1, 1]} : vector<4x32xf32> to vector<1x32xf32>
    %74 = vector.shape_cast %73 : vector<1x32xf32> to vector<32xf32>
    %75 = vector.shape_cast %74 : vector<32xf32> to vector<1x1x32xf32>
    %76 = vector.broadcast %75 : vector<1x1x32xf32> to vector<2x8x32xf32>
    %77 = arith.mulf %11, %76 : vector<2x8x32xf32>
    "tpu.trace_start"() <{level = 10 : i32, message = "bld,bmd->blm"}> : () -> ()
    %cst_21 = arith.constant dense<0.000000e+00> : vector<2x8x8xf32>
    %78 = tpu.matmul %77, %11, %cst_21 {dimension_numbers = #tpu.dot_dimension_numbers<[2], [2], [1], [1], [0, 0, 0, 1, 1, 1], [0], [0]>} : vector<2x8x32xf32>, vector<2x8x32xf32>, vector<2x8x8xf32> -> vector<2x8x8xf32>
    "tpu.trace_stop"() : () -> ()
    %79 = vector.shape_cast %74 : vector<32xf32> to vector<1x1x32xf32>
    %80 = vector.broadcast %79 : vector<1x1x32xf32> to vector<2x8x32xf32>
    %81 = arith.mulf %13, %80 : vector<2x8x32xf32>
    "tpu.trace_start"() <{level = 10 : i32, message = "bld,bmd->blm"}> : () -> ()
    %cst_22 = arith.constant dense<0.000000e+00> : vector<2x8x8xf32>
    %82 = tpu.matmul %81, %15, %cst_22 {dimension_numbers = #tpu.dot_dimension_numbers<[2], [2], [1], [1], [0, 0, 0, 1, 1, 1], [0], [0]>} : vector<2x8x32xf32>, vector<2x8x32xf32>, vector<2x8x8xf32> -> vector<2x8x8xf32>
    "tpu.trace_stop"() : () -> ()
    %83 = vector.shape_cast %74 : vector<32xf32> to vector<1x1x32xf32>
    %84 = vector.broadcast %83 : vector<1x1x32xf32> to vector<2x8x32xf32>
    %85 = arith.mulf %15, %84 : vector<2x8x32xf32>
    "tpu.trace_start"() <{level = 10 : i32, message = "bld,bmd->blm"}> : () -> ()
    %cst_23 = arith.constant dense<0.000000e+00> : vector<2x8x8xf32>
    %86 = tpu.matmul %85, %13, %cst_23 {dimension_numbers = #tpu.dot_dimension_numbers<[2], [2], [1], [1], [0, 0, 0, 1, 1, 1], [0], [0]>} : vector<2x8x32xf32>, vector<2x8x32xf32>, vector<2x8x8xf32> -> vector<2x8x8xf32>
    "tpu.trace_stop"() : () -> ()
    %87 = arith.addf %82, %86 : vector<2x8x8xf32>
    %cst_24 = arith.constant -8.000000e-01 : f32
    %88 = vector.broadcast %cst_24 : f32 to vector<2x8x8xf32>
    %89 = arith.mulf %88, %87 : vector<2x8x8xf32>
    %90 = arith.addf %78, %89 : vector<2x8x8xf32>
    %91 = arith.select %10, %90, %72 : vector<2x8x8xi1>, vector<2x8x8xf32>
    %cst_25 = arith.constant dense<0xFF800000> : vector<2x8xf32>
    %92 = vector.multi_reduction <maximumf>, %91, %cst_25 [2] : vector<2x8x8xf32> to vector<2x8xf32>
    %93 = vector.shape_cast %92 : vector<2x8xf32> to vector<2x8x1xf32>
    %94 = vector.broadcast %93 : vector<2x8x1xf32> to vector<2x8x8xf32>
    %95 = arith.subf %91, %94 : vector<2x8x8xf32>
    %96 = math.exp %95 : vector<2x8x8xf32>
    %cst_26 = arith.constant dense<0.000000e+00> : vector<2x8xf32>
    %97 = vector.multi_reduction <add>, %96, %cst_26 [2] : vector<2x8x8xf32> to vector<2x8xf32>
    %98 = vector.shape_cast %97 : vector<2x8xf32> to vector<2x8x1xf32>
    %99 = vector.broadcast %98 : vector<2x8x1xf32> to vector<2x8x8xf32>
    %100 = arith.divf %96, %99 : vector<2x8x8xf32>
    "tpu.trace_start"() <{level = 10 : i32, message = "blm,bmd->bld"}> : () -> ()
    %cst_27 = arith.constant dense<0.000000e+00> : vector<2x8x32xf32>
    %101 = tpu.matmul %100, %11, %cst_27 {dimension_numbers = #tpu.dot_dimension_numbers<[2], [1], [1], [2], [0, 0, 0, 1, 1, 2], [0], [0]>} : vector<2x8x8xf32>, vector<2x8x32xf32>, vector<2x8x32xf32> -> vector<2x8x32xf32>
    "tpu.trace_stop"() : () -> ()
    %c0_28 = arith.constant 0 : index
    %c0_29 = arith.constant 0 : index
    %c0_30 = arith.constant 0 : index
    %102 = vector.load %arg2[%c0_28, %c0_29, %c0_30] : memref<2x8x32xf32, #tpu.memory_space<vmem>>, vector<2x8x32xf32>
    %cst_31 = arith.constant 0.000000e+00 : f32
    %103 = vector.broadcast %cst_31 : f32 to vector<2x8x32xf32>
    %104 = arith.maximumf %102, %103 : vector<2x8x32xf32>
    %cst_32 = arith.constant 0.000000e+00 : f32
    %105 = vector.broadcast %cst_32 : f32 to vector<2x8x32xf32>
    %106 = arith.minimumf %102, %105 : vector<2x8x32xf32>
    %107 = vector.extract_strided_slice %1 {offsets = [0, 0], sizes = [1, 32], strides = [1, 1]} : vector<4x32xf32> to vector<1x32xf32>
    %108 = vector.shape_cast %107 : vector<1x32xf32> to vector<32xf32>
    %109 = vector.shape_cast %108 : vector<32xf32> to vector<1x1x32xf32>
    %110 = vector.broadcast %109 : vector<1x1x32xf32> to vector<2x8x32xf32>
    %111 = arith.mulf %102, %110 : vector<2x8x32xf32>
    "tpu.trace_start"() <{level = 10 : i32, message = "bld,bmd->blm"}> : () -> ()
    %cst_33 = arith.constant dense<0.000000e+00> : vector<2x8x8xf32>
    %112 = tpu.matmul %111, %102, %cst_33 {dimension_numbers = #tpu.dot_dimension_numbers<[2], [2], [1], [1], [0, 0, 0, 1, 1, 1], [0], [0]>} : vector<2x8x32xf32>, vector<2x8x32xf32>, vector<2x8x8xf32> -> vector<2x8x8xf32>
    "tpu.trace_stop"() : () -> ()
    %113 = vector.shape_cast %108 : vector<32xf32> to vector<1x1x32xf32>
    %114 = vector.broadcast %113 : vector<1x1x32xf32> to vector<2x8x32xf32>
    %115 = arith.mulf %104, %114 : vector<2x8x32xf32>
    "tpu.trace_start"() <{level = 10 : i32, message = "bld,bmd->blm"}> : () -> ()
    %cst_34 = arith.constant dense<0.000000e+00> : vector<2x8x8xf32>
    %116 = tpu.matmul %115, %106, %cst_34 {dimension_numbers = #tpu.dot_dimension_numbers<[2], [2], [1], [1], [0, 0, 0, 1, 1, 1], [0], [0]>} : vector<2x8x32xf32>, vector<2x8x32xf32>, vector<2x8x8xf32> -> vector<2x8x8xf32>
    "tpu.trace_stop"() : () -> ()
    %117 = vector.shape_cast %108 : vector<32xf32> to vector<1x1x32xf32>
    %118 = vector.broadcast %117 : vector<1x1x32xf32> to vector<2x8x32xf32>
    %119 = arith.mulf %106, %118 : vector<2x8x32xf32>
    "tpu.trace_start"() <{level = 10 : i32, message = "bld,bmd->blm"}> : () -> ()
    %cst_35 = arith.constant dense<0.000000e+00> : vector<2x8x8xf32>
    %120 = tpu.matmul %119, %104, %cst_35 {dimension_numbers = #tpu.dot_dimension_numbers<[2], [2], [1], [1], [0, 0, 0, 1, 1, 1], [0], [0]>} : vector<2x8x32xf32>, vector<2x8x32xf32>, vector<2x8x8xf32> -> vector<2x8x8xf32>
    "tpu.trace_stop"() : () -> ()
    %121 = arith.addf %116, %120 : vector<2x8x8xf32>
    %cst_36 = arith.constant -8.000000e-01 : f32
    %122 = vector.broadcast %cst_36 : f32 to vector<2x8x8xf32>
    %123 = arith.mulf %122, %121 : vector<2x8x8xf32>
    %124 = arith.addf %112, %123 : vector<2x8x8xf32>
    %125 = arith.select %4, %124, %2 : vector<2x8x8xi1>, vector<2x8x8xf32>
    %126 = vector.extract_strided_slice %1 {offsets = [1, 0], sizes = [1, 32], strides = [1, 1]} : vector<4x32xf32> to vector<1x32xf32>
    %127 = vector.shape_cast %126 : vector<1x32xf32> to vector<32xf32>
    %128 = vector.shape_cast %127 : vector<32xf32> to vector<1x1x32xf32>
    %129 = vector.broadcast %128 : vector<1x1x32xf32> to vector<2x8x32xf32>
    %130 = arith.mulf %102, %129 : vector<2x8x32xf32>
    "tpu.trace_start"() <{level = 10 : i32, message = "bld,bmd->blm"}> : () -> ()
    %cst_37 = arith.constant dense<0.000000e+00> : vector<2x8x8xf32>
    %131 = tpu.matmul %130, %102, %cst_37 {dimension_numbers = #tpu.dot_dimension_numbers<[2], [2], [1], [1], [0, 0, 0, 1, 1, 1], [0], [0]>} : vector<2x8x32xf32>, vector<2x8x32xf32>, vector<2x8x8xf32> -> vector<2x8x8xf32>
    "tpu.trace_stop"() : () -> ()
    %132 = vector.shape_cast %127 : vector<32xf32> to vector<1x1x32xf32>
    %133 = vector.broadcast %132 : vector<1x1x32xf32> to vector<2x8x32xf32>
    %134 = arith.mulf %104, %133 : vector<2x8x32xf32>
    "tpu.trace_start"() <{level = 10 : i32, message = "bld,bmd->blm"}> : () -> ()
    %cst_38 = arith.constant dense<0.000000e+00> : vector<2x8x8xf32>
    %135 = tpu.matmul %134, %106, %cst_38 {dimension_numbers = #tpu.dot_dimension_numbers<[2], [2], [1], [1], [0, 0, 0, 1, 1, 1], [0], [0]>} : vector<2x8x32xf32>, vector<2x8x32xf32>, vector<2x8x8xf32> -> vector<2x8x8xf32>
    "tpu.trace_stop"() : () -> ()
    %136 = vector.shape_cast %127 : vector<32xf32> to vector<1x1x32xf32>
    %137 = vector.broadcast %136 : vector<1x1x32xf32> to vector<2x8x32xf32>
    %138 = arith.mulf %106, %137 : vector<2x8x32xf32>
    "tpu.trace_start"() <{level = 10 : i32, message = "bld,bmd->blm"}> : () -> ()
    %cst_39 = arith.constant dense<0.000000e+00> : vector<2x8x8xf32>
    %139 = tpu.matmul %138, %104, %cst_39 {dimension_numbers = #tpu.dot_dimension_numbers<[2], [2], [1], [1], [0, 0, 0, 1, 1, 1], [0], [0]>} : vector<2x8x32xf32>, vector<2x8x32xf32>, vector<2x8x8xf32> -> vector<2x8x8xf32>
    "tpu.trace_stop"() : () -> ()
    %140 = arith.addf %135, %139 : vector<2x8x8xf32>
    %cst_40 = arith.constant -8.000000e-01 : f32
    %141 = vector.broadcast %cst_40 : f32 to vector<2x8x8xf32>
    %142 = arith.mulf %141, %140 : vector<2x8x8xf32>
    %143 = arith.addf %131, %142 : vector<2x8x8xf32>
    %144 = arith.select %6, %143, %125 : vector<2x8x8xi1>, vector<2x8x8xf32>
    %145 = vector.extract_strided_slice %1 {offsets = [2, 0], sizes = [1, 32], strides = [1, 1]} : vector<4x32xf32> to vector<1x32xf32>
    %146 = vector.shape_cast %145 : vector<1x32xf32> to vector<32xf32>
    %147 = vector.shape_cast %146 : vector<32xf32> to vector<1x1x32xf32>
    %148 = vector.broadcast %147 : vector<1x1x32xf32> to vector<2x8x32xf32>
    %149 = arith.mulf %102, %148 : vector<2x8x32xf32>
    "tpu.trace_start"() <{level = 10 : i32, message = "bld,bmd->blm"}> : () -> ()
    %cst_41 = arith.constant dense<0.000000e+00> : vector<2x8x8xf32>
    %150 = tpu.matmul %149, %102, %cst_41 {dimension_numbers = #tpu.dot_dimension_numbers<[2], [2], [1], [1], [0, 0, 0, 1, 1, 1], [0], [0]>} : vector<2x8x32xf32>, vector<2x8x32xf32>, vector<2x8x8xf32> -> vector<2x8x8xf32>
    "tpu.trace_stop"() : () -> ()
    %151 = vector.shape_cast %146 : vector<32xf32> to vector<1x1x32xf32>
    %152 = vector.broadcast %151 : vector<1x1x32xf32> to vector<2x8x32xf32>
    %153 = arith.mulf %104, %152 : vector<2x8x32xf32>
    "tpu.trace_start"() <{level = 10 : i32, message = "bld,bmd->blm"}> : () -> ()
    %cst_42 = arith.constant dense<0.000000e+00> : vector<2x8x8xf32>
    %154 = tpu.matmul %153, %106, %cst_42 {dimension_numbers = #tpu.dot_dimension_numbers<[2], [2], [1], [1], [0, 0, 0, 1, 1, 1], [0], [0]>} : vector<2x8x32xf32>, vector<2x8x32xf32>, vector<2x8x8xf32> -> vector<2x8x8xf32>
    "tpu.trace_stop"() : () -> ()
    %155 = vector.shape_cast %146 : vector<32xf32> to vector<1x1x32xf32>
    %156 = vector.broadcast %155 : vector<1x1x32xf32> to vector<2x8x32xf32>
    %157 = arith.mulf %106, %156 : vector<2x8x32xf32>
    "tpu.trace_start"() <{level = 10 : i32, message = "bld,bmd->blm"}> : () -> ()
    %cst_43 = arith.constant dense<0.000000e+00> : vector<2x8x8xf32>
    %158 = tpu.matmul %157, %104, %cst_43 {dimension_numbers = #tpu.dot_dimension_numbers<[2], [2], [1], [1], [0, 0, 0, 1, 1, 1], [0], [0]>} : vector<2x8x32xf32>, vector<2x8x32xf32>, vector<2x8x8xf32> -> vector<2x8x8xf32>
    "tpu.trace_stop"() : () -> ()
    %159 = arith.addf %154, %158 : vector<2x8x8xf32>
    %cst_44 = arith.constant -8.000000e-01 : f32
    %160 = vector.broadcast %cst_44 : f32 to vector<2x8x8xf32>
    %161 = arith.mulf %160, %159 : vector<2x8x8xf32>
    %162 = arith.addf %150, %161 : vector<2x8x8xf32>
    %163 = arith.select %8, %162, %144 : vector<2x8x8xi1>, vector<2x8x8xf32>
    %164 = vector.extract_strided_slice %1 {offsets = [3, 0], sizes = [1, 32], strides = [1, 1]} : vector<4x32xf32> to vector<1x32xf32>
    %165 = vector.shape_cast %164 : vector<1x32xf32> to vector<32xf32>
    %166 = vector.shape_cast %165 : vector<32xf32> to vector<1x1x32xf32>
    %167 = vector.broadcast %166 : vector<1x1x32xf32> to vector<2x8x32xf32>
    %168 = arith.mulf %102, %167 : vector<2x8x32xf32>
    "tpu.trace_start"() <{level = 10 : i32, message = "bld,bmd->blm"}> : () -> ()
    %cst_45 = arith.constant dense<0.000000e+00> : vector<2x8x8xf32>
    %169 = tpu.matmul %168, %102, %cst_45 {dimension_numbers = #tpu.dot_dimension_numbers<[2], [2], [1], [1], [0, 0, 0, 1, 1, 1], [0], [0]>} : vector<2x8x32xf32>, vector<2x8x32xf32>, vector<2x8x8xf32> -> vector<2x8x8xf32>
    "tpu.trace_stop"() : () -> ()
    %170 = vector.shape_cast %165 : vector<32xf32> to vector<1x1x32xf32>
    %171 = vector.broadcast %170 : vector<1x1x32xf32> to vector<2x8x32xf32>
    %172 = arith.mulf %104, %171 : vector<2x8x32xf32>
    "tpu.trace_start"() <{level = 10 : i32, message = "bld,bmd->blm"}> : () -> ()
    %cst_46 = arith.constant dense<0.000000e+00> : vector<2x8x8xf32>
    %173 = tpu.matmul %172, %106, %cst_46 {dimension_numbers = #tpu.dot_dimension_numbers<[2], [2], [1], [1], [0, 0, 0, 1, 1, 1], [0], [0]>} : vector<2x8x32xf32>, vector<2x8x32xf32>, vector<2x8x8xf32> -> vector<2x8x8xf32>
    "tpu.trace_stop"() : () -> ()
    %174 = vector.shape_cast %165 : vector<32xf32> to vector<1x1x32xf32>
    %175 = vector.broadcast %174 : vector<1x1x32xf32> to vector<2x8x32xf32>
    %176 = arith.mulf %106, %175 : vector<2x8x32xf32>
    "tpu.trace_start"() <{level = 10 : i32, message = "bld,bmd->blm"}> : () -> ()
    %cst_47 = arith.constant dense<0.000000e+00> : vector<2x8x8xf32>
    %177 = tpu.matmul %176, %104, %cst_47 {dimension_numbers = #tpu.dot_dimension_numbers<[2], [2], [1], [1], [0, 0, 0, 1, 1, 1], [0], [0]>} : vector<2x8x32xf32>, vector<2x8x32xf32>, vector<2x8x8xf32> -> vector<2x8x8xf32>
    "tpu.trace_stop"() : () -> ()
    %178 = arith.addf %173, %177 : vector<2x8x8xf32>
    %cst_48 = arith.constant -8.000000e-01 : f32
    %179 = vector.broadcast %cst_48 : f32 to vector<2x8x8xf32>
    %180 = arith.mulf %179, %178 : vector<2x8x8xf32>
    %181 = arith.addf %169, %180 : vector<2x8x8xf32>
    %182 = arith.select %10, %181, %163 : vector<2x8x8xi1>, vector<2x8x8xf32>
    %cst_49 = arith.constant dense<0xFF800000> : vector<2x8xf32>
    %183 = vector.multi_reduction <maximumf>, %182, %cst_49 [2] : vector<2x8x8xf32> to vector<2x8xf32>
    %184 = vector.shape_cast %183 : vector<2x8xf32> to vector<2x8x1xf32>
    %185 = vector.broadcast %184 : vector<2x8x1xf32> to vector<2x8x8xf32>
    %186 = arith.subf %182, %185 : vector<2x8x8xf32>
    %187 = math.exp %186 : vector<2x8x8xf32>
    %cst_50 = arith.constant dense<0.000000e+00> : vector<2x8xf32>
    %188 = vector.multi_reduction <add>, %187, %cst_50 [2] : vector<2x8x8xf32> to vector<2x8xf32>
    %189 = vector.shape_cast %188 : vector<2x8xf32> to vector<2x8x1xf32>
    %190 = vector.broadcast %189 : vector<2x8x1xf32> to vector<2x8x8xf32>
    %191 = arith.divf %187, %190 : vector<2x8x8xf32>
    "tpu.trace_start"() <{level = 10 : i32, message = "blm,bmd->bld"}> : () -> ()
    %cst_51 = arith.constant dense<0.000000e+00> : vector<2x8x32xf32>
    %192 = tpu.matmul %191, %102, %cst_51 {dimension_numbers = #tpu.dot_dimension_numbers<[2], [1], [1], [2], [0, 0, 0, 1, 1, 2], [0], [0]>} : vector<2x8x8xf32>, vector<2x8x32xf32>, vector<2x8x32xf32> -> vector<2x8x32xf32>
    "tpu.trace_stop"() : () -> ()
    %193 = arith.addf %101, %192 : vector<2x8x32xf32>
    %c0_52 = arith.constant 0 : index
    %c0_53 = arith.constant 0 : index
    %c0_54 = arith.constant 0 : index
    %194 = vector.load %arg5[%c0_52, %c0_53, %c0_54] : memref<2x8x32xf32, #tpu.memory_space<vmem>>, vector<2x8x32xf32>
    tpu.vector_store %arg5[%c0_52, %c0_53, %c0_54], %193 {strides = array<i32>} : memref<2x8x32xf32, #tpu.memory_space<vmem>>, vector<2x8x32xf32>,
    return
  }
  func.func @transform_0(%arg0: i32) -> (i32, i32, i32) {
    %c0_i32 = arith.constant 0 : i32
    %c0_i32_0 = arith.constant 0 : i32
    %c0_i32_1 = arith.constant 0 : i32
    return %arg0, %c0_i32, %c0_i32_0 : i32, i32, i32
  }
  func.func @transform_1(%arg0: i32) -> (i32, i32, i32) {
    %c0_i32 = arith.constant 0 : i32
    %c0_i32_0 = arith.constant 0 : i32
    %c0_i32_1 = arith.constant 0 : i32
    return %arg0, %c0_i32, %c0_i32_0 : i32, i32, i32
  }
  func.func @transform_2(%arg0: i32) -> (i32, i32, i32) {
    %c0_i32 = arith.constant 0 : i32
    %c0_i32_0 = arith.constant 0 : i32
    %c0_i32_1 = arith.constant 0 : i32
    return %arg0, %c0_i32, %c0_i32_0 : i32, i32, i32
  }
  func.func @transform_3(%arg0: i32) -> (i32, i32) {
    %c0_i32 = arith.constant 0 : i32
    %c0_i32_0 = arith.constant 0 : i32
    %c0_i32_1 = arith.constant 0 : i32
    return %c0_i32, %c0_i32_0 : i32, i32
  }
  func.func @transform_4(%arg0: i32) -> (i32, i32, i32) {
    %c0_i32 = arith.constant 0 : i32
    %c0_i32_0 = arith.constant 0 : i32
    %c0_i32_1 = arith.constant 0 : i32
    return %arg0, %c0_i32, %c0_i32_0 : i32, i32, i32
  }
}

</mosaic_0001>

<bundles_post_ra>
// kernel: session_graph_forward.6
= control target key start
LH: loop header
LB: loop body
LE: loop exit
PB: predicated region body
PF: predicated region fallthrough
CT: control target
= control target key end

     0   :  { %7 = vsyncpa [#allocation3], 0  ;;  %s724_s0 = inlined_call_operand.vmem [shape: f32[64,32], index: 0, kind: input, shape index: {}]   ;;  %s725_s1 = inlined_call_operand.hbm [shape: f32[4,32,32], index: 1, kind: input, shape index: {}]   ;;  %s726_s2 = inlined_call_operand.vmem [shape: f32[4,64,32], index: 2, kind: output, shape index: {}]  }
   0x1   :  { %9 = vsyncpa [#allocation3 + $0x1], 0  ;;  %s596_s9 = smov 0   ;;  %s598_s10 = smov 0  }
   0x2   :  { %s600_s11 = smov 0   ;;  %s602_s12 = smov 0  }
   0x3   :  { %s604_s13 = smov 0   ;;  %s606_s14 = smov 0  }
   0x4 LB: > { %s404_s15 = sadd.s32 4294967295, %s577_s14   ;;  %s27_s16 = sadd.s32 1, %s573_s13  ;;  %s577_s14 = sphi %s606_s14, %s15_s14   ;;  %s573_s13 = sphi %s604_s13, %s733_s13   ;;  %s569_s12 = sphi %s602_s12, %s732_s12   ;;  %s565_s11 = sphi %s600_s11, %s731_s11   ;;  %s561_s10 = sphi %s598_s10, %s730_s10   ;;  %s557_s9 = sphi %s596_s9, %s729_s9  }
   0x5   : > { %p29_p0 = scmp.ge.s32.totalorder %s27_s16, 4  ;;  %s60_s17 = sadd.s32 1, %s565_s11 }
   0x6   : > { %p67_p1 = scmp.ne.s32.totalorder %s565_s11, %s561_s10  ;;  %p68_p2 = scmp.eq.s32.totalorder %s577_s14, 0 }
   0x7   : > { %s735_s16 = smov (%p29_p0, %s27_s16), 0  ;;  %p73_p4 = scmp.ne.s32.totalorder %s561_s10, %s557_s9 }
   0x8   : > { %p632_p3 = por %p68_p2, %p67_p1  ;;  %s57_s19 = ssub.s32 %s573_s13, %s735_s16 }
   0x9   : > { %p74_p5 = scmp.eq.s32.totalorder %s404_s15, 0  ;;  %p58_p6 = scmp.eq.s32.totalorder %s57_s19, 0 }
   0xa   : > { %p446_p8 = scmp.lt.s32.totalorder %s577_s14, 4  ;;  %s134_s22 = sand.u32 1, %s565_s11  }
   0xb   : > { %p639_p7 = por %p74_p5, %p73_p4  ;;  %s426_s23 = sshll.u32 %s573_s13, 5 }
   0xc   : > { %s645_s21 = scalar_select %p58_p6, %s565_s11, %s60_s17  }
   0xd   : > { %s409_s24 = sshll.u32 %s134_s22, 5  ;;  %s143_s27 = scalar_lea.hbm %s725_s1, %s426_s23 }
   0xe   : > { %s144_s28 = sshll.u32 %s143_s27, 4  ;;  %s138_s29 = scalar_lea.vmem [#allocation2], %s409_s24  ;;  %s145_s28 = int_to_ptr.hbm [resolvable:$true] %s144_s28 }
   0xf   : > { %s146_s30 = sshll.u32 %s138_s29, 4  ;;  %p443_p9 = pnand %p446_p8, %p632_p3  ;;  %s147_s30 = int_to_ptr.vmem [resolvable:$true] %s146_s30 }
  0x10   : > { %p412_p10 = scmp.ge.s32.totalorder %s577_s14, 1  ;;  %p154_p11 = scmp.lt.s32.totalorder %s577_s14, 5 }
  0x11   : > { %s135_s3 = scalar_lea.sflag [#allocation3], %s134_s22  ;;  %s579_s4 = smov 128  }
  0x12   : > { %s580_s5 = smov 8   ;;  %p155_p12 = pnand %p412_p10, %p154_p11 }
  0x13   : > { %445 = dma.hbm_to_vmem [thread:$0]  (!%p443_p9), %s145_s28, 512, %s147_s30, %s135_s3, %s579_s4, %s579_s4, %s580_s5  }
  0x14   : > { %158 = sbr.rel (%p155_p12) target bundleno = 176 (0xb0), region = 28  ;;  %s160_s6 = sand.u32 (!%p155_p12), 1, %s561_s10  }
  0x15   : > { %s413_s7 = sshll.u32 (!%p155_p12), %s160_s6, 5  ;;  %s161_s8 = scalar_lea.sflag (!%p155_p12), [#allocation3], %s160_s6 }
  0x16   : > { %s164_s9 = scalar_lea.vmem (!%p155_p12), [#allocation2], %s413_s7 }
  0x19   : > { %552 = dma.done.wait (%p639_p7), %s161_s8, 512  }
  0x1a   : > { %554 = vsyncadd (%p639_p7), %s161_s8, 4294966784  ;;  %v222_v0 = vld [vmem:[%s164_s9 + $0x18] sm:$0xff]  ;;  %v221_v1 = vld [vmem:[%s164_s9 + $0x10] sm:$0xff]  ;;  %vm223_vm0 = vcmask 261120   ;;  %p202_p13 = scmp.lt.s32.totalorder %s569_s12, 3 }
  0x1b   : > { %429 = vmatpush.msra.mxu2 %v222_v0  ;;  %430 = vmatpush.msra.mxu3 %v222_v0  ;;  %v220_v2 = vld [vmem:[%s164_s9 + $0x8] sm:$0xff]  ;;  %v219_v3 = vld [vmem:[%s164_s9] sm:$0xff]  ;;  %v217_v5 = vld [vmem:[%s724_s0 + $0x30] sm:$0xff] }
  0x1c   : > { %260 = vmatpush.msra.mxu0 %v222_v0  ;;  %428 = vmatpush.msra.mxu1 %v222_v0  ;;  %v215_v4 = vld [vmem:[%s724_s0 + $0x20] sm:$0xff]  ;;  %v213_v7 = vld [vmem:[%s724_s0 + $0x10] sm:$0xff]  ;;  %v216_v8 = vld [vmem:[%s724_s0 + $0x28] sm:$0xff]  ;;  %s737_s12 = smov (!%p202_p13, %s569_s12), 3 }
  0x1d   : > { %432 = vmatpush.msra.mxu2 %v221_v1  ;;  %433 = vmatpush.msra.mxu3 %v221_v1  ;;  %v211_v6 = vld [vmem:[%s724_s0] sm:$0xff]  ;;  %v218_v9 = vld [vmem:[%s724_s0 + $0x38] sm:$0xff]  ;;  %v212_v10 = vld [vmem:[%s724_s0 + $0x8] sm:$0xff]  ;;  %s427_s5 = sshll.u32 %s737_s12, 6 }
  0x1e   : > { %261 = vmatpush.msra.mxu0 %v221_v1  ;;  %431 = vmatpush.msra.mxu1 %v221_v1  ;;  %v214_v11 = vld [vmem:[%s724_s0 + $0x18] sm:$0xff]  ;;  %s209_s8 = scalar_lea.vmem %s726_s2, %s427_s5 }
  0x1f   : > { %435 = vmatpush.msra.mxu2 %v220_v2  ;;  %436 = vmatpush.msra.mxu3 %v220_v2 }
  0x20   : > { %262 = vmatpush.msra.mxu0 %v220_v2  ;;  %434 = vmatpush.msra.mxu1 %v220_v2 }
  0x21   : > { %438 = vmatpush.msra.mxu2 %v219_v3  ;;  %439 = vmatpush.msra.mxu3 %v219_v3 }
  0x22   : > { %420 = vmatmul.msk.f32.vlgmr.msra.gmra.mxu2 %vm223_vm0, %v215_v4  ;;  %422 = vmatmul.msk.f32.vlgmr.msra.gmra.mxu3 %vm223_vm0, %v217_v5 }
  0x23   : > { %263 = vmatpush.msra.mxu0 %v219_v3  ;;  %437 = vmatpush.msra.mxu1 %v219_v3 }
  0x24   : > { %416 = vmatmul.msk.f32.vlgmr.msra.gmra.mxu0 %vm223_vm0, %v211_v6  ;;  %418 = vmatmul.msk.f32.vlgmr.msra.gmra.mxu1 %vm223_vm0, %v213_v7 }
  0x2a   : > { %421 = vmatmul.msk.f32.gmra.mxu2 %vm223_vm0, %v216_v8  ;;  %423 = vmatmul.msk.f32.gmra.mxu3 %vm223_vm0, %v218_v9 }
  0x2c   : > { %417 = vmatmul.msk.f32.gmra.mxu0 %vm223_vm0, %v212_v10  ;;  %419 = vmatmul.msk.f32.gmra.mxu1 %vm223_vm0, %v214_v11 }
  0xa1   : > { %v265_v12 = vpop.f32.mrf.mxu0  ;;  %v271_v13 = vpop.f32.mrf.mxu1 }
  0xa2   : > { %289 = vst.msk [vmem:[%s209_s8] sm:$0xff] %vm223_vm0, %v265_v12 }
  0xa3   : > { %291 = vst.msk [vmem:[%s209_s8 + $0x10] sm:$0xff] %vm223_vm0, %v271_v13 }
  0xa5   : > { %v277_v14 = vpop.f32.mrf.mxu2  ;;  %v283_v15 = vpop.f32.mrf.mxu3 }
  0xa6   : > { %293 = vst.msk [vmem:[%s209_s8 + $0x20] sm:$0xff] %vm223_vm0, %v277_v14 }
  0xa7   : > { %295 = vst.msk [vmem:[%s209_s8 + $0x30] sm:$0xff] %vm223_vm0, %v283_v15 }
  0xa9   : > { %v268_v16 = vpop.f32.mrf.mxu0  ;;  %v274_v17 = vpop.f32.mrf.mxu1 }
  0xaa   : > { %290 = vst.msk [vmem:[%s209_s8 + $0x8] sm:$0xff] %vm223_vm0, %v268_v16 }
  0xab   : > { %292 = vst.msk [vmem:[%s209_s8 + $0x18] sm:$0xff] %vm223_vm0, %v274_v17 }
  0xad   : > { %v280_v18 = vpop.f32.mrf.mxu2  ;;  %v286_v19 = vpop.f32.mrf.mxu3 }
  0xae   : > { %294 = vst.msk [vmem:[%s209_s8 + $0x28] sm:$0xff] %vm223_vm0, %v280_v18 }
  0xaf   : > { %296 = vst.msk [vmem:[%s209_s8 + $0x38] sm:$0xff] %vm223_vm0, %v286_v19 }
  0xb0 PF: > { %s15_s14 = sadd.s32 1, %s577_s14   ;;  %s729_s9 = smov %s561_s10 }
  0xb1   : > { %p12_p0 = scmp.ge.s32.totalorder %s15_s14, 6   ;;  %s730_s10 = smov %s565_s11 }
  0xb2   : > { %s731_s11 = smov %s645_s21  ;;  %s732_s12 = smov %s573_s13 }
  0xb3   : > { %s733_s13 = smov %s735_s16  ;;  %14 = sbr.rel (!%p12_p0) target bundleno = 4 (0x4), region = 71 }
  0xb8   :  { %327 = vsyncpa [#allocation3], 1 }
  0xb9   :  { %329 = vsyncpa [#allocation3 + $0x1], 1 }

// kernel: session_graph_forward.5
= control target key start
LH: loop header
LB: loop body
LE: loop exit
PB: predicated region body
PF: predicated region fallthrough
CT: control target
= control target key end

     0   :  { %vm15_vm0 = vcmask 261120   ;;  %v187_v2 = vmov 0.0   ;;  %vm48_vm1 = vcmask 523264   ;;  %s307_s1 = inlined_call_operand.vmem [shape: f32[64,32], index: 1, kind: input, shape index: {}]   ;;  %s308_s0 = inlined_call_operand.vmem [shape: f32[64,64], index: 0, kind: input, shape index: {}]   ;;  %s309_s2 = inlined_call_operand.vmem [shape: f32[64,32], index: 2, kind: output, shape index: {}]  }
   0x1   :  { %v47_v0 = vld [vmem:[%s307_s1 + $0x38] sm:$0xff]  ;;  %v46_v1 = vld [vmem:[%s307_s1 + $0x30] sm:$0xff]  ;;  %16 = vst.msk [vmem:[#allocation2] sm:$0xff] %vm15_vm0, %v187_v2  ;;  %v45_v3 = vld [vmem:[%s307_s1 + $0x28] sm:$0xff] }
   0x2   :  { %163 = vmatpush.msra.mxu2 %v47_v0  ;;  %164 = vmatpush.msra.mxu3 %v47_v0  ;;  %17 = vst.msk [vmem:[#allocation2 + $0x8] sm:$0xff] %vm15_vm0, %v187_v2  ;;  %v44_v4 = vld [vmem:[%s307_s1 + $0x20] sm:$0xff]  ;;  %v43_v5 = vld [vmem:[%s307_s1 + $0x18] sm:$0xff]  ;;  %v42_v6 = vld [vmem:[%s307_s1 + $0x10] sm:$0xff] }
   0x3   :  { %81 = vmatpush.msra.mxu0 %v47_v0  ;;  %162 = vmatpush.msra.mxu1 %v47_v0  ;;  %18 = vst.msk [vmem:[#allocation2 + $0x10] sm:$0xff] %vm15_vm0, %v187_v2  ;;  %v41_v7 = vld [vmem:[%s307_s1 + $0x8] sm:$0xff]  ;;  %v40_v8 = vld [vmem:[%s307_s1] sm:$0xff]  ;;  %v38_v10 = vld [vmem:[%s308_s0 + $0x30] sm:$0xff] }
   0x4   :  { %166 = vmatpush.msra.mxu2 %v46_v1  ;;  %167 = vmatpush.msra.mxu3 %v46_v1  ;;  %19 = vst.msk [vmem:[#allocation2 + $0x18] sm:$0xff] %vm15_vm0, %v187_v2  ;;  %v36_v9 = vld [vmem:[%s308_s0 + $0x20] sm:$0xff]  ;;  %v34_v12 = vld [vmem:[%s308_s0 + $0x10] sm:$0xff]  ;;  %v37_v13 = vld [vmem:[%s308_s0 + $0x28] sm:$0xff] }
   0x5   :  { %82 = vmatpush.msra.mxu0 %v46_v1  ;;  %165 = vmatpush.msra.mxu1 %v46_v1  ;;  %20 = vst.msk [vmem:[#allocation2 + $0x20] sm:$0xff] %vm15_vm0, %v187_v2  ;;  %v32_v11 = vld [vmem:[%s308_s0] sm:$0xff]  ;;  %v39_v14 = vld [vmem:[%s308_s0 + $0x38] sm:$0xff]  ;;  %v33_v15 = vld [vmem:[%s308_s0 + $0x8] sm:$0xff] }
   0x6   :  { %169 = vmatpush.msra.mxu2 %v45_v3  ;;  %170 = vmatpush.msra.mxu3 %v45_v3  ;;  %21 = vst.msk [vmem:[#allocation2 + $0x28] sm:$0xff] %vm15_vm0, %v187_v2  ;;  %v35_v16 = vld [vmem:[%s308_s0 + $0x18] sm:$0xff] }
   0x7   :  { %83 = vmatpush.msra.mxu0 %v45_v3  ;;  %168 = vmatpush.msra.mxu1 %v45_v3  ;;  %22 = vst.msk [vmem:[#allocation2 + $0x30] sm:$0xff] %vm15_vm0, %v187_v2 }
   0x8   :  { %172 = vmatpush.msra.mxu2 %v44_v4  ;;  %173 = vmatpush.msra.mxu3 %v44_v4  ;;  %23 = vst.msk [vmem:[#allocation2 + $0x38] sm:$0xff] %vm15_vm0, %v187_v2  ;;  %v24_v17 = vld [vmem:[#allocation2] sm:$0xff] }
   0x9   :  { %84 = vmatpush.msra.mxu0 %v44_v4  ;;  %171 = vmatpush.msra.mxu1 %v44_v4  ;;  %v25_v29 = vld [vmem:[#allocation2 + $0x8] sm:$0xff] }
   0xa   :  { %175 = vmatpush.msra.mxu2 %v43_v5  ;;  %176 = vmatpush.msra.mxu3 %v43_v5  ;;  %v26_v18 = vld [vmem:[#allocation2 + $0x10] sm:$0xff] }
   0xb   :  { %85 = vmatpush.msra.mxu0 %v43_v5  ;;  %174 = vmatpush.msra.mxu1 %v43_v5  ;;  %v27_v30 = vld [vmem:[#allocation2 + $0x18] sm:$0xff] }
   0xc   :  { %178 = vmatpush.msra.mxu2 %v42_v6  ;;  %179 = vmatpush.msra.mxu3 %v42_v6  ;;  %v28_v23 = vld [vmem:[#allocation2 + $0x20] sm:$0xff] }
   0xd   :  { %86 = vmatpush.msra.mxu0 %v42_v6  ;;  %177 = vmatpush.msra.mxu1 %v42_v6  ;;  %v29_v36 = vld [vmem:[#allocation2 + $0x28] sm:$0xff] }
   0xe   :  { %181 = vmatpush.msra.mxu2 %v41_v7  ;;  %182 = vmatpush.msra.mxu3 %v41_v7  ;;  %v30_v24 = vld [vmem:[#allocation2 + $0x30] sm:$0xff] }
   0xf   :  { %87 = vmatpush.msra.mxu0 %v41_v7  ;;  %180 = vmatpush.msra.mxu1 %v41_v7  ;;  %v31_v38 = vld [vmem:[#allocation2 + $0x38] sm:$0xff] }
  0x10   :  { %184 = vmatpush.msra.mxu2 %v40_v8  ;;  %185 = vmatpush.msra.mxu3 %v40_v8 }
  0x11   :  { %158 = vmatmul.msk.f32.vlgmr.msra.gmra.mxu2 %vm48_vm1, %v36_v9  ;;  %160 = vmatmul.msk.f32.vlgmr.msra.gmra.mxu3 %vm48_vm1, %v38_v10 }
  0x12   :  { %88 = vmatpush.msra.mxu0 %v40_v8  ;;  %183 = vmatpush.msra.mxu1 %v40_v8 }
  0x13   :  { %154 = vmatmul.msk.f32.vlgmr.msra.gmra.mxu0 %vm48_vm1, %v32_v11  ;;  %156 = vmatmul.msk.f32.vlgmr.msra.gmra.mxu1 %vm48_vm1, %v34_v12 }
  0x19   :  { %159 = vmatmul.msk.f32.gmra.mxu2 %vm48_vm1, %v37_v13  ;;  %161 = vmatmul.msk.f32.gmra.mxu3 %vm48_vm1, %v39_v14 }
  0x1b   :  { %155 = vmatmul.msk.f32.gmra.mxu0 %vm48_vm1, %v33_v15  ;;  %157 = vmatmul.msk.f32.gmra.mxu1 %vm48_vm1, %v35_v16 }
  0x90   :  { %v90_v19 = vpop.f32.mrf.mxu0  ;;  %v96_v20 = vpop.f32.mrf.mxu1 }
  0x91   :  { %v114_v21 = vadd.f32 %v90_v19, %v24_v17  ;;  %v116_v22 = vadd.f32 %v96_v20, %v26_v18 }
  0x93   :  { %123 = vst.msk [vmem:[#allocation2] sm:$0xff] %vm15_vm0, %v114_v21 }
  0x94   :  { %125 = vst.msk [vmem:[#allocation2 + $0x10] sm:$0xff] %vm15_vm0, %v116_v22  ;;  %v102_v25 = vpop.f32.mrf.mxu2  ;;  %v108_v26 = vpop.f32.mrf.mxu3 }
  0x95   :  { %v118_v27 = vadd.f32 %v102_v25, %v28_v23  ;;  %v120_v28 = vadd.f32 %v108_v26, %v30_v24 }
  0x97   :  { %127 = vst.msk [vmem:[#allocation2 + $0x20] sm:$0xff] %vm15_vm0, %v118_v27 }
  0x98   :  { %129 = vst.msk [vmem:[#allocation2 + $0x30] sm:$0xff] %vm15_vm0, %v120_v28  ;;  %v93_v31 = vpop.f32.mrf.mxu0  ;;  %v99_v32 = vpop.f32.mrf.mxu1 }
  0x99   :  { %v115_v33 = vadd.f32 %v93_v31, %v25_v29  ;;  %v117_v35 = vadd.f32 %v99_v32, %v27_v30 }
  0x9a   :  { %v134_v34 = vld [vmem:[#allocation2] sm:$0xff] }
  0x9b   :  { %142 = vst.msk [vmem:[%s309_s2] sm:$0xff] %vm15_vm0, %v134_v34  ;;  %v136_v37 = vld [vmem:[#allocation2 + $0x10] sm:$0xff] }
  0x9c   :  { %144 = vst.msk [vmem:[%s309_s2 + $0x10] sm:$0xff] %vm15_vm0, %v136_v37  ;;  %v105_v39 = vpop.f32.mrf.mxu2  ;;  %v111_v40 = vpop.f32.mrf.mxu3 }
  0x9d   :  { %124 = vst.msk [vmem:[#allocation2 + $0x8] sm:$0xff] %vm15_vm0, %v115_v33  ;;  %v119_v41 = vadd.f32 %v105_v39, %v29_v36  ;;  %v121_v43 = vadd.f32 %v111_v40, %v31_v38 }
  0x9e   :  { %v138_v42 = vld [vmem:[#allocation2 + $0x20] sm:$0xff]  ;;  %126 = vst.msk [vmem:[#allocation2 + $0x18] sm:$0xff] %vm15_vm0, %v117_v35 }
  0x9f   :  { %146 = vst.msk [vmem:[%s309_s2 + $0x20] sm:$0xff] %vm15_vm0, %v138_v42  ;;  %v140_v44 = vld [vmem:[#allocation2 + $0x30] sm:$0xff] }
  0xa0   :  { %148 = vst.msk [vmem:[%s309_s2 + $0x30] sm:$0xff] %vm15_vm0, %v140_v44 }
  0xa1   :  { %128 = vst.msk [vmem:[#allocation2 + $0x28] sm:$0xff] %vm15_vm0, %v119_v41 }
  0xa2   :  { %130 = vst.msk [vmem:[#allocation2 + $0x38] sm:$0xff] %vm15_vm0, %v121_v43 }
  0xa4   :  { %v135_v45 = vld [vmem:[#allocation2 + $0x8] sm:$0xff] }
  0xa5   :  { %143 = vst.msk [vmem:[%s309_s2 + $0x8] sm:$0xff] %vm15_vm0, %v135_v45  ;;  %v137_v46 = vld [vmem:[#allocation2 + $0x18] sm:$0xff] }
  0xa6   :  { %145 = vst.msk [vmem:[%s309_s2 + $0x18] sm:$0xff] %vm15_vm0, %v137_v46 }
  0xa8   :  { %v139_v47 = vld [vmem:[#allocation2 + $0x28] sm:$0xff] }
  0xa9   :  { %147 = vst.msk [vmem:[%s309_s2 + $0x28] sm:$0xff] %vm15_vm0, %v139_v47  ;;  %v141_v48 = vld [vmem:[#allocation2 + $0x38] sm:$0xff] }
  0xaa   :  { %149 = vst.msk [vmem:[%s309_s2 + $0x38] sm:$0xff] %vm15_vm0, %v141_v48 }

// kernel: session_graph_forward.7
= control target key start
LH: loop header
LB: loop body
LE: loop exit
PB: predicated region body
PF: predicated region fallthrough
CT: control target
= control target key end

     0   :  { %vm143_vm0 = vcmask 257024   ;;  %vm147_vm1 = vcmask 261120   ;;  %vm418_vm2 = vcmask 130112   ;;  %vm422_vm3 = vcmask 195712   ;;  %s922_s2 = inlined_call_operand.vmem [shape: f32[4,32], index: 2, kind: input, shape index: {}]   ;;  %s923_s1 = inlined_call_operand.vmem [shape: f32[4,64,32], index: 1, kind: input, shape index: {}]   ;;  %s924_s0 = inlined_call_operand.vmem [shape: f32[4,64,32], index: 0, kind: input, shape index: {}]   ;;  %s925_s3 = inlined_call_operand.vmem [shape: f32[4,64], index: 3, kind: output, shape index: {}]  }
   0x1   :  { %v142_v0 = vld [vmem:[%s922_s2] sm:$0xf]  ;;  %v17_v1 = vld [vmem:[%s923_s1 + $0x18] sm:$0xff]  ;;  %v15_v3 = vld [vmem:[%s923_s1 + $0x8] sm:$0xff]  ;;  %vm426_vm4 = vcmask 261312   ;;  %vm430_vm5 = vcmask 326912  }
   0x2   :  { %v144_v2 = vsel %vm143_vm0, %v142_v0, 0.0  ;;  %506 = vtanh.f32 %v17_v1  ;;  %v14_v4 = vld [vmem:[%s923_s1] sm:$0xff]  ;;  %v16_v6 = vld [vmem:[%s923_s1 + $0x10] sm:$0xff]  ;;  %v19_v7 = vld [vmem:[%s923_s1 + $0x28] sm:$0xff]  ;;  %vm434_vm6 = vcmask 392512   ;;  %vm438_vm7 = vcmask 458112  }
   0x3   :  { %145 = vadd.xlane.f32.xlu0 %v144_v2  ;;  %508 = vtanh.f32 %v15_v3  ;;  %v18_v5 = vld [vmem:[%s923_s1 + $0x20] sm:$0xff]  ;;  %v81_v8 = vld [vmem:[%s924_s0 + $0x18] sm:$0xff]  ;;  %v79_v9 = vld [vmem:[%s924_s0 + $0x8] sm:$0xff]  ;;  %vm442_vm8 = vcmask 523712   ;;  %vm489_vm9 = vcmask 1041409   ;;  %vm491_vm10 = vcmask 1042434  }
   0x4   :  { %510 = vtanh.f32 %v14_v4  ;;  %v78_v11 = vld [vmem:[%s924_s0] sm:$0xff]  ;;  %v21_v14 = vld [vmem:[%s923_s1 + $0x38] sm:$0xff]  ;;  %v20_v18 = vld [vmem:[%s923_s1 + $0x30] sm:$0xff]  ;;  %vm493_vm11 = vcmask 1043459   ;;  %vm496_vm12 = vcmask 519168  }
   0x5   :  { %512 = vtanh.f32 %v18_v5  ;;  %v82_v17 = vld [vmem:[%s924_s0 + $0x20] sm:$0xff]  ;;  %v80_v22 = vld [vmem:[%s924_s0 + $0x10] sm:$0xff]  ;;  %v83_v26 = vld [vmem:[%s924_s0 + $0x28] sm:$0xff] }
   0x6   :  { %514 = vtanh.f32 %v16_v6  ;;  %v22_v23 = vld [vmem:[%s923_s1 + $0x40] sm:$0xff]  ;;  %v24_v33 = vld [vmem:[%s923_s1 + $0x50] sm:$0xff]  ;;  %v85_v36 = vld [vmem:[%s924_s0 + $0x38] sm:$0xff] }
   0x7   :  { %516 = vtanh.f32 %v19_v7  ;;  %v23_v37 = vld [vmem:[%s923_s1 + $0x48] sm:$0xff]  ;;  %v84_v40 = vld [vmem:[%s924_s0 + $0x30] sm:$0xff]  ;;  %v25_v41 = vld [vmem:[%s923_s1 + $0x58] sm:$0xff] }
   0x8   :  { %v507_v10 = vpop.eup %506  ;;  %518 = vtanh.f32 %v21_v14  ;;  %v86_v43 = vld [vmem:[%s924_s0 + $0x40] sm:$0xff]  ;;  %v27_v48 = vld [vmem:[%s923_s1 + $0x68] sm:$0xff]  ;;  %v88_v51 = vld [vmem:[%s924_s0 + $0x50] sm:$0xff] }
   0x9   :  { %v509_v12 = vpop.eup %508  ;;  %v113_v13 = vmul.f32 %v507_v10, %v81_v8  ;;  %520 = vtanh.f32 %v20_v18  ;;  %v26_v52 = vld [vmem:[%s923_s1 + $0x60] sm:$0xff]  ;;  %v87_v55 = vld [vmem:[%s924_s0 + $0x48] sm:$0xff]  ;;  %v28_v56 = vld [vmem:[%s923_s1 + $0x70] sm:$0xff] }
   0xa   :  { %v511_v15 = vpop.eup %510  ;;  %v111_v16 = vmul.f32 %v509_v12, %v79_v9  ;;  %522 = vtanh.f32 %v22_v23  ;;  %v89_v58 = vld [vmem:[%s924_s0 + $0x58] sm:$0xff]  ;;  %v30_v61 = vld [vmem:[%s923_s1 + $0x80] sm:$0xff]  ;;  %v31_v0 = vld [vmem:[%s923_s1 + $0x88] sm:$0xff] }
   0xb   :  { %v513_v19 = vpop.eup %512  ;;  %v157_v20 = vsel %vm147_vm1, %v113_v13, 0.0  ;;  %v110_v21 = vmul.f32 %v511_v15, %v78_v11  ;;  %524 = vtanh.f32 %v24_v33  ;;  %v29_v63 = vld [vmem:[%s923_s1 + $0x78] sm:$0xff]  ;;  %v91_v4 = vld [vmem:[%s924_s0 + $0x68] sm:$0xff]  ;;  %v90_v5 = vld [vmem:[%s924_s0 + $0x60] sm:$0xff] }
   0xc   :  { %v515_v24 = vpop.eup %514  ;;  %158 = vadd.xlane.f32.xlu2 %v157_v20  ;;  %v151_v25 = vsel %vm147_vm1, %v111_v16, 0.0  ;;  %v114_v29 = vmul.f32 %v513_v19, %v82_v17  ;;  %526 = vtanh.f32 %v23_v37  ;;  %v39_v8 = vld [vmem:[%s923_s1 + $0xc8] sm:$0xff]  ;;  %v38_v9 = vld [vmem:[%s923_s1 + $0xc0] sm:$0xff]  ;;  %v40_v10 = vld [vmem:[%s923_s1 + $0xd0] sm:$0xff] }
   0xd   :  { %v517_v27 = vpop.eup %516  ;;  %152 = vadd.xlane.f32.xlu1 %v151_v25  ;;  %v148_v28 = vsel %vm147_vm1, %v110_v21, 0.0  ;;  %v112_v30 = vmul.f32 %v515_v24, %v80_v22  ;;  %528 = vtanh.f32 %v25_v41  ;;  %v92_v12 = vld [vmem:[%s924_s0 + $0x70] sm:$0xff]  ;;  %v33_v15 = vld [vmem:[%s923_s1 + $0x98] sm:$0xff]  ;;  %v34_v20 = vld [vmem:[%s923_s1 + $0xa0] sm:$0xff] }
   0xe   :  { %149 = vadd.xlane.f32.xlu0 %v148_v28  ;;  %v115_v31 = vmul.f32 %v517_v27, %v83_v26  ;;  %v160_v32 = vsel %vm147_vm1, %v114_v29, 0.0  ;;  %v519_v34 = vpop.eup %518  ;;  %530 = vtanh.f32 %v27_v48  ;;  %v32_v18 = vld [vmem:[%s923_s1 + $0x90] sm:$0xff]  ;;  %v103_v21 = vld [vmem:[%s924_s0 + $0xc8] sm:$0xff]  ;;  %v94_v24 = vld [vmem:[%s924_s0 + $0x80] sm:$0xff] }
   0xf   :  { %v154_v35 = vsel %vm147_vm1, %v112_v30, 0.0  ;;  %v521_v38 = vpop.eup %520  ;;  %v117_v44 = vmul.f32 %v519_v34, %v85_v36  ;;  %532 = vtanh.f32 %v26_v52  ;;  %v93_v27 = vld [vmem:[%s924_s0 + $0x78] sm:$0xff]  ;;  %v102_v28 = vld [vmem:[%s924_s0 + $0xc0] sm:$0xff]  ;;  %v104_v29 = vld [vmem:[%s924_s0 + $0xd0] sm:$0xff] }
  0x10   :  { %v163_v39 = vsel %vm147_vm1, %v115_v31, 0.0  ;;  %v523_v42 = vpop.eup %522  ;;  %v116_v45 = vmul.f32 %v521_v38, %v84_v40  ;;  %534 = vtanh.f32 %v28_v56  ;;  %v42_v33 = vld [vmem:[%s923_s1 + $0xe0] sm:$0xff]  ;;  %v41_v34 = vld [vmem:[%s923_s1 + $0xd8] sm:$0xff]  ;;  %v95_v37 = vld [vmem:[%s924_s0 + $0x88] sm:$0xff] }
  0x11   :  { %v118_v46 = vmul.f32 %v523_v42, %v86_v43  ;;  %v169_v47 = vsel %vm147_vm1, %v117_v44, 0.0  ;;  %v525_v49 = vpop.eup %524  ;;  %536 = vtanh.f32 %v30_v61  ;;  %v96_v56 = vld [vmem:[%s924_s0 + $0x90] sm:$0xff]  ;;  %v37_v61 = vld [vmem:[%s923_s1 + $0xb8] sm:$0xff] }
  0x12   :  { %v166_v50 = vsel %vm147_vm1, %v116_v45, 0.0  ;;  %v527_v53 = vpop.eup %526  ;;  %v120_v59 = vmul.f32 %v525_v49, %v88_v51  ;;  %538 = vtanh.f32 %v29_v63  ;;  %v35_v49 = vld [vmem:[%s923_s1 + $0xa8] sm:$0xff]  ;;  %v45_v63 = vld [vmem:[%s923_s1 + $0xf8] sm:$0xff] }
  0x13   :  { %v172_v54 = vsel %vm147_vm1, %v118_v46, 0.0  ;;  %v529_v57 = vpop.eup %528  ;;  %v119_v60 = vmul.f32 %v527_v53, %v87_v55  ;;  %540 = vtanh.f32 %v31_v0  ;;  %v36_v46 = vld [vmem:[%s923_s1 + $0xb0] sm:$0xff]  ;;  %v97_v53 = vld [vmem:[%s924_s0 + $0x98] sm:$0xff] }
  0x14   :  { %161 = vadd.xlane.f32.xlu2 %v160_v32  ;;  %v121_v62 = vmul.f32 %v529_v57, %v89_v58  ;;  %v178_v1 = vsel %vm147_vm1, %v120_v59, 0.0  ;;  %v531_v2 = vpop.eup %530  ;;  %542 = vtanh.f32 %v39_v8  ;;  %v105_v57 = vld [vmem:[%s924_s0 + $0xd8] sm:$0xff]  ;;  %v107_v58 = vld [vmem:[%s924_s0 + $0xe8] sm:$0xff]  ;;  %v44_v0 = vld [vmem:[%s923_s1 + $0xf0] sm:$0xff] }
  0x15   :  { %155 = vadd.xlane.f32.xlu1 %v154_v35  ;;  %v175_v3 = vsel %vm147_vm1, %v119_v60, 0.0  ;;  %v533_v6 = vpop.eup %532  ;;  %v123_v13 = vmul.f32 %v531_v2, %v91_v4  ;;  %544 = vtanh.f32 %v38_v9  ;;  %v43_v35 = vld [vmem:[%s923_s1 + $0xe8] sm:$0xff]  ;;  %v98_v2 = vld [vmem:[%s924_s0 + $0xa0] sm:$0xff] }
  0x16   :  { %164 = vadd.xlane.f32.xlu0 %v163_v39  ;;  %v181_v7 = vsel %vm147_vm1, %v121_v62, 0.0  ;;  %v535_v11 = vpop.eup %534  ;;  %v122_v14 = vmul.f32 %v533_v6, %v90_v5  ;;  %546 = vtanh.f32 %v40_v10 }
  0x17   :  { %v537_v16 = vpop.eup %536  ;;  %v124_v17 = vmul.f32 %v535_v11, %v92_v12  ;;  %v187_v23 = vsel %vm147_vm1, %v123_v13, 0.0  ;;  %548 = vtanh.f32 %v33_v15  ;;  %v109_v12 = vld [vmem:[%s924_s0 + $0xf8] sm:$0xff] }
  0x18   :  { %v539_v19 = vpop.eup %538  ;;  %v184_v26 = vsel %vm147_vm1, %v122_v14, 0.0  ;;  %550 = vtanh.f32 %v32_v18  ;;  %v126_v39 = vmul.f32 %v537_v16, %v94_v24  ;;  %v108_v18 = vld [vmem:[%s924_s0 + $0xf0] sm:$0xff]  ;;  %v101_v24 = vld [vmem:[%s924_s0 + $0xb8] sm:$0xff] }
  0x19   :  { %v541_v22 = vpop.eup %540  ;;  %v190_v31 = vsel %vm147_vm1, %v124_v17, 0.0  ;;  %552 = vtanh.f32 %v34_v20  ;;  %v125_v42 = vmul.f32 %v539_v19, %v93_v27  ;;  %v100_v17 = vld [vmem:[%s924_s0 + $0xb0] sm:$0xff] }
  0x1a   :  { %v543_v25 = vpop.eup %542  ;;  %554 = vtanh.f32 %v42_v33  ;;  %v127_v45 = vmul.f32 %v541_v22, %v95_v37  ;;  %v196_v52 = vsel %vm147_vm1, %v126_v39, 0.0 }
  0x1b   :  { %v545_v30 = vpop.eup %544  ;;  %v135_v32 = vmul.f32 %v543_v25, %v103_v21  ;;  %556 = vtanh.f32 %v41_v34  ;;  %v193_v55 = vsel %vm147_vm1, %v125_v42, 0.0  ;;  %v99_v21 = vld [vmem:[%s924_s0 + $0xa8] sm:$0xff]  ;;  %v570_v34 = vmov 0  }
  0x1c   :  { %170 = vadd.xlane.f32.xlu2 %v169_v47  ;;  %v547_v36 = vpop.eup %546  ;;  %v134_v38 = vmul.f32 %v545_v30, %v102_v28  ;;  %558 = vtanh.f32 %v43_v35  ;;  %v199_v60 = vsel %vm147_vm1, %v127_v45, 0.0  ;;  %504 = vset.pattern.permute.xlu1 %v570_v34 }
  0x1d   :  { %167 = vadd.xlane.f32.xlu1 %v166_v50  ;;  %v754_v40 = vsel %vm147_vm1, %v135_v32, 0.0  ;;  %v136_v41 = vmul.f32 %v547_v36, %v104_v29  ;;  %v549_v44 = vpop.eup %548  ;;  %v106_v50 = vld [vmem:[%s924_s0 + $0xe0] sm:$0xff]  ;;  %560 = vtanh.f32 %v36_v46  ;;  %503 = vset.pattern.permute.xlu0 %v570_v34 }
  0x1e   :  { %173 = vadd.xlane.f32.xlu0 %v172_v54  ;;  %v757_v43 = vsel %vm147_vm1, %v134_v38, 0.0  ;;  %v551_v48 = vpop.eup %550  ;;  %562 = vtanh.f32 %v35_v49  ;;  %v129_v4 = vmul.f32 %v549_v44, %v97_v53  ;;  %505 = vset.pattern.permute.xlu2 %v570_v34 }
  0x1f   :  { %v763_v47 = vsel %vm147_vm1, %v136_v41, 0.0  ;;  %v553_v51 = vpop.eup %552  ;;  %564 = vtanh.f32 %v45_v63 }
  0x20   :  { %v555_v54 = vpop.eup %554  ;;  %566 = vtanh.f32 %v44_v0  ;;  %v130_v9 = vmul.f32 %v553_v51, %v98_v2  ;;  %v205_v14 = vsel %vm147_vm1, %v129_v4, 0.0 }
  0x21   :  { %v557_v59 = vpop.eup %556  ;;  %v138_v62 = vmul.f32 %v555_v54, %v106_v50  ;;  %568 = vtanh.f32 %v37_v61 }
  0x22   :  { %v208_v20 = vsel %vm147_vm1, %v130_v9, 0.0 }
  0x23   :  { %v232_v5 = vsel %vm147_vm1, %v138_v62, 0.0 }
  0x24   :  { %179 = vadd.xlane.f32.xlu2 %v178_v1  ;;  %v559_v1 = vpop.eup %558 }
  0x25   :  { %176 = vadd.xlane.f32.xlu1 %v175_v3  ;;  %v137_v3 = vmul.f32 %v557_v59, %v105_v57  ;;  %v139_v6 = vmul.f32 %v559_v1, %v107_v58  ;;  %v561_v11 = vpop.eup %560 }
  0x26   :  { %182 = vadd.xlane.f32.xlu0 %v181_v7  ;;  %v128_v7 = vmul.f32 %v551_v48, %v96_v56  ;;  %v563_v13 = vpop.eup %562 }
  0x27   :  { %v229_v8 = vsel %vm147_vm1, %v137_v3, 0.0  ;;  %v235_v10 = vsel %vm147_vm1, %v139_v6, 0.0  ;;  %v565_v15 = vpop.eup %564  ;;  %v131_v28 = vmul.f32 %v563_v13, %v99_v21 }
  0x28   :  { %v202_v16 = vsel %vm147_vm1, %v128_v7, 0.0  ;;  %v567_v19 = vpop.eup %566  ;;  %v141_v22 = vmul.f32 %v565_v15, %v109_v12 }
  0x29   :  { %v140_v25 = vmul.f32 %v567_v19, %v108_v18  ;;  %v211_v32 = vsel %vm147_vm1, %v131_v28, 0.0 }
  0x2a   :  { %v241_v27 = vsel %vm147_vm1, %v141_v22, 0.0 }
  0x2b   :  { %v238_v29 = vsel %vm147_vm1, %v140_v25, 0.0 }
  0x2c   :  { %188 = vadd.xlane.f32.xlu2 %v187_v23  ;;  %v569_v23 = vpop.eup %568 }
  0x2d   :  { %185 = vadd.xlane.f32.xlu1 %v184_v26  ;;  %v132_v26 = vmul.f32 %v561_v11, %v100_v17  ;;  %v133_v30 = vmul.f32 %v569_v23, %v101_v24 }
  0x2e   :  { %191 = vadd.xlane.f32.xlu0 %v190_v31 }
  0x2f   :  { %v214_v31 = vsel %vm147_vm1, %v132_v26, 0.0  ;;  %v217_v33 = vsel %vm147_vm1, %v133_v30, 0.0 }
  0x34   :  { %197 = vadd.xlane.f32.xlu2 %v196_v52 }
  0x35   :  { %194 = vadd.xlane.f32.xlu1 %v193_v55 }
  0x36   :  { %200 = vadd.xlane.f32.xlu0 %v199_v60 }
  0x3c   :  { %206 = vadd.xlane.f32.xlu2 %v205_v14 }
  0x3d   :  { %203 = vadd.xlane.f32.xlu1 %v202_v16 }
  0x3e   :  { %209 = vadd.xlane.f32.xlu0 %v208_v20 }
  0x44   :  { %215 = vadd.xlane.f32.xlu2 %v214_v31 }
  0x45   :  { %212 = vadd.xlane.f32.xlu1 %v211_v32 }
  0x46   :  { %218 = vadd.xlane.f32.xlu0 %v217_v33 }
  0x4c   :  { %224 = vadd.xlane.f32.xlu2 %v754_v40 }
  0x4d   :  { %221 = vadd.xlane.f32.xlu1 %v757_v43 }
  0x4e   :  { %227 = vadd.xlane.f32.xlu0 %v763_v47 }
  0x54   :  { %233 = vadd.xlane.f32.xlu2 %v232_v5 }
  0x55   :  { %230 = vadd.xlane.f32.xlu1 %v229_v8 }
  0x56   :  { %236 = vadd.xlane.f32.xlu0 %v235_v10 }
  0x5c   :  { %242 = vadd.xlane.f32.xlu2 %v241_v27 }
  0x5d   :  { %239 = vadd.xlane.f32.xlu1 %v238_v29 }
  0x76   :  { %v827_v35 = vpop.xlane.xlu0 %145 }
  0x77   :  { %v245_v36 = vperm.slane %v827_v35, 0  ;;  %v246_v53 = vperm.slane %v827_v35, 1  ;;  %v247_v2 = vperm.slane %v827_v35, 2  ;;  %v248_v20 = vperm.slane %v827_v35, 3 }
  0x7f   :  { %v159_v37 = vpop.xlane.xlu2 %158 }
  0x80   :  { %v153_v38 = vpop.xlane.xlu1 %152  ;;  %v256_v50 = vadd.f32 %v245_v36, %v159_v37 }
  0x81   :  { %v254_v39 = vadd.f32 %v245_v36, %v153_v38  ;;  %v150_v40 = vpop.xlane.xlu0 %149 }
  0x82   :  { %v253_v41 = vadd.f32 %v245_v36, %v150_v40 }
  0x83   :  { %321 = vperm.xlu1 %504, %v254_v39  }
  0x84   :  { %318 = vperm.xlu0 %503, %v253_v41   ;;  %v413_v41 = vlaneseq }
  0x87   :  { %v162_v42 = vpop.xlane.xlu2 %161 }
  0x88   :  { %v257_v43 = vadd.f32 %v245_v36, %v162_v42  ;;  %v156_v44 = vpop.xlane.xlu1 %155 }
  0x89   :  { %v255_v45 = vadd.f32 %v245_v36, %v156_v44  ;;  %v165_v46 = vpop.xlane.xlu0 %164 }
  0x8a   :  { %v258_v57 = vadd.f32 %v245_v36, %v165_v46 }
  0x8b   :  { %330 = vperm.xlu1 %504, %v257_v43   ;;  %324 = vperm.xlu2 %505, %v255_v45   ;;  %v833_v43 = vand.u32 127, %v413_v41 }
  0x8d   :  { %v836_v44 = vadd.s32 4294967288, %v833_v43  ;;  %v839_v45 = vadd.s32 4294967280, %v833_v43  ;;  %v842_v46 = vadd.s32 4294967272, %v833_v43 }
  0x8f   :  { %v171_v47 = vpop.xlane.xlu2 %170 }
  0x90   :  { %v260_v48 = vadd.f32 %v245_v36, %v171_v47  ;;  %v168_v49 = vpop.xlane.xlu1 %167 }
  0x91   :  { %v259_v51 = vadd.f32 %v245_v36, %v168_v49  ;;  %v174_v52 = vpop.xlane.xlu0 %173 }
  0x92   :  { %339 = vperm.xlu0 %503, %v260_v48   ;;  %v261_v63 = vadd.f32 %v246_v53, %v174_v52 }
  0x93   :  { %327 = vperm.xlu2 %505, %v256_v50   ;;  %336 = vperm.xlu1 %504, %v259_v51  }
  0x97   :  { %v180_v54 = vpop.xlane.xlu2 %179 }
  0x98   :  { %v263_v55 = vadd.f32 %v246_v53, %v180_v54  ;;  %v177_v56 = vpop.xlane.xlu1 %176 }
  0x99   :  { %v262_v58 = vadd.f32 %v246_v53, %v177_v56  ;;  %v183_v59 = vpop.xlane.xlu0 %182  ;;  %v853_v56 = vadd.s32 4294967264, %v833_v43 }
  0x9a   :  { %348 = vperm.xlu0 %503, %v263_v55   ;;  %v264_v6 = vadd.f32 %v246_v53, %v183_v59 }
  0x9b   :  { %345 = vperm.xlu1 %504, %v262_v58   ;;  %333 = vperm.xlu2 %505, %v258_v57  }
  0x9f   :  { %v189_v60 = vpop.xlane.xlu2 %188 }
  0xa0   :  { %v266_v61 = vadd.f32 %v246_v53, %v189_v60  ;;  %v186_v62 = vpop.xlane.xlu1 %185 }
  0xa1   :  { %v265_v0 = vadd.f32 %v246_v53, %v186_v62  ;;  %v192_v1 = vpop.xlane.xlu0 %191 }
  0xa2   :  { %357 = vperm.xlu0 %503, %v266_v61   ;;  %v267_v12 = vadd.f32 %v246_v53, %v192_v1 }
  0xa3   :  { %354 = vperm.xlu1 %504, %v265_v0   ;;  %342 = vperm.xlu2 %505, %v261_v63  }
  0xa7   :  { %v198_v3 = vpop.xlane.xlu2 %197 }
  0xa8   :  { %v269_v4 = vadd.f32 %v247_v2, %v198_v3  ;;  %v195_v5 = vpop.xlane.xlu1 %194 }
  0xa9   :  { %v268_v7 = vadd.f32 %v246_v53, %v195_v5  ;;  %v201_v8 = vpop.xlane.xlu0 %200 }
  0xaa   :  { %366 = vperm.xlu0 %503, %v269_v4   ;;  %v270_v18 = vadd.f32 %v247_v2, %v201_v8 }
  0xab   :  { %363 = vperm.xlu1 %504, %v268_v7   ;;  %351 = vperm.xlu2 %505, %v264_v6  }
  0xaf   :  { %v207_v9 = vpop.xlane.xlu2 %206 }
  0xb0   :  { %v272_v10 = vadd.f32 %v247_v2, %v207_v9  ;;  %v204_v11 = vpop.xlane.xlu1 %203 }
  0xb1   :  { %v271_v13 = vadd.f32 %v247_v2, %v204_v11  ;;  %v210_v15 = vpop.xlane.xlu0 %209 }
  0xb2   :  { %375 = vperm.xlu0 %503, %v272_v10   ;;  %v273_v24 = vadd.f32 %v247_v2, %v210_v15 }
  0xb3   :  { %372 = vperm.xlu1 %504, %v271_v13   ;;  %360 = vperm.xlu2 %505, %v267_v12  }
  0xb7   :  { %v216_v14 = vpop.xlane.xlu2 %215 }
  0xb8   :  { %v275_v16 = vadd.f32 %v247_v2, %v216_v14  ;;  %v213_v17 = vpop.xlane.xlu1 %212 }
  0xb9   :  { %v274_v19 = vadd.f32 %v247_v2, %v213_v17  ;;  %v219_v26 = vpop.xlane.xlu0 %218 }
  0xba   :  { %384 = vperm.xlu0 %503, %v275_v16   ;;  %v276_v30 = vadd.f32 %v247_v2, %v219_v26 }
  0xbb   :  { %381 = vperm.xlu1 %504, %v274_v19   ;;  %369 = vperm.xlu2 %505, %v270_v18  }
  0xbf   :  { %v225_v21 = vpop.xlane.xlu2 %224 }
  0xc0   :  { %v278_v22 = vadd.f32 %v248_v20, %v225_v21  ;;  %v222_v23 = vpop.xlane.xlu1 %221 }
  0xc1   :  { %v277_v25 = vadd.f32 %v248_v20, %v222_v23  ;;  %v228_v32 = vpop.xlane.xlu0 %227 }
  0xc2   :  { %393 = vperm.xlu0 %503, %v278_v22   ;;  %v279_v36 = vadd.f32 %v248_v20, %v228_v32 }
  0xc3   :  { %390 = vperm.xlu1 %504, %v277_v25   ;;  %378 = vperm.xlu2 %505, %v273_v24  }
  0xc7   :  { %v234_v27 = vpop.xlane.xlu2 %233 }
  0xc8   :  { %v281_v28 = vadd.f32 %v248_v20, %v234_v27  ;;  %v231_v29 = vpop.xlane.xlu1 %230 }
  0xc9   :  { %v280_v31 = vadd.f32 %v248_v20, %v231_v29  ;;  %v237_v38 = vpop.xlane.xlu0 %236 }
  0xca   :  { %402 = vperm.xlu0 %503, %v281_v28   ;;  %v282_v39 = vadd.f32 %v248_v20, %v237_v38 }
  0xcb   :  { %399 = vperm.xlu1 %504, %v280_v31   ;;  %387 = vperm.xlu2 %505, %v276_v30   ;;  %v432_v30 = vadd.s32 4294967256, %v833_v43 }
  0xcf   :  { %v243_v33 = vpop.xlane.xlu2 %242 }
  0xd0   :  { %v284_v34 = vadd.f32 %v248_v20, %v243_v33  ;;  %v240_v35 = vpop.xlane.xlu1 %239 }
  0xd1   :  { %v283_v37 = vadd.f32 %v248_v20, %v240_v35 }
  0xd2   :  { %411 = vperm.xlu0 %503, %v284_v34   ;;  %v436_v34 = vadd.s32 4294967248, %v833_v43 }
  0xd3   :  { %408 = vperm.xlu1 %504, %v283_v37   ;;  %396 = vperm.xlu2 %505, %v279_v36  }
  0xdb   :  { %405 = vperm.xlu2 %505, %v282_v39  }
  0xe5   :  { %v325_v40 = vpop.permute.xlu2 %324 }
  0xe6   :  { %v421_v52 = vperm.slane %v325_v40, %v839_v45 }
  0xed   :  { %v328_v42 = vpop.permute.xlu2 %327 }
  0xee   :  { %v425_v53 = vperm.slane %v328_v42, %v842_v46 }
  0xf5   :  { %v322_v47 = vpop.permute.xlu1 %321  ;;  %v844_v48 = vpop.permute.xlu2 %333 }
  0xf6   :  { %v417_v49 = vperm.slane %v322_v47, %v836_v44  ;;  %v319_v50 = vpop.permute.xlu0 %318 }
  0xf7   :  { %v415_v51 = vperm.slane %v319_v50, %v833_v43  ;;  %v440_v50 = vadd.s32 4294967240, %v833_v43 }
  0xf9   :  { %v419_v54 = vsel %vm418_vm2, %v417_v49, %v415_v51 }
  0xfa   :  { %v423_v55 = vsel %vm422_vm3, %v421_v52, %v419_v54 }
  0xfb   :  { %v427_v57 = vsel %vm426_vm4, %v425_v53, %v423_v55 }
  0xfd   :  { %v331_v58 = vpop.permute.xlu1 %330  ;;  %v343_v59 = vpop.permute.xlu2 %342 }
  0xfe   :  { %v429_v60 = vperm.slane %v331_v58, %v853_v56  ;;  %v444_v18 = vperm.slane %v343_v59, %v833_v43  ;;  %v433_v58 = vperm.slane %v844_v48, %v432_v30 }
 0x100   :  { %v858_v61 = vsel %vm430_vm5, %v429_v60, %v427_v57 }
 0x104   :  { %v860_v62 = vpop.permute.xlu0 %339 }
 0x105   :  { %v862_v63 = vpop.permute.xlu1 %336  ;;  %v352_v0 = vpop.permute.xlu2 %351 }
 0x106   :  { %v449_v33 = vperm.slane %v352_v0, %v842_v46  ;;  %v437_v53 = vperm.slane %v862_v63, %v436_v34  ;;  %v435_v63 = vsel %vm434_vm6, %v433_v58, %v858_v61  ;;  %v441_v0 = vperm.slane %v860_v62, %v440_v50 }
 0x10c   :  { %v349_v1 = vpop.permute.xlu0 %348 }
 0x10d   :  { %v346_v2 = vpop.permute.xlu1 %345  ;;  %v864_v3 = vpop.permute.xlu2 %360  ;;  %v447_v21 = vperm.slane %v349_v1, %v839_v45 }
 0x10e   :  { %v445_v15 = vperm.slane %v346_v2, %v836_v44 }
 0x110   :  { %v446_v23 = vsel %vm418_vm2, %v445_v15, %v444_v18 }
 0x111   :  { %v448_v31 = vsel %vm422_vm3, %v447_v21, %v446_v23 }
 0x112   :  { %v450_v38 = vsel %vm426_vm4, %v449_v33, %v448_v31 }
 0x114   :  { %v358_v4 = vpop.permute.xlu0 %357 }
 0x115   :  { %v355_v5 = vpop.permute.xlu1 %354  ;;  %v370_v6 = vpop.permute.xlu2 %369  ;;  %v453_v39 = vperm.slane %v358_v4, %v432_v30 }
 0x116   :  { %v460_v22 = vperm.slane %v370_v6, %v836_v44  ;;  %v451_v32 = vperm.slane %v355_v5, %v853_v56 }
 0x11c   :  { %v367_v7 = vpop.permute.xlu0 %366 }
 0x11d   :  { %v866_v8 = vpop.permute.xlu1 %363  ;;  %v379_v9 = vpop.permute.xlu2 %378  ;;  %v459_v16 = vperm.slane %v367_v7, %v833_v43 }
 0x11e   :  { %v466_v40 = vperm.slane %v379_v9, %v853_v56 }
 0x11f   :  { %v461_v24 = vsel %vm418_vm2, %v460_v22, %v459_v16 }
 0x124   :  { %v376_v10 = vpop.permute.xlu0 %375 }
 0x125   :  { %v373_v11 = vpop.permute.xlu1 %372  ;;  %v868_v14 = vpop.permute.xlu2 %387  ;;  %v464_v25 = vperm.slane %v376_v10, %v842_v46 }
 0x126   :  { %v462_v19 = vperm.slane %v373_v11, %v839_v45  ;;  %v472_v2 = vperm.slane %v868_v14, %v440_v50 }
 0x128   :  { %v463_v27 = vsel %vm422_vm3, %v462_v19, %v461_v24 }
 0x129   :  { %v465_v35 = vsel %vm426_vm4, %v464_v25, %v463_v27 }
 0x12a   :  { %v467_v51 = vsel %vm430_vm5, %v466_v40, %v465_v35 }
 0x12c   :  { %v385_v12 = vpop.permute.xlu0 %384 }
 0x12d   :  { %v382_v13 = vpop.permute.xlu1 %381  ;;  %v397_v26 = vpop.permute.xlu2 %396  ;;  %v470_v52 = vperm.slane %v385_v12, %v436_v34 }
 0x12e   :  { %v468_v36 = vperm.slane %v382_v13, %v432_v30  ;;  %v477_v47 = vperm.slane %v397_v26, %v839_v45 }
 0x130   :  { %v469_v54 = vsel %vm434_vm6, %v468_v36, %v467_v51 }
 0x131   :  { %v471_v1 = vsel %vm438_vm7, %v470_v52, %v469_v54 }
 0x134   :  { %v394_v17 = vpop.permute.xlu0 %393 }
 0x135   :  { %v391_v20 = vpop.permute.xlu1 %390  ;;  %v475_v29 = vperm.slane %v394_v17, %v836_v44  ;;  %v452_v44 = vsel %vm430_vm5, %v451_v32, %v450_v38  ;;  %v406_v60 = vpop.permute.xlu2 %405 }
 0x136   :  { %v474_v28 = vperm.slane %v391_v20, %v833_v43  ;;  %v454_v45 = vsel %vm434_vm6, %v453_v39, %v452_v44  ;;  %v455_v43 = vperm.slane %v864_v3, %v436_v34  ;;  %v483_v6 = vperm.slane %v406_v60, %v432_v30 }
 0x138   :  { %v476_v41 = vsel %vm418_vm2, %v475_v29, %v474_v28  ;;  %v456_v48 = vsel %vm438_vm7, %v455_v43, %v454_v45 }
 0x139   :  { %v478_v55 = vsel %vm422_vm3, %v477_v47, %v476_v41 }
 0x13c   :  { %v403_v37 = vpop.permute.xlu0 %402 }
 0x13d   :  { %v400_v42 = vpop.permute.xlu1 %399  ;;  %v481_v57 = vperm.slane %v403_v37, %v853_v56  ;;  %v439_v56 = vsel %vm438_vm7, %v437_v53, %v435_v63 }
 0x13e   :  { %v479_v49 = vperm.slane %v400_v42, %v842_v46  ;;  %v457_v46 = vperm.slane %v866_v8, %v440_v50  ;;  %v473_v8 = vsel %vm442_vm8, %v472_v2, %v471_v1  ;;  %v443_v9 = vsel %vm442_vm8, %v441_v0, %v439_v56 }
 0x140   :  { %v480_v59 = vsel %vm426_vm4, %v479_v49, %v478_v55  ;;  %v458_v3 = vsel %vm442_vm8, %v457_v46, %v456_v48 }
 0x141   :  { %v482_v4 = vsel %vm430_vm5, %v481_v57, %v480_v59  ;;  %v490_v11 = vsel %vm489_vm9, %v458_v3, %v443_v9 }
 0x142   :  { %v484_v10 = vsel %vm434_vm6, %v483_v6, %v482_v4  ;;  %v492_v13 = vsel %vm491_vm10, %v473_v8, %v490_v11 }
 0x144   :  { %v412_v5 = vpop.permute.xlu0 %411 }
 0x145   :  { %v409_v7 = vpop.permute.xlu1 %408  ;;  %v487_v61 = vperm.slane %v412_v5, %v440_v50 }
 0x146   :  { %v485_v62 = vperm.slane %v409_v7, %v436_v34 }
 0x148   :  { %v486_v12 = vsel %vm438_vm7, %v485_v62, %v484_v10 }
 0x149   :  { %v488_v14 = vsel %vm442_vm8, %v487_v61, %v486_v12 }
 0x14a   :  { %v494_v15 = vsel %vm493_vm11, %v488_v14, %v492_v13 }
 0x14b   :  { %497 = vst.msk [vmem:[%s925_s3] sm:$0xf] %vm496_vm12, %v494_v15 }

// kernel: session_graph_forward.8
= control target key start
LH: loop header
LB: loop body
LE: loop exit
PB: predicated region body
PF: predicated region fallthrough
CT: control target
= control target key end

     0   :  { %vm57_vm0 = vcmask 523264   ;;  %vm15_vm1 = vcmask 7168   ;;  %v690_v3 = vmov -inf   ;;  %v691_v17 = vmov 0   ;;  %s988_s0 = inlined_call_operand.vmem [shape: f32[64,64], index: 0, kind: input, shape index: {}]   ;;  %s989_s1 = inlined_call_operand.vmem [shape: f32[64,32], index: 1, kind: input, shape index: {}]   ;;  %s990_s2 = inlined_call_operand.vmem [shape: f32[64,32], index: 2, kind: output, shape index: {}]  }
   0x1   :  { %v711_v0 = vld [vmem:[%s988_s0 + $0x28] sm:$0xff]  ;;  %v716_v1 = vld [vmem:[%s988_s0 + $0x20] sm:$0xff]  ;;  %21 = vst.msk [vmem:[#allocation2 + $0x28] sm:$0xff] %vm15_vm1, %v690_v3  ;;  %v735_v7 = vld [vmem:[%s988_s0 + $0x38] sm:$0xff]  ;;  %641 = vset.pattern.permute.xlu1 %v691_v17  ;;  %639 = vset.pattern.permute.xlu2 %v691_v17  ;;  %v692_v18 = vmov 0.0   ;;  %vm32_vm2 = vcmask 261120  }
   0x2   :  { %v721_v2 = vld [vmem:[%s988_s0] sm:$0xff]  ;;  %v73_v4 = vsel %vm57_vm0, %v711_v0, -inf  ;;  %v70_v5 = vsel %vm57_vm0, %v716_v1, -inf  ;;  %16 = vst.msk [vmem:[#allocation2] sm:$0xff] %vm15_vm1, %v690_v3  ;;  %v740_v8 = vld [vmem:[%s988_s0 + $0x30] sm:$0xff]  ;;  %v79_v10 = vsel %vm57_vm0, %v735_v7, -inf  ;;  %640 = vset.pattern.permute.xlu0 %v691_v17 }
   0x3   :  { %v58_v6 = vsel %vm57_vm0, %v721_v2, -inf  ;;  %74 = vmax.xlane.f32.xlu2 %v73_v4  ;;  %71 = vmax.xlane.f32.xlu0 %v70_v5  ;;  %17 = vst.msk [vmem:[#allocation2 + $0x8] sm:$0xff] %vm15_vm1, %v690_v3  ;;  %v746_v9 = vld [vmem:[%s988_s0 + $0x10] sm:$0xff]  ;;  %v76_v11 = vsel %vm57_vm0, %v740_v8, -inf  ;;  %v761_v13 = vld [vmem:[%s988_s0 + $0x8] sm:$0xff]  ;;  %v766_v14 = vld [vmem:[%s988_s0 + $0x18] sm:$0xff] }
   0x4   :  { %59 = vmax.xlane.f32.xlu1 %v58_v6  ;;  %18 = vst.msk [vmem:[#allocation2 + $0x10] sm:$0xff] %vm15_vm1, %v690_v3  ;;  %v64_v12 = vsel %vm57_vm0, %v746_v9, -inf  ;;  %v61_v15 = vsel %vm57_vm0, %v761_v13, -inf  ;;  %v67_v16 = vsel %vm57_vm0, %v766_v14, -inf  ;;  %v314_v39 = vld [vmem:[%s989_s1 + $0x38] sm:$0xff]  ;;  %v313_v40 = vld [vmem:[%s989_s1 + $0x30] sm:$0xff] }
   0x5   :  { %19 = vst.msk [vmem:[#allocation2 + $0x18] sm:$0xff] %vm15_vm1, %v690_v3  ;;  %613 = vmatpush.msra.mxu2 %v314_v39  ;;  %612 = vmatpush.msra.mxu1 %v314_v39  ;;  %v312_v6 = vld [vmem:[%s989_s1 + $0x28] sm:$0xff]  ;;  %vm118_vm3 = vcmp.gt.f32.partialorder %v716_v1, -1e+29  ;;  %vm116_vm4 = vcmp.gt.f32.partialorder %v746_v9, -1e+29 }
   0x6   :  { %20 = vst.msk [vmem:[#allocation2 + $0x20] sm:$0xff] %vm15_vm1, %v690_v3  ;;  %347 = vmatpush.msra.mxu0 %v314_v39  ;;  %614 = vmatpush.msra.mxu3 %v314_v39  ;;  %vm119_vm5 = vcmp.gt.f32.partialorder %v711_v0, -1e+29  ;;  %vm115_vm6 = vcmp.gt.f32.partialorder %v761_v13, -1e+29 }
   0x7   :  { %22 = vst.msk [vmem:[#allocation2 + $0x30] sm:$0xff] %vm15_vm1, %v690_v3  ;;  %616 = vmatpush.msra.mxu2 %v313_v40  ;;  %615 = vmatpush.msra.mxu1 %v313_v40  ;;  %vm114_vm7 = vcmp.gt.f32.partialorder %v721_v2, -1e+29  ;;  %vm120_vm8 = vcmp.gt.f32.partialorder %v740_v8, -1e+29 }
   0x8   :  { %23 = vst.msk [vmem:[#allocation2 + $0x38] sm:$0xff] %vm15_vm1, %v690_v3  ;;  %v788_v19 = vld [vmem:[#allocation2 + $0x28] sm:$0xff]  ;;  %348 = vmatpush.msra.mxu0 %v313_v40  ;;  %617 = vmatpush.msra.mxu3 %v313_v40  ;;  %vm121_vm9 = vcmp.gt.f32.partialorder %v735_v7, -1e+29  ;;  %vm117_vm10 = vcmp.gt.f32.partialorder %v766_v14, -1e+29 }
   0x9   :  { %24 = vst.msk [vmem:[#allocation3] sm:$0xff] %vm15_vm1, %v692_v18  ;;  %v49_v21 = vld [vmem:[#allocation2] sm:$0xff]  ;;  %619 = vmatpush.msra.mxu2 %v312_v6  ;;  %618 = vmatpush.msra.mxu1 %v312_v6 }
   0xa   :  { %25 = vst.msk [vmem:[#allocation3 + $0x8] sm:$0xff] %vm15_vm1, %v692_v18  ;;  %v50_v43 = vld [vmem:[#allocation2 + $0x8] sm:$0xff]  ;;  %349 = vmatpush.msra.mxu0 %v312_v6  ;;  %620 = vmatpush.msra.mxu3 %v312_v6 }
   0xb   :  { %80 = vmax.xlane.f32.xlu2 %v79_v10  ;;  %77 = vmax.xlane.f32.xlu0 %v76_v11  ;;  %26 = vst.msk [vmem:[#allocation3 + $0x10] sm:$0xff] %vm15_vm1, %v692_v18  ;;  %v51_v30 = vld [vmem:[#allocation2 + $0x10] sm:$0xff]  ;;  %v311_v10 = vld [vmem:[%s989_s1 + $0x20] sm:$0xff]  ;;  %v310_v11 = vld [vmem:[%s989_s1 + $0x18] sm:$0xff] }
   0xc   :  { %65 = vmax.xlane.f32.xlu1 %v64_v12  ;;  %27 = vst.msk [vmem:[#allocation3 + $0x18] sm:$0xff] %vm15_vm1, %v692_v18  ;;  %v52_v44 = vld [vmem:[#allocation2 + $0x18] sm:$0xff]  ;;  %622 = vmatpush.msra.mxu2 %v311_v10  ;;  %v309_v12 = vld [vmem:[%s989_s1 + $0x10] sm:$0xff] }
   0xd   :  { %28 = vst.msk [vmem:[#allocation3 + $0x20] sm:$0xff] %vm15_vm1, %v692_v18  ;;  %v53_v20 = vld [vmem:[#allocation2 + $0x20] sm:$0xff]  ;;  %621 = vmatpush.msra.mxu1 %v311_v10  ;;  %350 = vmatpush.msra.mxu0 %v311_v10 }
   0xe   :  { %29 = vst.msk [vmem:[#allocation3 + $0x28] sm:$0xff] %vm15_vm1, %v692_v18  ;;  %v55_v29 = vld [vmem:[#allocation2 + $0x30] sm:$0xff]  ;;  %623 = vmatpush.msra.mxu3 %v311_v10  ;;  %625 = vmatpush.msra.mxu2 %v310_v11 }
   0xf   :  { %30 = vst.msk [vmem:[#allocation3 + $0x30] sm:$0xff] %vm15_vm1, %v692_v18  ;;  %v797_v28 = vld [vmem:[#allocation2 + $0x38] sm:$0xff]  ;;  %624 = vmatpush.msra.mxu1 %v310_v11  ;;  %351 = vmatpush.msra.mxu0 %v310_v11 }
  0x10   :  { %31 = vst.msk [vmem:[#allocation3 + $0x38] sm:$0xff] %vm15_vm1, %v692_v18  ;;  %626 = vmatpush.msra.mxu3 %v310_v11  ;;  %628 = vmatpush.msra.mxu2 %v309_v12 }
  0x11   :  { %627 = vmatpush.msra.mxu1 %v309_v12  ;;  %352 = vmatpush.msra.mxu0 %v309_v12  ;;  %34 = vst.msk [vmem:[#allocation4 + $0x8] sm:$0xff] %vm32_vm2, %v692_v18 }
  0x12   :  { %629 = vmatpush.msra.mxu3 %v309_v12  ;;  %33 = vst.msk [vmem:[#allocation4] sm:$0xff] %vm32_vm2, %v692_v18 }
  0x13   :  { %62 = vmax.xlane.f32.xlu0 %v61_v15  ;;  %v308_v15 = vld [vmem:[%s989_s1 + $0x8] sm:$0xff]  ;;  %35 = vst.msk [vmem:[#allocation4 + $0x10] sm:$0xff] %vm32_vm2, %v692_v18 }
  0x14   :  { %68 = vmax.xlane.f32.xlu1 %v67_v16  ;;  %631 = vmatpush.msra.mxu2 %v308_v15  ;;  %v307_v16 = vld [vmem:[%s989_s1] sm:$0xff]  ;;  %36 = vst.msk [vmem:[#allocation4 + $0x18] sm:$0xff] %vm32_vm2, %v692_v18 }
  0x15   :  { %630 = vmatpush.msra.mxu1 %v308_v15  ;;  %353 = vmatpush.msra.mxu0 %v308_v15  ;;  %37 = vst.msk [vmem:[#allocation4 + $0x20] sm:$0xff] %vm32_vm2, %v692_v18 }
  0x16   :  { %632 = vmatpush.msra.mxu3 %v308_v15  ;;  %634 = vmatpush.msra.mxu2 %v307_v16  ;;  %38 = vst.msk [vmem:[#allocation4 + $0x28] sm:$0xff] %vm32_vm2, %v692_v18  ;;  %v196_v15 = vld [vmem:[#allocation3 + $0x10] sm:$0xff] }
  0x17   :  { %633 = vmatpush.msra.mxu1 %v307_v16  ;;  %354 = vmatpush.msra.mxu0 %v307_v16  ;;  %39 = vst.msk [vmem:[#allocation4 + $0x30] sm:$0xff] %vm32_vm2, %v692_v18 }
  0x18   :  { %635 = vmatpush.msra.mxu3 %v307_v16  ;;  %40 = vst.msk [vmem:[#allocation4 + $0x38] sm:$0xff] %vm32_vm2, %v692_v18 }
  0x76   :  { %v75_v22 = vpop.xlane.xlu2 %74  ;;  %v72_v23 = vpop.xlane.xlu0 %71 }
  0x77   :  { %v791_v24 = vmax.f32 %v788_v19, %v75_v22  ;;  %v86_v25 = vmax.f32 %v53_v20, %v72_v23  ;;  %v60_v26 = vpop.xlane.xlu1 %59 }
  0x78   :  { %v82_v27 = vmax.f32 %v49_v21, %v60_v26 }
  0x79   :  { %402 = vst.msk [vmem:[#allocation2 + $0x28] sm:$0xff] %vm15_vm1, %v791_v24  ;;  %144 = vperm.xlu2 %639, %v86_v25   ;;  %v94_v46 = vsub.f32 %v53_v20, %v86_v25  ;;  %v95_v58 = vsub.f32 %v788_v19, %v791_v24 }
  0x7a   :  { %401 = vst.msk [vmem:[#allocation2 + $0x20] sm:$0xff] %vm15_vm1, %v86_v25  ;;  %124 = vperm.xlu1 %641, %v82_v27   ;;  %v90_v41 = vsub.f32 %v49_v21, %v82_v27 }
  0x7b   :  { %397 = vst.msk [vmem:[#allocation2] sm:$0xff] %vm15_vm1, %v82_v27  ;;  %v106_v52 = vmul.f32 1.442695, %v94_v46  ;;  %v108_v61 = vmul.f32 1.442695, %v95_v58 }
  0x7c   :  { %v98_v47 = vmul.f32 1.442695, %v90_v41 }
  0x7e   :  { %v81_v31 = vpop.xlane.xlu2 %80  ;;  %v78_v32 = vpop.xlane.xlu0 %77 }
  0x7f   :  { %v800_v33 = vmax.f32 %v797_v28, %v81_v31  ;;  %v88_v34 = vmax.f32 %v55_v29, %v78_v32  ;;  %v66_v35 = vpop.xlane.xlu1 %65 }
  0x80   :  { %v84_v36 = vmax.f32 %v51_v30, %v66_v35 }
  0x81   :  { %v97_v37 = vsub.f32 %v797_v28, %v800_v33  ;;  %404 = vst.msk [vmem:[#allocation2 + $0x38] sm:$0xff] %vm15_vm1, %v800_v33  ;;  %154 = vperm.xlu0 %640, %v88_v34   ;;  %v96_v59 = vsub.f32 %v55_v29, %v88_v34 }
  0x82   :  { %403 = vst.msk [vmem:[#allocation2 + $0x30] sm:$0xff] %vm15_vm1, %v88_v34  ;;  %v92_v38 = vsub.f32 %v51_v30, %v84_v36  ;;  %159 = vperm.xlu1 %641, %v800_v33   ;;  %134 = vperm.xlu2 %639, %v84_v36  }
  0x83   :  { %399 = vst.msk [vmem:[#allocation2 + $0x10] sm:$0xff] %vm15_vm1, %v84_v36  ;;  %v110_v63 = vmul.f32 1.442695, %v96_v59 }
  0x84   :  { %v102_v42 = vmul.f32 1.442695, %v92_v38 }
  0x86   :  { %v63_v45 = vpop.xlane.xlu0 %62  ;;  %642 = vpow2.f32 %v102_v42 }
  0x87   :  { %v69_v48 = vpop.xlane.xlu1 %68  ;;  %v83_v49 = vmax.f32 %v50_v43, %v63_v45  ;;  %644 = vpow2.f32 %v98_v47 }
  0x88   :  { %v85_v50 = vmax.f32 %v52_v44, %v69_v48  ;;  %646 = vpow2.f32 %v106_v52 }
  0x89   :  { %v91_v51 = vsub.f32 %v50_v43, %v83_v49  ;;  %398 = vst.msk [vmem:[#allocation2 + $0x8] sm:$0xff] %vm15_vm1, %v83_v49 }
  0x8a   :  { %400 = vst.msk [vmem:[#allocation2 + $0x18] sm:$0xff] %vm15_vm1, %v85_v50  ;;  %149 = vperm.xlu2 %639, %v791_v24   ;;  %139 = vperm.xlu1 %641, %v85_v50   ;;  %v93_v53 = vsub.f32 %v52_v44, %v85_v50 }
  0x8b   :  { %v100_v55 = vmul.f32 1.442695, %v91_v51 }
  0x8c   :  { %v818_v54 = vpop.eup %642  ;;  %v104_v56 = vmul.f32 1.442695, %v93_v53 }
  0x8d   :  { %271 = vperm.xlu0 %640, %v818_v54   ;;  %v821_v57 = vpop.eup %644  ;;  %648 = vpow2.f32 %v100_v55 }
  0x8e   :  { %650 = vpow2.f32 %v104_v56  ;;  %v826_v60 = vpop.eup %646 }
  0x8f   :  { %652 = vpow2.f32 %v108_v61 }
  0x90   :  { %654 = vpow2.f32 %v110_v63 }
  0x92   :  { %129 = vperm.xlu2 %639, %v83_v49   ;;  %261 = vperm.xlu1 %641, %v821_v57  }
  0x93   :  { %v829_v62 = vpop.eup %648 }
  0x94   :  { %v831_v3 = vpop.eup %650 }
  0x95   :  { %281 = vperm.xlu0 %640, %v826_v60   ;;  %v835_v4 = vpop.eup %652 }
  0x96   :  { %v837_v5 = vpop.eup %654 }
  0x9a   :  { %266 = vperm.xlu2 %639, %v829_v62   ;;  %276 = vperm.xlu1 %641, %v831_v3  }
  0xa2   :  { %286 = vperm.xlu2 %639, %v835_v4   ;;  %291 = vperm.xlu1 %641, %v837_v5  }
  0xd3   :  { %v145_v17 = vpop.permute.xlu2 %144 }
  0xd4   :  { %v166_v19 = vsub.f32 %v716_v1, %v145_v17  ;;  %v204_v17 = vmul.f32 %v818_v54, %v196_v15 }
  0xd6   :  { %v178_v20 = vmul.f32 1.442695, %v166_v19 }
  0xd8   :  { %656 = vpow2.f32 %v178_v20 }
  0xdc   :  { %v135_v21 = vpop.permute.xlu2 %134 }
  0xdd   :  { %v164_v22 = vsub.f32 %v746_v9, %v135_v21  ;;  %v255_v21 = vld [vmem:[#allocation4 + $0x20] sm:$0xff] }
  0xde   :  { %v657_v23 = vpop.eup %656 }
  0xdf   :  { %v174_v24 = vmul.f32 1.442695, %v164_v22  ;;  %v190_v25 = vsel %vm118_vm3, %v657_v23, 0.0  ;;  %v199_v23 = vld [vmem:[#allocation3 + $0x28] sm:$0xff] }
  0xe0   :  { %608 = vmatmul.msk.f32.vlgmr.msra.gmra.mxu2 %vm57_vm0, %v190_v25  ;;  %v222_v56 = vsel %vm57_vm0, %v190_v25, 0.0 }
  0xe1   :  { %658 = vpow2.f32 %v174_v24  ;;  %v253_v24 = vld [vmem:[#allocation4 + $0x10] sm:$0xff] }
  0xe4   :  { %v150_v26 = vpop.permute.xlu2 %149 }
  0xe5   :  { %v167_v27 = vsub.f32 %v711_v0, %v150_v26 }
  0xe7   :  { %v659_v29 = vpop.eup %658  ;;  %v180_v18 = vmul.f32 1.442695, %v167_v27 }
  0xe8   :  { %v188_v30 = vsel %vm116_vm4, %v659_v29, 0.0  ;;  %v207_v29 = vmul.f32 %v835_v4, %v199_v23 }
  0xe9   :  { %660 = vpow2.f32 %v180_v18  ;;  %606 = vmatmul.msk.f32.vlgmr.msra.gmra.mxu1 %vm57_vm0, %v188_v30  ;;  %v216_v1 = vsel %vm57_vm0, %v188_v30, 0.0 }
  0xea   :  { %217 = vadd.xlane.f32.xlu1 %v216_v1 }
  0xec   :  { %v130_v31 = vpop.permute.xlu2 %129  ;;  %v125_v32 = vpop.permute.xlu1 %124 }
  0xed   :  { %v163_v34 = vsub.f32 %v761_v13, %v130_v31  ;;  %v162_v35 = vsub.f32 %v721_v2, %v125_v32 }
  0xef   :  { %v661_v36 = vpop.eup %660  ;;  %v172_v38 = vmul.f32 1.442695, %v163_v34  ;;  %v170_v9 = vmul.f32 1.442695, %v162_v35 }
  0xf0   :  { %v191_v39 = vsel %vm119_vm5, %v661_v36, 0.0  ;;  %v195_v36 = vld [vmem:[#allocation3 + $0x8] sm:$0xff] }
  0xf1   :  { %662 = vpow2.f32 %v172_v38  ;;  %609 = vmatmul.msk.f32.gmra.mxu2 %vm57_vm0, %v191_v39  ;;  %v225_v40 = vsel %vm57_vm0, %v191_v39, 0.0  ;;  %v194_v38 = vld [vmem:[#allocation3] sm:$0xff] }
  0xf2   :  { %664 = vpow2.f32 %v170_v9  ;;  %226 = vadd.xlane.f32.xlu1 %v225_v40  ;;  %v203_v9 = vmul.f32 %v829_v62, %v195_v36  ;;  %v202_v39 = vmul.f32 %v821_v57, %v194_v38 }
  0xf3   :  { %v155_v41 = vpop.permute.xlu0 %154 }
  0xf4   :  { %v168_v42 = vsub.f32 %v740_v8, %v155_v41  ;;  %v160_v43 = vpop.permute.xlu1 %159  ;;  %v911_v16 = vpop.permute.xlu2 %266 }
  0xf5   :  { %v169_v0 = vsub.f32 %v735_v7, %v160_v43 }
  0xf6   :  { %v182_v44 = vmul.f32 1.442695, %v168_v42  ;;  %v112_v42 = vmul.f32 1.442695, %v97_v37 }
  0xf7   :  { %v663_v45 = vpop.eup %662  ;;  %v184_v50 = vmul.f32 1.442695, %v169_v0  ;;  %v256_v0 = vld [vmem:[#allocation4 + $0x28] sm:$0xff] }
  0xf8   :  { %v665_v46 = vpop.eup %664  ;;  %666 = vpow2.f32 %v182_v44  ;;  %v187_v47 = vsel %vm115_vm6, %v663_v45, 0.0 }
  0xf9   :  { %v186_v48 = vsel %vm114_vm7, %v665_v46, 0.0  ;;  %v213_v49 = vsel %vm57_vm0, %v187_v47, 0.0  ;;  %668 = vpow2.f32 %v184_v50  ;;  %v198_v46 = vld [vmem:[#allocation3 + $0x20] sm:$0xff] }
  0xfa   :  { %604 = vmatmul.msk.f32.vlgmr.msra.gmra.mxu0 %vm57_vm0, %v186_v48  ;;  %214 = vadd.xlane.f32.xlu2 %v213_v49  ;;  %v210_v51 = vsel %vm57_vm0, %v186_v48, 0.0  ;;  %v206_v49 = vmul.f32 %v826_v60, %v198_v46  ;;  %v201_v60 = vld [vmem:[#allocation3 + $0x38] sm:$0xff] }
  0xfb   :  { %211 = vadd.xlane.f32.xlu0 %v210_v51 }
  0xfc   :  { %v140_v13 = vpop.permute.xlu1 %139  ;;  %v287_v18 = vpop.permute.xlu2 %286 }
  0xfd   :  { %v165_v52 = vsub.f32 %v766_v14, %v140_v13  ;;  %v304_v62 = vmul.f32 %v287_v18, %v256_v0 }
  0xfe   :  { %v667_v2 = vpop.eup %666 }
  0xff   :  { %v176_v53 = vmul.f32 1.442695, %v165_v52  ;;  %v192_v55 = vsel %vm120_vm8, %v667_v2, 0.0  ;;  %v669_v58 = vpop.eup %668  ;;  %v272_v14 = vpop.permute.xlu0 %271 }
 0x100   :  { %610 = vmatmul.msk.f32.vlgmr.msra.gmra.mxu3 %vm57_vm0, %v192_v55  ;;  %v193_v59 = vsel %vm121_vm9, %v669_v58, 0.0  ;;  %v228_v10 = vsel %vm57_vm0, %v192_v55, 0.0  ;;  %v301_v30 = vmul.f32 %v272_v14, %v253_v24  ;;  %v252_v58 = vld [vmem:[#allocation4 + $0x8] sm:$0xff] }
 0x101   :  { %670 = vpow2.f32 %v176_v53  ;;  %v231_v6 = vsel %vm57_vm0, %v193_v59, 0.0 }
 0x102   :  { %605 = vmatmul.msk.f32.gmra.mxu0 %vm57_vm0, %v187_v47  ;;  %672 = vpow2.f32 %v112_v42  ;;  %v251_v47 = vld [vmem:[#allocation4] sm:$0xff] }
 0x103   :  { %223 = vadd.xlane.f32.xlu0 %v222_v56  ;;  %v197_v56 = vld [vmem:[#allocation3 + $0x18] sm:$0xff] }
 0x104   :  { %v262_v11 = vpop.permute.xlu1 %261 }
 0x105   :  { %v299_v50 = vmul.f32 %v262_v11, %v251_v47  ;;  %v257_v11 = vld [vmem:[#allocation4 + $0x30] sm:$0xff] }
 0x107   :  { %v671_v8 = vpop.eup %670  ;;  %v282_v22 = vpop.permute.xlu0 %281 }
 0x108   :  { %v189_v61 = vsel %vm117_vm10, %v671_v8, 0.0  ;;  %611 = vmatmul.msk.f32.gmra.mxu3 %vm57_vm0, %v193_v59  ;;  %v303_v25 = vmul.f32 %v282_v22, %v255_v21  ;;  %v673_v53 = vpop.eup %672  ;;  %v205_v8 = vmul.f32 %v831_v3, %v197_v56  ;;  %v200_v21 = vld [vmem:[#allocation3 + $0x30] sm:$0xff]  ;;  %v254_v22 = vld [vmem:[#allocation4 + $0x18] sm:$0xff] }
 0x109   :  { %607 = vmatmul.msk.f32.gmra.mxu1 %vm57_vm0, %v189_v61  ;;  %v219_v63 = vsel %vm57_vm0, %v189_v61, 0.0  ;;  %v209_v59 = vmul.f32 %v673_v53, %v201_v60  ;;  %v208_v24 = vmul.f32 %v837_v5, %v200_v21 }
 0x10a   :  { %220 = vadd.xlane.f32.xlu2 %v219_v63  ;;  %v300_v63 = vmul.f32 %v911_v16, %v252_v58 }
 0x10b   :  { %232 = vadd.xlane.f32.xlu0 %v231_v6 }
 0x10c   :  { %v907_v7 = vpop.permute.xlu1 %276 }
 0x112   :  { %229 = vadd.xlane.f32.xlu2 %v228_v10 }
 0x114   :  { %v909_v12 = vpop.permute.xlu1 %291 }
 0x115   :  { %v305_v3 = vmul.f32 %v909_v12, %v257_v11 }
 0x15d   :  { %v218_v19 = vpop.xlane.xlu1 %217 }
 0x15e   :  { %v236_v20 = vadd.f32 %v218_v19, %v204_v17 }
 0x160   :  { %245 = vst.msk [vmem:[#allocation3 + $0x10] sm:$0xff] %vm15_vm1, %v236_v20 }
 0x163   :  { %v368_v26 = vpop.f32.mrf.mxu2 }
 0x164   :  { %v384_v27 = vadd.f32 %v368_v26, %v303_v25  ;;  %v302_v25 = vmul.f32 %v907_v7, %v254_v22 }
 0x165   :  { %v227_v1 = vpop.xlane.xlu1 %226 }
 0x166   :  { %393 = vst.msk [vmem:[#allocation4 + $0x20] sm:$0xff] %vm32_vm2, %v384_v27  ;;  %v239_v31 = vadd.f32 %v227_v1, %v207_v29  ;;  %v362_v54 = vpop.f32.mrf.mxu1 }
 0x167   :  { %v382_v32 = vadd.f32 %v362_v54, %v301_v30  ;;  %v418_v34 = vld [vmem:[#allocation3 + $0x10] sm:$0xff] }
 0x168   :  { %248 = vst.msk [vmem:[#allocation3 + $0x28] sm:$0xff] %vm15_vm1, %v239_v31  ;;  %v426_v35 = vmax.f32 %v418_v34, 1e-30 }
 0x169   :  { %391 = vst.msk [vmem:[#allocation4 + $0x10] sm:$0xff] %vm32_vm2, %v382_v32 }
 0x16a   :  { %444 = vperm.xlu1 %641, %v426_v35  }
 0x16d   :  { %v215_v4 = vpop.xlane.xlu2 %214 }
 0x16e   :  { %v235_v40 = vadd.f32 %v215_v4, %v203_v9  ;;  %v212_v41 = vpop.xlane.xlu0 %211 }
 0x16f   :  { %v234_v43 = vadd.f32 %v212_v41, %v202_v39  ;;  %v421_v44 = vld [vmem:[#allocation3 + $0x28] sm:$0xff] }
 0x170   :  { %244 = vst.msk [vmem:[#allocation3 + $0x8] sm:$0xff] %vm15_vm1, %v235_v40  ;;  %v429_v45 = vmax.f32 %v421_v44, 1e-30 }
 0x171   :  { %243 = vst.msk [vmem:[#allocation3] sm:$0xff] %vm15_vm1, %v234_v43 }
 0x172   :  { %459 = vperm.xlu1 %641, %v429_v45  }
 0x174   :  { %v371_v57 = vpop.f32.mrf.mxu2 }
 0x175   :  { %v385_v48 = vadd.f32 %v371_v57, %v304_v62 }
 0x176   :  { %v224_v28 = vpop.xlane.xlu0 %223 }
 0x177   :  { %394 = vst.msk [vmem:[#allocation4 + $0x28] sm:$0xff] %vm32_vm2, %v385_v48  ;;  %v238_v33 = vadd.f32 %v224_v28, %v206_v49  ;;  %v356_v37 = vpop.f32.mrf.mxu0  ;;  %v417_v51 = vld [vmem:[#allocation3 + $0x8] sm:$0xff] }
 0x178   :  { %v380_v13 = vadd.f32 %v356_v37, %v299_v50  ;;  %v416_v52 = vld [vmem:[#allocation3] sm:$0xff]  ;;  %v425_v2 = vmax.f32 %v417_v51, 1e-30 }
 0x179   :  { %247 = vst.msk [vmem:[#allocation3 + $0x20] sm:$0xff] %vm15_vm1, %v238_v33  ;;  %v424_v55 = vmax.f32 %v416_v52, 1e-30 }
 0x17a   :  { %389 = vst.msk [vmem:[#allocation4] sm:$0xff] %vm32_vm2, %v380_v13  ;;  %439 = vperm.xlu2 %639, %v425_v2   ;;  %296 = vperm.xlu1 %641, %v673_v53  }
 0x17b   :  { %434 = vperm.xlu0 %640, %v424_v55  }
 0x17d   :  { %v221_v61 = vpop.xlane.xlu2 %220 }
 0x17e   :  { %v233_v6 = vpop.xlane.xlu0 %232  ;;  %v237_v10 = vadd.f32 %v221_v61, %v205_v8 }
 0x17f   :  { %v241_v14 = vadd.f32 %v233_v6, %v209_v59  ;;  %v359_v15 = vpop.f32.mrf.mxu0 }
 0x180   :  { %246 = vst.msk [vmem:[#allocation3 + $0x18] sm:$0xff] %vm15_vm1, %v237_v10  ;;  %v381_v17 = vadd.f32 %v359_v15, %v300_v63  ;;  %v420_v19 = vld [vmem:[#allocation3 + $0x20] sm:$0xff]  ;;  %v410_v63 = vld [vmem:[#allocation4 + $0x10] sm:$0xff] }
 0x181   :  { %250 = vst.msk [vmem:[#allocation3 + $0x38] sm:$0xff] %vm15_vm1, %v241_v14  ;;  %v428_v20 = vmax.f32 %v420_v19, 1e-30  ;;  %v258_v14 = vld [vmem:[#allocation4 + $0x38] sm:$0xff] }
 0x182   :  { %390 = vst.msk [vmem:[#allocation4 + $0x8] sm:$0xff] %vm32_vm2, %v381_v17  ;;  %v412_v17 = vld [vmem:[#allocation4 + $0x20] sm:$0xff] }
 0x183   :  { %454 = vperm.xlu2 %639, %v428_v20   ;;  %v374_v16 = vpop.f32.mrf.mxu3 }
 0x184   :  { %v386_v23 = vadd.f32 %v374_v16, %v305_v3 }
 0x185   :  { %v230_v26 = vpop.xlane.xlu2 %229 }
 0x186   :  { %395 = vst.msk [vmem:[#allocation4 + $0x30] sm:$0xff] %vm32_vm2, %v386_v23  ;;  %v240_v27 = vadd.f32 %v230_v26, %v208_v24  ;;  %v365_v29 = vpop.f32.mrf.mxu1 }
 0x187   :  { %v383_v18 = vadd.f32 %v365_v29, %v302_v25  ;;  %v419_v30 = vld [vmem:[#allocation3 + $0x18] sm:$0xff] }
 0x188   :  { %249 = vst.msk [vmem:[#allocation3 + $0x30] sm:$0xff] %vm15_vm1, %v240_v27  ;;  %v423_v1 = vld [vmem:[#allocation3 + $0x38] sm:$0xff]  ;;  %v427_v12 = vmax.f32 %v419_v30, 1e-30 }
 0x189   :  { %392 = vst.msk [vmem:[#allocation4 + $0x18] sm:$0xff] %vm32_vm2, %v383_v18  ;;  %v431_v31 = vmax.f32 %v423_v1, 1e-30  ;;  %v409_v46 = vld [vmem:[#allocation4 + $0x8] sm:$0xff] }
 0x18a   :  { %449 = vperm.xlu0 %640, %v427_v12  }
 0x18b   :  { %469 = vperm.xlu2 %639, %v431_v31   ;;  %v377_v26 = vpop.f32.mrf.mxu3 }
 0x18f   :  { %v422_v54 = vld [vmem:[#allocation3 + $0x30] sm:$0xff] }
 0x190   :  { %v430_v5 = vmax.f32 %v422_v54, 1e-30 }
 0x192   :  { %464 = vperm.xlu0 %640, %v430_v5   ;;  %v413_v5 = vld [vmem:[#allocation4 + $0x28] sm:$0xff] }
 0x1d4   :  { %v440_v7 = vpop.permute.xlu2 %439 }
 0x1d5   :  { %674 = vrcp.f32 %v440_v7  ;;  %v498_v9 = vand.u32 2147483648, %v440_v7  ;;  %v496_v39 = vand.u32 2147483647, %v440_v7  ;;  %vm492_vm12 = vweird.f32 %v440_v7 }
 0x1d7   :  { %v499_v42 = vor.u32 1.1754944e-38, %v498_v9  ;;  %vm497_vm14 = vcmp.eq.f32.partialorder %v496_v39, 8.507059e+37 }
 0x1db   :  { %v675_v32 = vpop.eup %674 }
 0x1dc   :  { %v488_v34 = vmul.f32 %v675_v32, %v440_v7  ;;  %v445_v35 = vpop.permute.xlu1 %444  ;;  %vm493_vm11 = vweird.f32 %v675_v32 }
 0x1dd   :  { %v455_v36 = vpop.permute.xlu2 %454  ;;  %676 = vrcp.f32 %v445_v35  ;;  %vm494_vm13 = vmor %vm492_vm12, %vm493_vm11  ;;  %v513_v28 = vand.u32 2147483648, %v445_v35  ;;  %v511_v51 = vand.u32 2147483647, %v445_v35  ;;  %vm507_vm1 = vweird.f32 %v445_v35 }
 0x1de   :  { %v489_v38 = vsub.f32 1.0, %v488_v34  ;;  %678 = vrcp.f32 %v455_v36  ;;  %v543_v33 = vand.u32 2147483648, %v455_v36  ;;  %v541_v52 = vand.u32 2147483647, %v455_v36 }
 0x1df   :  { %vm537_vm3 = vweird.f32 %v455_v36  ;;  %v514_v56 = vor.u32 1.1754944e-38, %v513_v28  ;;  %vm512_vm6 = vcmp.eq.f32.partialorder %v511_v51, 8.507059e+37 }
 0x1e0   :  { %v490_v4 = vmul.f32 %v675_v32, %v489_v38  ;;  %v544_v58 = vor.u32 1.1754944e-38, %v543_v33  ;;  %vm542_vm7 = vcmp.eq.f32.partialorder %v541_v52, 8.507059e+37 }
 0x1e2   :  { %v491_v40 = vadd.f32 %v675_v32, %v490_v4 }
 0x1e3   :  { %v677_v41 = vpop.eup %676 }
 0x1e4   :  { %v679_v43 = vpop.eup %678  ;;  %v495_v44 = vsel %vm494_vm13, %v675_v32, %v491_v40  ;;  %v503_v0 = vmul.f32 %v677_v41, %v445_v35  ;;  %v941_v45 = vpop.permute.xlu1 %459  ;;  %vm508_vm15 = vweird.f32 %v677_v41 }
 0x1e5   :  { %v500_v62 = vsel %vm497_vm14, %v499_v42, %v495_v44  ;;  %v533_v47 = vmul.f32 %v679_v43, %v455_v36  ;;  %v943_v57 = vpop.permute.xlu2 %469  ;;  %680 = vrcp.f32 %v941_v45  ;;  %vm538_vm0 = vweird.f32 %v679_v43  ;;  %vm509_vm4 = vmor %vm507_vm1, %vm508_vm15 }
 0x1e6   :  { %v501_v48 = vmul.f32 %v500_v62, %v409_v46  ;;  %v504_v49 = vsub.f32 1.0, %v503_v0  ;;  %682 = vrcp.f32 %v943_v57  ;;  %vm539_vm5 = vmor %vm537_vm3, %vm538_vm0  ;;  %v558_v16 = vand.u32 2147483648, %v941_v45  ;;  %v408_v62 = vld [vmem:[#allocation4] sm:$0xff] }
 0x1e7   :  { %v534_v50 = vsub.f32 1.0, %v533_v47  ;;  %v556_v24 = vand.u32 2147483647, %v941_v45  ;;  %vm552_vm9 = vweird.f32 %v941_v45  ;;  %v588_v54 = vand.u32 2147483648, %v943_v57 }
 0x1e8   :  { %593 = vst.msk [vmem:[%s990_s2 + $0x8] sm:$0xff] %vm32_vm2, %v501_v48  ;;  %v505_v37 = vmul.f32 %v677_v41, %v504_v49  ;;  %v559_v30 = vor.u32 1.1754944e-38, %v558_v16  ;;  %vm582_vm13 = vweird.f32 %v943_v57  ;;  %v586_v34 = vand.u32 2147483647, %v943_v57 }
 0x1e9   :  { %v535_v13 = vmul.f32 %v679_v43, %v534_v50  ;;  %vm557_vm12 = vcmp.eq.f32.partialorder %v556_v24, 8.507059e+37  ;;  %v589_v4 = vor.u32 1.1754944e-38, %v588_v54 }
 0x1ea   :  { %v506_v2 = vadd.f32 %v677_v41, %v505_v37  ;;  %vm587_vm0 = vcmp.eq.f32.partialorder %v586_v34, 8.507059e+37 }
 0x1eb   :  { %v681_v53 = vpop.eup %680  ;;  %v536_v55 = vadd.f32 %v679_v43, %v535_v13 }
 0x1ec   :  { %v683_v60 = vpop.eup %682  ;;  %v510_v8 = vsel %vm509_vm4, %v677_v41, %v506_v2  ;;  %v548_v59 = vmul.f32 %v681_v53, %v941_v45  ;;  %v297_v15 = vpop.permute.xlu1 %296  ;;  %vm553_vm8 = vweird.f32 %v681_v53 }
 0x1ed   :  { %v540_v61 = vsel %vm539_vm5, %v679_v43, %v536_v55  ;;  %v515_v6 = vsel %vm512_vm6, %v514_v56, %v510_v8  ;;  %v578_v10 = vmul.f32 %v683_v60, %v943_v57  ;;  %v435_v11 = vpop.permute.xlu0 %434  ;;  %v306_v25 = vmul.f32 %v297_v15, %v258_v14  ;;  %vm554_vm10 = vmor %vm552_vm9, %vm553_vm8  ;;  %v411_v56 = vld [vmem:[#allocation4 + $0x18] sm:$0xff]  ;;  %v414_v14 = vld [vmem:[#allocation4 + $0x30] sm:$0xff] }
 0x1ee   :  { %v545_v19 = vsel %vm542_vm7, %v544_v58, %v540_v61  ;;  %v516_v20 = vmul.f32 %v515_v6, %v410_v63  ;;  %v549_v21 = vsub.f32 1.0, %v548_v59  ;;  %684 = vrcp.f32 %v435_v11 }
 0x1ef   :  { %v546_v22 = vmul.f32 %v545_v19, %v412_v17  ;;  %v579_v3 = vsub.f32 1.0, %v578_v10  ;;  %v387_v18 = vadd.f32 %v377_v26, %v306_v25  ;;  %vm583_vm11 = vweird.f32 %v683_v60 }
 0x1f0   :  { %594 = vst.msk [vmem:[%s990_s2 + $0x10] sm:$0xff] %vm32_vm2, %v516_v20  ;;  %v550_v23 = vmul.f32 %v681_v53, %v549_v21  ;;  %vm584_vm14 = vmor %vm582_vm13, %vm583_vm11  ;;  %v483_v9 = vand.u32 2147483648, %v435_v11  ;;  %v481_v40 = vand.u32 2147483647, %v435_v11  ;;  %vm477_vm1 = vweird.f32 %v435_v11 }
 0x1f1   :  { %596 = vst.msk [vmem:[%s990_s2 + $0x20] sm:$0xff] %vm32_vm2, %v546_v22  ;;  %v580_v27 = vmul.f32 %v683_v60, %v579_v3 }
 0x1f2   :  { %v551_v29 = vadd.f32 %v681_v53, %v550_v23  ;;  %396 = vst.msk [vmem:[#allocation4 + $0x38] sm:$0xff] %vm32_vm2, %v387_v18  ;;  %v484_v44 = vor.u32 1.1754944e-38, %v483_v9  ;;  %vm482_vm4 = vcmp.eq.f32.partialorder %v481_v40, 8.507059e+37 }
 0x1f3   :  { %v581_v12 = vadd.f32 %v683_v60, %v580_v27 }
 0x1f4   :  { %v685_v1 = vpop.eup %684  ;;  %v555_v31 = vsel %vm554_vm10, %v681_v53, %v551_v29 }
 0x1f5   :  { %v560_v7 = vsel %vm557_vm12, %v559_v30, %v555_v31  ;;  %v473_v32 = vmul.f32 %v685_v1, %v435_v11  ;;  %v585_v38 = vsel %vm584_vm14, %v683_v60, %v581_v12  ;;  %vm478_vm15 = vweird.f32 %v685_v1 }
 0x1f6   :  { %v561_v35 = vmul.f32 %v560_v7, %v413_v5  ;;  %v590_v41 = vsel %vm587_vm0, %v589_v4, %v585_v38  ;;  %vm479_vm3 = vmor %vm477_vm1, %vm478_vm15 }
 0x1f7   :  { %v474_v36 = vsub.f32 1.0, %v473_v32 }
 0x1f8   :  { %597 = vst.msk [vmem:[%s990_s2 + $0x28] sm:$0xff] %vm32_vm2, %v561_v35 }
 0x1f9   :  { %v475_v39 = vmul.f32 %v685_v1, %v474_v36  ;;  %v415_v43 = vld [vmem:[#allocation4 + $0x38] sm:$0xff] }
 0x1fa   :  { %v591_v0 = vmul.f32 %v590_v41, %v415_v43 }
 0x1fb   :  { %v476_v42 = vadd.f32 %v685_v1, %v475_v39 }
 0x1fc   :  { %v450_v45 = vpop.permute.xlu0 %449  ;;  %599 = vst.msk [vmem:[%s990_s2 + $0x38] sm:$0xff] %vm32_vm2, %v591_v0 }
 0x1fd   :  { %v480_v46 = vsel %vm479_vm3, %v685_v1, %v476_v42  ;;  %686 = vrcp.f32 %v450_v45  ;;  %v528_v33 = vand.u32 2147483648, %v450_v45  ;;  %v526_v51 = vand.u32 2147483647, %v450_v45 }
 0x1fe   :  { %v485_v47 = vsel %vm482_vm4, %v484_v44, %v480_v46  ;;  %vm522_vm6 = vweird.f32 %v450_v45 }
 0x1ff   :  { %v486_v57 = vmul.f32 %v485_v47, %v408_v62  ;;  %v529_v2 = vor.u32 1.1754944e-38, %v528_v33  ;;  %vm527_vm8 = vcmp.eq.f32.partialorder %v526_v51, 8.507059e+37 }
 0x201   :  { %592 = vst.msk [vmem:[%s990_s2] sm:$0xff] %vm32_vm2, %v486_v57 }
 0x203   :  { %v687_v48 = vpop.eup %686 }
 0x204   :  { %v518_v49 = vmul.f32 %v687_v48, %v450_v45  ;;  %v465_v50 = vpop.permute.xlu0 %464  ;;  %vm523_vm5 = vweird.f32 %v687_v48 }
 0x205   :  { %688 = vrcp.f32 %v465_v50  ;;  %vm524_vm7 = vmor %vm522_vm6, %vm523_vm5  ;;  %v573_v59 = vand.u32 2147483648, %v465_v50  ;;  %v571_v63 = vand.u32 2147483647, %v465_v50  ;;  %vm567_vm10 = vweird.f32 %v465_v50 }
 0x206   :  { %v519_v28 = vsub.f32 1.0, %v518_v49 }
 0x207   :  { %v574_v10 = vor.u32 1.1754944e-38, %v573_v59  ;;  %vm572_vm12 = vcmp.eq.f32.partialorder %v571_v63, 8.507059e+37 }
 0x208   :  { %v520_v37 = vmul.f32 %v687_v48, %v519_v28 }
 0x20a   :  { %v521_v13 = vadd.f32 %v687_v48, %v520_v37 }
 0x20b   :  { %v689_v52 = vpop.eup %688 }
 0x20c   :  { %v525_v53 = vsel %vm524_vm7, %v687_v48, %v521_v13  ;;  %v563_v55 = vmul.f32 %v689_v52, %v465_v50  ;;  %vm568_vm9 = vweird.f32 %v689_v52 }
 0x20d   :  { %v530_v60 = vsel %vm527_vm8, %v529_v2, %v525_v53  ;;  %vm569_vm11 = vmor %vm567_vm10, %vm568_vm9 }
 0x20e   :  { %v531_v58 = vmul.f32 %v530_v60, %v411_v56  ;;  %v564_v8 = vsub.f32 1.0, %v563_v55 }
 0x210   :  { %595 = vst.msk [vmem:[%s990_s2 + $0x18] sm:$0xff] %vm32_vm2, %v531_v58  ;;  %v565_v61 = vmul.f32 %v689_v52, %v564_v8 }
 0x212   :  { %v566_v6 = vadd.f32 %v689_v52, %v565_v61 }
 0x214   :  { %v570_v11 = vsel %vm569_vm11, %v689_v52, %v566_v6 }
 0x215   :  { %v575_v15 = vsel %vm572_vm12, %v574_v10, %v570_v11 }
 0x216   :  { %v576_v17 = vmul.f32 %v575_v15, %v414_v14 }
 0x218   :  { %598 = vst.msk [vmem:[%s990_s2 + $0x30] sm:$0xff] %vm32_vm2, %v576_v17 }

// kernel: session_graph_forward.9
= control target key start
LH: loop header
LB: loop body
LE: loop exit
PB: predicated region body
PF: predicated region fallthrough
CT: control target
= control target key end

     0   :  { %vm42_vm0 = vcmask 261120   ;;  %s2030_s0 = inlined_call_operand.vmem [shape: f32[2,8,32], index: 0, kind: input, shape index: {}]   ;;  %s2031_s1 = inlined_call_operand.vmem [shape: f32[2,8,32], index: 1, kind: input, shape index: {}]   ;;  %s2032_s2 = inlined_call_operand.vmem [shape: s32[2,8,8], index: 2, kind: input, shape index: {}]   ;;  %s2033_s3 = inlined_call_operand.vmem [shape: f32[4,32], index: 3, kind: input, shape index: {}]   ;;  %s2034_s4 = inlined_call_operand.hbm [shape: f32[2,8,32], index: 4, kind: output, shape index: {}]  }
   0x1   :  { %v1651_v0 = vld [vmem:[%s2030_s0] sm:$0xff]  ;;  %v1656_v1 = vld [vmem:[%s2030_s0 + $0x8] sm:$0xff] }
   0x2   :  { %v20_v2 = vld [vmem:[%s2033_s3] sm:$0xf]  ;;  %v1662_v3 = vmax.f32 %v1651_v0, 0.0  ;;  %v1665_v4 = vmin.f32 %v1651_v0, 0.0  ;;  %v1668_v5 = vmin.f32 %v1656_v1, 0.0  ;;  %v1671_v6 = vmax.f32 %v1656_v1, 0.0 }
   0x3   :  { %9 = vsyncpa [#allocation3], 0  ;;  %v1673_v7 = vperm.slane %v20_v2, 0  ;;  %v1697_v12 = vperm.slane %v20_v2, 1  ;;  %v1743_v21 = vperm.slane %v20_v2, 2  ;;  %v1765_v26 = vperm.slane %v20_v2, 3 }
   0x4   :  { %1475 = vmatpush.xpose.msk.msra.mxu0 %vm42_vm0, %v1662_v3  ;;  %1479 = vmatpush.xpose.msk.msra.mxu2 %vm42_vm0, %v1665_v4  ;;  %v1780_v27 = vld [vmem:[%s2031_s1] sm:$0xff]  ;;  %v1789_v30 = vld [vmem:[%s2031_s1 + $0x8] sm:$0xff]  ;;  %vm650_vm5 = vcmask 64512   ;;  %s1463_s29 = sshll.u32 %s2034_s4, 4  ;;  %s1621_s30 = smov 128   ;;  %s1464_s29 = int_to_ptr.hbm [resolvable:$true] %s1463_s29 }
   0x5   :  { %1481 = vmatpush.xpose.msk.msra.mxu3 %vm42_vm0, %v1668_v5  ;;  %1477 = vmatpush.xpose.msk.msra.mxu1 %vm42_vm0, %v1671_v6  ;;  %v40_v8 = vmul.f32 %v1673_v7, %v1665_v4  ;;  %v38_v9 = vmul.f32 %v1673_v7, %v1662_v3  ;;  %v39_v10 = vmul.f32 %v1673_v7, %v1671_v6  ;;  %v1796_v33 = vmin.f32 %v1780_v27, 0.0  ;;  %s1622_s5 = smov 8  }
   0x6   :  { %v41_v11 = vmul.f32 %v1673_v7, %v1668_v5  ;;  %v36_v13 = vmul.f32 %v1673_v7, %v1651_v0  ;;  %v208_v14 = vmul.f32 %v1697_v12, %v1665_v4  ;;  %v209_v15 = vmul.f32 %v1697_v12, %v1668_v5 }
   0x7   :  { %1476 = vmatmul.msk.f32.vlgmr.msra.gmra.mxu0 %vm42_vm0, %v40_v8  ;;  %1480 = vmatmul.msk.f32.vlgmr.msra.gmra.mxu2 %vm42_vm0, %v38_v9  ;;  %v37_v16 = vmul.f32 %v1673_v7, %v1656_v1  ;;  %v206_v17 = vmul.f32 %v1697_v12, %v1662_v3  ;;  %v204_v18 = vmul.f32 %v1697_v12, %v1651_v0  ;;  %v1799_v34 = vmax.f32 %v1780_v27, 0.0 }
   0x8   :  { %1487 = vmatpush.xpose.msk.msrb.mxu2 %vm42_vm0, %v1662_v3  ;;  %1483 = vmatpush.xpose.msk.msrb.mxu0 %vm42_vm0, %v1651_v0  ;;  %v205_v19 = vmul.f32 %v1697_v12, %v1656_v1  ;;  %v207_v20 = vmul.f32 %v1697_v12, %v1671_v6  ;;  %v357_v22 = vmul.f32 %v1743_v21, %v1665_v4  ;;  %v1802_v35 = vmin.f32 %v1789_v30, 0.0 }
   0x9   :  { %1482 = vmatmul.msk.f32.vlgmr.msra.gmra.mxu3 %vm42_vm0, %v39_v10  ;;  %1478 = vmatmul.msk.f32.vlgmr.msra.gmra.mxu1 %vm42_vm0, %v41_v11  ;;  %v355_v23 = vmul.f32 %v1743_v21, %v1662_v3  ;;  %v356_v24 = vmul.f32 %v1743_v21, %v1671_v6  ;;  %v358_v25 = vmul.f32 %v1743_v21, %v1668_v5  ;;  %v1805_v36 = vmax.f32 %v1789_v30, 0.0 }
   0xa   :  { %1489 = vmatpush.xpose.msk.msrb.mxu3 %vm42_vm0, %v1671_v6  ;;  %1485 = vmatpush.xpose.msk.msrb.mxu1 %vm42_vm0, %v1656_v1  ;;  %v353_v28 = vmul.f32 %v1743_v21, %v1651_v0  ;;  %v506_v29 = vmul.f32 %v1765_v26, %v1665_v4  ;;  %v507_v31 = vmul.f32 %v1765_v26, %v1668_v5 }
   0xb   :  { %v354_v32 = vmul.f32 %v1743_v21, %v1656_v1  ;;  %v504_v37 = vmul.f32 %v1765_v26, %v1662_v3  ;;  %v502_v38 = vmul.f32 %v1765_v26, %v1651_v0  ;;  %v503_v39 = vmul.f32 %v1765_v26, %v1656_v1 }
   0xc   :  { %1495 = vmatpush.xpose.msk.msra.mxu2 %vm42_vm0, %v1651_v0  ;;  %1491 = vmatpush.xpose.msk.msra.mxu0 %vm42_vm0, %v1665_v4  ;;  %v505_v40 = vmul.f32 %v1765_v26, %v1671_v6  ;;  %v709_v41 = vmul.f32 %v1796_v33, %v1673_v7  ;;  %v707_v42 = vmul.f32 %v1799_v34, %v1673_v7 }
   0xd   :  { %v708_v43 = vmul.f32 %v1805_v36, %v1673_v7  ;;  %v710_v44 = vmul.f32 %v1802_v35, %v1673_v7  ;;  %v705_v45 = vmul.f32 %v1780_v27, %v1673_v7  ;;  %v875_v46 = vmul.f32 %v1796_v33, %v1697_v12 }
   0xe   :  { %1497 = vmatpush.xpose.msk.msra.mxu3 %vm42_vm0, %v1656_v1  ;;  %1493 = vmatpush.xpose.msk.msra.mxu1 %vm42_vm0, %v1668_v5  ;;  %v876_v47 = vmul.f32 %v1802_v35, %v1697_v12  ;;  %v706_v48 = vmul.f32 %v1789_v30, %v1673_v7  ;;  %v873_v49 = vmul.f32 %v1799_v34, %v1697_v12 }
   0xf   :  { %1484 = vmatmul.msk.f32.vlgmr.msrb.gmra.mxu0 %vm42_vm0, %v36_v13  ;;  %1488 = vmatmul.msk.f32.vlgmr.msrb.gmra.mxu2 %vm42_vm0, %v208_v14  ;;  %v871_v50 = vmul.f32 %v1780_v27, %v1697_v12  ;;  %v872_v51 = vmul.f32 %v1789_v30, %v1697_v12  ;;  %v874_v52 = vmul.f32 %v1805_v36, %v1697_v12 }
  0x10   :  { %1503 = vmatpush.xpose.msk.msrb.mxu2 %vm42_vm0, %v1665_v4  ;;  %1499 = vmatpush.xpose.msk.msrb.mxu0 %vm42_vm0, %v1662_v3  ;;  %v1023_v53 = vmul.f32 %v1796_v33, %v1743_v21  ;;  %v1021_v54 = vmul.f32 %v1799_v34, %v1743_v21  ;;  %v1022_v55 = vmul.f32 %v1805_v36, %v1743_v21 }
  0x11   :  { %1490 = vmatmul.msk.f32.vlgmr.msrb.gmra.mxu3 %vm42_vm0, %v209_v15  ;;  %1486 = vmatmul.msk.f32.vlgmr.msrb.gmra.mxu1 %vm42_vm0, %v37_v16  ;;  %v1024_v56 = vmul.f32 %v1802_v35, %v1743_v21  ;;  %v1019_v57 = vmul.f32 %v1780_v27, %v1743_v21  ;;  %v1171_v58 = vmul.f32 %v1796_v33, %v1765_v26 }
  0x12   :  { %1505 = vmatpush.xpose.msk.msrb.mxu3 %vm42_vm0, %v1668_v5  ;;  %1501 = vmatpush.xpose.msk.msrb.mxu1 %vm42_vm0, %v1671_v6  ;;  %v1172_v59 = vmul.f32 %v1802_v35, %v1765_v26  ;;  %v1020_v60 = vmul.f32 %v1789_v30, %v1743_v21  ;;  %v1169_v61 = vmul.f32 %v1799_v34, %v1765_v26 }
  0x13   :  { %v1167_v62 = vmul.f32 %v1780_v27, %v1765_v26  ;;  %v1168_v63 = vmul.f32 %v1789_v30, %v1765_v26  ;;  %v1170_v2 = vmul.f32 %v1805_v36, %v1765_v26  ;;  %v1950_v26 = vld [vmem:[%s2032_s2] sm:$0xff] }
  0x14   :  { %vm21_vm1 = vcmp.eq.s32.totalorder %v1950_v26, 1  ;;  %vm23_vm2 = vcmp.eq.s32.totalorder %v1950_v26, 2  ;;  %vm25_vm3 = vcmp.eq.s32.totalorder %v1950_v26, 3  ;;  %vm27_vm4 = vcmp.eq.s32.totalorder %v1950_v26, 4 }
  0x17   :  { %1492 = vmatmul.msk.f32.vlgmr.msra.gmra.mxu0 %vm42_vm0, %v206_v17  ;;  %1496 = vmatmul.msk.f32.vlgmr.msra.gmra.mxu2 %vm42_vm0, %v204_v18 }
  0x18   :  { %1511 = vmatpush.xpose.msk.msra.mxu2 %vm42_vm0, %v1662_v3  ;;  %1507 = vmatpush.xpose.msk.msra.mxu0 %vm42_vm0, %v1651_v0 }
  0x19   :  { %1498 = vmatmul.msk.f32.vlgmr.msra.gmra.mxu3 %vm42_vm0, %v205_v19  ;;  %1494 = vmatmul.msk.f32.vlgmr.msra.gmra.mxu1 %vm42_vm0, %v207_v20 }
  0x1a   :  { %1513 = vmatpush.xpose.msk.msra.mxu3 %vm42_vm0, %v1671_v6  ;;  %1509 = vmatpush.xpose.msk.msra.mxu1 %vm42_vm0, %v1656_v1 }
  0x1f   :  { %1500 = vmatmul.msk.f32.vlgmr.msrb.gmra.mxu0 %vm42_vm0, %v357_v22  ;;  %1504 = vmatmul.msk.f32.vlgmr.msrb.gmra.mxu2 %vm42_vm0, %v355_v23 }
  0x20   :  { %1519 = vmatpush.xpose.msk.msrb.mxu2 %vm42_vm0, %v1651_v0  ;;  %1515 = vmatpush.xpose.msk.msrb.mxu0 %vm42_vm0, %v1665_v4 }
  0x21   :  { %1506 = vmatmul.msk.f32.vlgmr.msrb.gmra.mxu3 %vm42_vm0, %v356_v24  ;;  %1502 = vmatmul.msk.f32.vlgmr.msrb.gmra.mxu1 %vm42_vm0, %v358_v25 }
  0x22   :  { %1521 = vmatpush.xpose.msk.msrb.mxu3 %vm42_vm0, %v1656_v1  ;;  %1517 = vmatpush.xpose.msk.msrb.mxu1 %vm42_vm0, %v1668_v5 }
  0x27   :  { %1508 = vmatmul.msk.f32.vlgmr.msra.gmra.mxu0 %vm42_vm0, %v353_v28  ;;  %1512 = vmatmul.msk.f32.vlgmr.msra.gmra.mxu2 %vm42_vm0, %v506_v29 }
  0x28   :  { %1527 = vmatpush.xpose.msk.msra.mxu2 %vm42_vm0, %v1796_v33  ;;  %1523 = vmatpush.xpose.msk.msra.mxu0 %vm42_vm0, %v1799_v34 }
  0x29   :  { %1514 = vmatmul.msk.f32.vlgmr.msra.gmra.mxu3 %vm42_vm0, %v507_v31  ;;  %1510 = vmatmul.msk.f32.vlgmr.msra.gmra.mxu1 %vm42_vm0, %v354_v32 }
  0x2a   :  { %1529 = vmatpush.xpose.msk.msra.mxu3 %vm42_vm0, %v1802_v35  ;;  %1525 = vmatpush.xpose.msk.msra.mxu1 %vm42_vm0, %v1805_v36 }
  0x2f   :  { %1516 = vmatmul.msk.f32.vlgmr.msrb.gmra.mxu0 %vm42_vm0, %v504_v37  ;;  %1520 = vmatmul.msk.f32.vlgmr.msrb.gmra.mxu2 %vm42_vm0, %v502_v38 }
  0x30   :  { %1535 = vmatpush.xpose.msk.msrb.mxu2 %vm42_vm0, %v1799_v34  ;;  %1531 = vmatpush.xpose.msk.msrb.mxu0 %vm42_vm0, %v1780_v27 }
  0x31   :  { %1522 = vmatmul.msk.f32.vlgmr.msrb.gmra.mxu3 %vm42_vm0, %v503_v39  ;;  %1518 = vmatmul.msk.f32.vlgmr.msrb.gmra.mxu1 %vm42_vm0, %v505_v40 }
  0x32   :  { %1537 = vmatpush.xpose.msk.msrb.mxu3 %vm42_vm0, %v1805_v36  ;;  %1533 = vmatpush.xpose.msk.msrb.mxu1 %vm42_vm0, %v1789_v30 }
  0x37   :  { %1524 = vmatmul.msk.f32.vlgmr.msra.gmra.mxu0 %vm42_vm0, %v709_v41  ;;  %1528 = vmatmul.msk.f32.vlgmr.msra.gmra.mxu2 %vm42_vm0, %v707_v42  ;;  %v1960_v42 = vld [vmem:[%s2032_s2 + $0x8] sm:$0xff]  ;;  %s1620_s2 = smov [#allocation2]  }
  0x38   :  { %1543 = vmatpush.xpose.msk.msra.mxu2 %vm42_vm0, %v1780_v27  ;;  %1539 = vmatpush.xpose.msk.msra.mxu0 %vm42_vm0, %v1796_v33  ;;  %vm22_vm6 = vcmp.eq.s32.totalorder %v1960_v42, 1  ;;  %vm24_vm7 = vcmp.eq.s32.totalorder %v1960_v42, 2  ;;  %vm26_vm8 = vcmp.eq.s32.totalorder %v1960_v42, 3  ;;  %vm28_vm9 = vcmp.eq.s32.totalorder %v1960_v42, 4  ;;  %s1461_s26 = sshll.u32 %s1620_s2, 4  ;;  %s1462_s26 = int_to_ptr.vmem [resolvable:$true] %s1461_s26 }
  0x39   :  { %1530 = vmatmul.msk.f32.vlgmr.msra.gmra.mxu3 %vm42_vm0, %v708_v43  ;;  %1526 = vmatmul.msk.f32.vlgmr.msra.gmra.mxu1 %vm42_vm0, %v710_v44 }
  0x3a   :  { %1545 = vmatpush.xpose.msk.msra.mxu3 %vm42_vm0, %v1789_v30  ;;  %1541 = vmatpush.xpose.msk.msra.mxu1 %vm42_vm0, %v1802_v35 }
  0x3f   :  { %1532 = vmatmul.msk.f32.vlgmr.msrb.gmra.mxu0 %vm42_vm0, %v705_v45  ;;  %1536 = vmatmul.msk.f32.vlgmr.msrb.gmra.mxu2 %vm42_vm0, %v875_v46 }
  0x40   :  { %1551 = vmatpush.xpose.msk.msrb.mxu2 %vm42_vm0, %v1796_v33  ;;  %1547 = vmatpush.xpose.msk.msrb.mxu0 %vm42_vm0, %v1799_v34 }
  0x41   :  { %1538 = vmatmul.msk.f32.vlgmr.msrb.gmra.mxu3 %vm42_vm0, %v876_v47  ;;  %1534 = vmatmul.msk.f32.vlgmr.msrb.gmra.mxu1 %vm42_vm0, %v706_v48 }
  0x42   :  { %1553 = vmatpush.xpose.msk.msrb.mxu3 %vm42_vm0, %v1802_v35  ;;  %1549 = vmatpush.xpose.msk.msrb.mxu1 %vm42_vm0, %v1805_v36 }
  0x47   :  { %1540 = vmatmul.msk.f32.vlgmr.msra.gmra.mxu0 %vm42_vm0, %v873_v49  ;;  %1544 = vmatmul.msk.f32.vlgmr.msra.gmra.mxu2 %vm42_vm0, %v871_v50 }
  0x48   :  { %1559 = vmatpush.xpose.msk.msra.mxu2 %vm42_vm0, %v1799_v34  ;;  %1555 = vmatpush.xpose.msk.msra.mxu0 %vm42_vm0, %v1780_v27 }
  0x49   :  { %1546 = vmatmul.msk.f32.vlgmr.msra.gmra.mxu3 %vm42_vm0, %v872_v51  ;;  %1542 = vmatmul.msk.f32.vlgmr.msra.gmra.mxu1 %vm42_vm0, %v874_v52 }
  0x4a   :  { %1561 = vmatpush.xpose.msk.msra.mxu3 %vm42_vm0, %v1805_v36  ;;  %1557 = vmatpush.xpose.msk.msra.mxu1 %vm42_vm0, %v1789_v30 }
  0x4f   :  { %1548 = vmatmul.msk.f32.vlgmr.msrb.gmra.mxu0 %vm42_vm0, %v1023_v53  ;;  %1552 = vmatmul.msk.f32.vlgmr.msrb.gmra.mxu2 %vm42_vm0, %v1021_v54 }
  0x50   :  { %1567 = vmatpush.xpose.msk.msrb.mxu2 %vm42_vm0, %v1780_v27  ;;  %1563 = vmatpush.xpose.msk.msrb.mxu0 %vm42_vm0, %v1796_v33 }
  0x51   :  { %1554 = vmatmul.msk.f32.vlgmr.msrb.gmra.mxu3 %vm42_vm0, %v1022_v55  ;;  %1550 = vmatmul.msk.f32.vlgmr.msrb.gmra.mxu1 %vm42_vm0, %v1024_v56 }
  0x52   :  { %1569 = vmatpush.xpose.msk.msrb.mxu3 %vm42_vm0, %v1789_v30  ;;  %1565 = vmatpush.xpose.msk.msrb.mxu1 %vm42_vm0, %v1802_v35 }
  0x57   :  { %1556 = vmatmul.msk.f32.vlgmr.msra.gmra.mxu0 %vm42_vm0, %v1019_v57  ;;  %1560 = vmatmul.msk.f32.vlgmr.msra.gmra.mxu2 %vm42_vm0, %v1171_v58 }
  0x58   :  { %1427 = vmatpush.msra.mxu2 %v1651_v0  ;;  %1381 = vmatpush.msra.mxu0 %v1780_v27 }
  0x59   :  { %1562 = vmatmul.msk.f32.vlgmr.msra.gmra.mxu3 %vm42_vm0, %v1172_v59  ;;  %1558 = vmatmul.msk.f32.vlgmr.msra.gmra.mxu1 %vm42_vm0, %v1020_v60 }
  0x5a   :  { %1450 = vmatpush.msra.mxu3 %v1656_v1  ;;  %1404 = vmatpush.msra.mxu1 %v1789_v30 }
  0x5f   :  { %1564 = vmatmul.msk.f32.vlgmr.msrb.gmra.mxu0 %vm42_vm0, %v1169_v61  ;;  %1568 = vmatmul.msk.f32.vlgmr.msrb.gmra.mxu2 %vm42_vm0, %v1167_v62 }
  0x61   :  { %1570 = vmatmul.msk.f32.vlgmr.msrb.gmra.mxu3 %vm42_vm0, %v1168_v63  ;;  %1566 = vmatmul.msk.f32.vlgmr.msrb.gmra.mxu1 %vm42_vm0, %v1170_v2 }
  0x84   :  { %v66_v0 = vpop.f32.mrf.mxu0 }
  0x86   :  { %v92_v1 = vpop.f32.mrf.mxu1 }
  0x8a   :  { %v118_v3 = vpop.f32.mrf.mxu2 }
  0x8b   :  { %v119_v19 = vadd.f32 %v118_v3, %v66_v0 }
  0x8c   :  { %v144_v4 = vpop.f32.mrf.mxu3  ;;  %v172_v5 = vpop.f32.mrf.mxu0 }
  0x8d   :  { %v147_v22 = vmul.f32 -0.8, %v119_v19  ;;  %v145_v25 = vadd.f32 %v144_v4, %v92_v1 }
  0x8e   :  { %v198_v6 = vpop.f32.mrf.mxu1 }
  0x8f   :  { %v173_v33 = vadd.f32 %v172_v5, %v147_v22  ;;  %v148_v37 = vmul.f32 -0.8, %v145_v25 }
  0x91   :  { %v201_v41 = vsel %vm21_vm1, %v173_v33, -9e+15  ;;  %v199_v49 = vadd.f32 %v198_v6, %v148_v37 }
  0x92   :  { %v230_v7 = vpop.f32.mrf.mxu2 }
  0x93   :  { %v202_v58 = vsel %vm22_vm6, %v199_v49, -9e+15 }
  0x94   :  { %v253_v8 = vpop.f32.mrf.mxu3  ;;  %v276_v9 = vpop.f32.mrf.mxu0 }
  0x95   :  { %v277_v21 = vadd.f32 %v276_v9, %v230_v7 }
  0x96   :  { %v299_v10 = vpop.f32.mrf.mxu1 }
  0x97   :  { %v302_v29 = vmul.f32 -0.8, %v277_v21  ;;  %v300_v30 = vadd.f32 %v299_v10, %v253_v8 }
  0x99   :  { %v303_v39 = vmul.f32 -0.8, %v300_v30 }
  0x9a   :  { %v324_v11 = vpop.f32.mrf.mxu2 }
  0x9b   :  { %v325_v35 = vadd.f32 %v324_v11, %v302_v29 }
  0x9c   :  { %v347_v12 = vpop.f32.mrf.mxu3  ;;  %v379_v13 = vpop.f32.mrf.mxu0 }
  0x9d   :  { %v350_v45 = vsel %vm23_vm2, %v325_v35, %v201_v41  ;;  %v348_v52 = vadd.f32 %v347_v12, %v303_v39 }
  0x9e   :  { %v402_v14 = vpop.f32.mrf.mxu1 }
  0x9f   :  { %v351_v59 = vsel %vm24_vm7, %v348_v52, %v202_v58 }
  0xa2   :  { %v425_v15 = vpop.f32.mrf.mxu2 }
  0xa3   :  { %v426_v20 = vadd.f32 %v425_v15, %v379_v13 }
  0xa4   :  { %v448_v16 = vpop.f32.mrf.mxu3  ;;  %v473_v17 = vpop.f32.mrf.mxu0 }
  0xa5   :  { %v451_v27 = vmul.f32 -0.8, %v426_v20  ;;  %v449_v34 = vadd.f32 %v448_v16, %v402_v14 }
  0xa6   :  { %v496_v18 = vpop.f32.mrf.mxu1 }
  0xa7   :  { %v474_v38 = vadd.f32 %v473_v17, %v451_v27  ;;  %v452_v43 = vmul.f32 -0.8, %v449_v34 }
  0xa9   :  { %v499_v51 = vsel %vm25_vm3, %v474_v38, %v350_v45  ;;  %v497_v55 = vadd.f32 %v496_v18, %v452_v43 }
  0xaa   :  { %v528_v23 = vpop.f32.mrf.mxu2 }
  0xab   :  { %v500_v61 = vsel %vm26_vm8, %v497_v55, %v351_v59 }
  0xac   :  { %v551_v24 = vpop.f32.mrf.mxu3  ;;  %v574_v28 = vpop.f32.mrf.mxu0 }
  0xad   :  { %v575_v31 = vadd.f32 %v574_v28, %v528_v23 }
  0xae   :  { %v597_v32 = vpop.f32.mrf.mxu1 }
  0xaf   :  { %v598_v36 = vadd.f32 %v597_v32, %v551_v24  ;;  %v600_v40 = vmul.f32 -0.8, %v575_v31 }
  0xb1   :  { %v601_v46 = vmul.f32 -0.8, %v598_v36 }
  0xb2   :  { %v622_v44 = vpop.f32.mrf.mxu2 }
  0xb3   :  { %v623_v47 = vadd.f32 %v622_v44, %v600_v40 }
  0xb4   :  { %v645_v48 = vpop.f32.mrf.mxu3  ;;  %v734_v50 = vpop.f32.mrf.mxu0 }
  0xb5   :  { %v1970_v54 = vsel %vm27_vm4, %v623_v47, %v499_v51  ;;  %v646_v57 = vadd.f32 %v645_v48, %v601_v46 }
  0xb6   :  { %v760_v53 = vpop.f32.mrf.mxu1  ;;  %v651_v56 = vsel %vm650_vm5, %v1970_v54, -inf }
  0xb7   :  { %652 = vmax.xlane.f32.xlu0 %v651_v56  ;;  %v1985_v63 = vsel %vm28_vm9, %v646_v57, %v500_v61 }
  0xb8   :  { %v654_v1 = vsel %vm650_vm5, %v1985_v63, -inf }
  0xba   :  { %v786_v60 = vpop.f32.mrf.mxu2 }
  0xbb   :  { %v787_v15 = vadd.f32 %v786_v60, %v734_v50 }
  0xbc   :  { %v812_v62 = vpop.f32.mrf.mxu3  ;;  %v840_v2 = vpop.f32.mrf.mxu0 }
  0xbd   :  { %v815_v18 = vmul.f32 -0.8, %v787_v15  ;;  %v813_v21 = vadd.f32 %v812_v62, %v760_v53 }
  0xbe   :  { %v866_v0 = vpop.f32.mrf.mxu1 }
  0xbf   :  { %655 = vmax.xlane.f32.xlu0 %v654_v1  ;;  %v841_v29 = vadd.f32 %v840_v2, %v815_v18  ;;  %v816_v33 = vmul.f32 -0.8, %v813_v21 }
  0xc1   :  { %v869_v37 = vsel %vm21_vm1, %v841_v29, -9e+15  ;;  %v867_v44 = vadd.f32 %v866_v0, %v816_v33 }
  0xc2   :  { %v897_v3 = vpop.f32.mrf.mxu2 }
  0xc3   :  { %v870_v52 = vsel %vm22_vm6, %v867_v44, -9e+15 }
  0xc4   :  { %v920_v4 = vpop.f32.mrf.mxu3  ;;  %v943_v5 = vpop.f32.mrf.mxu0 }
  0xc5   :  { %v944_v17 = vadd.f32 %v943_v5, %v897_v3 }
  0xc6   :  { %v966_v6 = vpop.f32.mrf.mxu1 }
  0xc7   :  { %v969_v24 = vmul.f32 -0.8, %v944_v17  ;;  %v967_v25 = vadd.f32 %v966_v6, %v920_v4 }
  0xc9   :  { %v970_v35 = vmul.f32 -0.8, %v967_v25 }
  0xca   :  { %v991_v7 = vpop.f32.mrf.mxu2 }
  0xcb   :  { %v992_v31 = vadd.f32 %v991_v7, %v969_v24 }
  0xcc   :  { %v1014_v8 = vpop.f32.mrf.mxu3  ;;  %v1045_v9 = vpop.f32.mrf.mxu0 }
  0xcd   :  { %v1017_v40 = vsel %vm23_vm2, %v992_v31, %v869_v37  ;;  %v1015_v47 = vadd.f32 %v1014_v8, %v970_v35 }
  0xce   :  { %v1068_v10 = vpop.f32.mrf.mxu1 }
  0xcf   :  { %v1018_v53 = vsel %vm24_vm7, %v1015_v47, %v870_v52 }
  0xd2   :  { %v1091_v11 = vpop.f32.mrf.mxu2 }
  0xd3   :  { %v1092_v16 = vadd.f32 %v1091_v11, %v1045_v9 }
  0xd4   :  { %v1114_v12 = vpop.f32.mrf.mxu3  ;;  %v1139_v13 = vpop.f32.mrf.mxu0 }
  0xd5   :  { %v1117_v22 = vmul.f32 -0.8, %v1092_v16  ;;  %v1115_v30 = vadd.f32 %v1114_v12, %v1068_v10 }
  0xd6   :  { %v1162_v14 = vpop.f32.mrf.mxu1 }
  0xd7   :  { %v1140_v34 = vadd.f32 %v1139_v13, %v1117_v22  ;;  %v1118_v38 = vmul.f32 -0.8, %v1115_v30 }
  0xd9   :  { %v1165_v46 = vsel %vm25_vm3, %v1140_v34, %v1017_v40  ;;  %v1163_v49 = vadd.f32 %v1162_v14, %v1118_v38 }
  0xda   :  { %v1193_v19 = vpop.f32.mrf.mxu2 }
  0xdb   :  { %v1166_v55 = vsel %vm26_vm8, %v1163_v49, %v1018_v53 }
  0xdc   :  { %v1216_v20 = vpop.f32.mrf.mxu3  ;;  %v1239_v23 = vpop.f32.mrf.mxu0 }
  0xdd   :  { %v1240_v27 = vadd.f32 %v1239_v23, %v1193_v19 }
  0xde   :  { %v1262_v28 = vpop.f32.mrf.mxu1 }
  0xdf   :  { %v1263_v32 = vadd.f32 %v1262_v28, %v1216_v20  ;;  %v1265_v36 = vmul.f32 -0.8, %v1240_v27 }
  0xe1   :  { %v1266_v41 = vmul.f32 -0.8, %v1263_v32 }
  0xe2   :  { %v1287_v39 = vpop.f32.mrf.mxu2 }
  0xe3   :  { %v1288_v43 = vadd.f32 %v1287_v39, %v1265_v36 }
  0xe4   :  { %v1310_v45 = vpop.f32.mrf.mxu3 }
  0xe5   :  { %v1313_v48 = vsel %vm27_vm4, %v1288_v43, %v1165_v46  ;;  %v1311_v51 = vadd.f32 %v1310_v45, %v1266_v41 }
  0xe6   :  { %v1315_v50 = vsel %vm650_vm5, %v1313_v48, -inf }
  0xe7   :  { %1316 = vmax.xlane.f32.xlu1 %v1315_v50  ;;  %v1314_v56 = vsel %vm28_vm9, %v1311_v51, %v1166_v55 }
  0xe8   :  { %v1318_v26 = vsel %vm650_vm5, %v1314_v56, -inf }
  0xef   :  { %1319 = vmax.xlane.f32.xlu1 %v1318_v26 }
 0x12a   :  { %v653_v57 = vpop.xlane.xlu0 %652 }
 0x12b   :  { %v657_v58 = vsub.f32 %v1970_v54, %v653_v57 }
 0x12d   :  { %v659_v59 = vmul.f32 1.442695, %v657_v58 }
 0x12f   :  { %1578 = vpow2.f32 %v659_v59 }
 0x132   :  { %v656_v60 = vpop.xlane.xlu0 %655 }
 0x133   :  { %v658_v61 = vsub.f32 %v1985_v63, %v656_v60 }
 0x135   :  { %v1579_v62 = vpop.eup %1578  ;;  %v661_v2 = vmul.f32 1.442695, %v658_v61 }
 0x136   :  { %v663_v0 = vsel %vm650_vm5, %v1579_v62, 0.0 }
 0x137   :  { %1580 = vpow2.f32 %v661_v2  ;;  %664 = vadd.xlane.f32.xlu2 %v663_v0 }
 0x13d   :  { %v1581_v1 = vpop.eup %1580 }
 0x13e   :  { %v666_v42 = vsel %vm650_vm5, %v1581_v1, 0.0 }
 0x13f   :  { %667 = vadd.xlane.f32.xlu2 %v666_v42 }
 0x15a   :  { %v1317_v3 = vpop.xlane.xlu1 %1316 }
 0x15b   :  { %v1321_v4 = vsub.f32 %v1313_v48, %v1317_v3 }
 0x15d   :  { %v1323_v5 = vmul.f32 1.442695, %v1321_v4 }
 0x15f   :  { %1582 = vpow2.f32 %v1323_v5 }
 0x162   :  { %v1320_v54 = vpop.xlane.xlu1 %1319 }
 0x163   :  { %v1322_v6 = vsub.f32 %v1314_v56, %v1320_v54 }
 0x165   :  { %v2011_v7 = vpop.eup %1582  ;;  %v1325_v8 = vmul.f32 1.442695, %v1322_v6 }
 0x166   :  { %v1327_v63 = vsel %vm650_vm5, %v2011_v7, 0.0 }
 0x167   :  { %1584 = vpow2.f32 %v1325_v8  ;;  %1328 = vadd.xlane.f32.xlu0 %v1327_v63 }
 0x16d   :  { %v2015_v9 = vpop.eup %1584 }
 0x16e   :  { %v1330_v10 = vsel %vm650_vm5, %v2015_v9, 0.0 }
 0x16f   :  { %1331 = vadd.xlane.f32.xlu1 %v1330_v10 }
 0x1aa   :  { %v665_v11 = vpop.xlane.xlu2 %664 }
 0x1ab   :  { %1586 = vrcp.f32 %v665_v11  ;;  %v680_v16 = vand.u32 2147483648, %v665_v11  ;;  %v678_v18 = vand.u32 2147483647, %v665_v11  ;;  %vm674_vm11 = vweird.f32 %v665_v11 }
 0x1ad   :  { %v681_v21 = vor.u32 1.1754944e-38, %v680_v16  ;;  %vm679_vm13 = vcmp.eq.f32.partialorder %v678_v18, 8.507059e+37 }
 0x1b1   :  { %v1587_v12 = vpop.eup %1586 }
 0x1b2   :  { %v670_v13 = vmul.f32 %v1587_v12, %v665_v11  ;;  %v668_v14 = vpop.xlane.xlu2 %667  ;;  %vm675_vm10 = vweird.f32 %v1587_v12 }
 0x1b3   :  { %1588 = vrcp.f32 %v668_v14  ;;  %vm676_vm12 = vmor %vm674_vm11, %vm675_vm10  ;;  %v695_v28 = vand.u32 2147483648, %v668_v14  ;;  %v693_v30 = vand.u32 2147483647, %v668_v14  ;;  %vm689_vm15 = vweird.f32 %v668_v14 }
 0x1b4   :  { %v671_v15 = vsub.f32 1.0, %v670_v13 }
 0x1b5   :  { %v696_v32 = vor.u32 1.1754944e-38, %v695_v28  ;;  %vm694_vm2 = vcmp.eq.f32.partialorder %v693_v30, 8.507059e+37 }
 0x1b6   :  { %v672_v17 = vmul.f32 %v1587_v12, %v671_v15 }
 0x1b8   :  { %v673_v19 = vadd.f32 %v1587_v12, %v672_v17 }
 0x1b9   :  { %v1589_v20 = vpop.eup %1588 }
 0x1ba   :  { %v677_v22 = vsel %vm676_vm12, %v1587_v12, %v673_v19  ;;  %v685_v23 = vmul.f32 %v1589_v20, %v668_v14  ;;  %vm690_vm14 = vweird.f32 %v1589_v20 }
 0x1bb   :  { %v682_v24 = vsel %vm679_vm13, %v681_v21, %v677_v22  ;;  %vm691_vm1 = vmor %vm689_vm15, %vm690_vm14 }
 0x1bc   :  { %v686_v25 = vsub.f32 1.0, %v685_v23  ;;  %v683_v27 = vmul.f32 %v1579_v62, %v682_v24 }
 0x1be   :  { %v687_v29 = vmul.f32 %v1589_v20, %v686_v25  ;;  %1573 = vmatmul.msk.f32.vlgmr.msra.gmra.mxu2 %vm650_vm5, %v683_v27 }
 0x1c0   :  { %v688_v31 = vadd.f32 %v1589_v20, %v687_v29 }
 0x1c2   :  { %v692_v33 = vsel %vm691_vm1, %v1589_v20, %v688_v31 }
 0x1c3   :  { %v697_v34 = vsel %vm694_vm2, %v696_v32, %v692_v33 }
 0x1c4   :  { %v698_v35 = vmul.f32 %v1581_v1, %v697_v34 }
 0x1c6   :  { %1574 = vmatmul.msk.f32.vlgmr.msra.gmra.mxu3 %vm650_vm5, %v698_v35 }
 0x1da   :  { %v1329_v36 = vpop.xlane.xlu0 %1328 }
 0x1db   :  { %1590 = vrcp.f32 %v1329_v36  ;;  %v1344_v41 = vand.u32 2147483648, %v1329_v36  ;;  %v1342_v44 = vand.u32 2147483647, %v1329_v36  ;;  %vm1338_vm4 = vweird.f32 %v1329_v36 }
 0x1dd   :  { %v1345_v47 = vor.u32 1.1754944e-38, %v1344_v41  ;;  %vm1343_vm7 = vcmp.eq.f32.partialorder %v1342_v44, 8.507059e+37 }
 0x1e1   :  { %v1591_v37 = vpop.eup %1590 }
 0x1e2   :  { %v1334_v38 = vmul.f32 %v1591_v37, %v1329_v36  ;;  %v1332_v39 = vpop.xlane.xlu1 %1331  ;;  %vm1339_vm3 = vweird.f32 %v1591_v37 }
 0x1e3   :  { %1592 = vrcp.f32 %v1332_v39  ;;  %vm1340_vm6 = vmor %vm1338_vm4, %vm1339_vm3  ;;  %v1359_v53 = vand.u32 2147483648, %v1332_v39  ;;  %v1357_v56 = vand.u32 2147483647, %v1332_v39  ;;  %vm1353_vm9 = vweird.f32 %v1332_v39 }
 0x1e4   :  { %v1335_v40 = vsub.f32 1.0, %v1334_v38 }
 0x1e5   :  { %v1360_v57 = vor.u32 1.1754944e-38, %v1359_v53  ;;  %vm1358_vm11 = vcmp.eq.f32.partialorder %v1357_v56, 8.507059e+37 }
 0x1e6   :  { %v1336_v43 = vmul.f32 %v1591_v37, %v1335_v40 }
 0x1e8   :  { %v1337_v45 = vadd.f32 %v1591_v37, %v1336_v43 }
 0x1e9   :  { %v1593_v46 = vpop.eup %1592 }
 0x1ea   :  { %v1341_v48 = vsel %vm1340_vm6, %v1591_v37, %v1337_v45  ;;  %v1349_v49 = vmul.f32 %v1593_v46, %v1332_v39  ;;  %vm1354_vm8 = vweird.f32 %v1593_v46 }
 0x1eb   :  { %v1346_v50 = vsel %vm1343_vm7, %v1345_v47, %v1341_v48  ;;  %vm1355_vm10 = vmor %vm1353_vm9, %vm1354_vm8 }
 0x1ec   :  { %v1347_v51 = vmul.f32 %v2011_v7, %v1346_v50  ;;  %v1350_v52 = vsub.f32 1.0, %v1349_v49 }
 0x1ee   :  { %v1351_v55 = vmul.f32 %v1593_v46, %v1350_v52  ;;  %1571 = vmatmul.msk.f32.vlgmr.msra.gmra.mxu0 %vm650_vm5, %v1347_v51 }
 0x1f0   :  { %v1352_v26 = vadd.f32 %v1593_v46, %v1351_v55 }
 0x1f2   :  { %v1356_v58 = vsel %vm1355_vm10, %v1593_v46, %v1352_v26 }
 0x1f3   :  { %v1361_v59 = vsel %vm1358_vm11, %v1360_v57, %v1356_v58 }
 0x1f4   :  { %v1362_v60 = vmul.f32 %v2015_v9, %v1361_v59 }
 0x1f6   :  { %1572 = vmatmul.msk.f32.vlgmr.msra.gmra.mxu1 %vm650_vm5, %v1362_v60 }
 0x241   :  { %v1429_v61 = vpop.f32.mrf.mxu2 }
 0x249   :  { %v1452_v0 = vpop.f32.mrf.mxu3 }
 0x26b   :  { %v1383_v62 = vpop.f32.mrf.mxu0 }
 0x26c   :  { %v1430_v2 = vadd.f32 %v1429_v61, %v1383_v62 }
 0x26e   :  { %1455 = vst.msk [vmem:[#allocation2] sm:$0xff] %vm42_vm0, %v1430_v2 }
 0x273   :  { %v1406_v1 = vpop.f32.mrf.mxu1 }
 0x274   :  { %v1453_v42 = vadd.f32 %v1452_v0, %v1406_v1 }
 0x276   :  { %1456 = vst.msk [vmem:[#allocation2 + $0x8] sm:$0xff] %vm42_vm0, %v1453_v42 }
 0x277   :  { %1469 = dma.vmem_to_hbm [thread:$0]  %s1462_s26, 256, %s1464_s29, [#allocation3], %s1621_s30, %s1621_s30, %s1622_s5  }
 0x278   :  { %1618 = dma.done.wait [#allocation3], 256  }
 0x279   :  { %1619 = vsyncadd [#allocation3], 4294967040 }
 0x27a   :  { %1474 = vsyncpa [#allocation3], 1 }

</bundles_post_ra>
